<compile_context>
chip_gen: v7x
topology: tpu7x:2x2x1
jax: 0.10.0
libtpu: 0.0.40
codegen_flags: <defaults>
</compile_context>

<pallas_src>
import functools

import jax
import jax.numpy as jnp
from jax.experimental import pallas as pl
from jax.experimental.pallas import tpu as pltpu


# ----------------------------------------------------------------------------
# One fused bidirectional LSTM layer (runs inside the kernel trace)
# ----------------------------------------------------------------------------
def _bidir_lstm_layer(x_ref, gx_ref, y_ref, wih, whh, bias, *, seq, bp, H):
    """x_ref: (seq*bp, W) f32 time-major input slab (row t*bp + b <-> (t, b)).
    gx_ref: (seq*bp, 8H) f32 scratch for the hoisted input projection.
    y_ref : (seq*bp, W) f32 per-step output slab, or None for the last layer.
    wih   : (W, 8H) bf16, whh: (2H, 8H) bf16 (block-diagonal), bias: (1, 8H) f32.
    Returns final h_cat = [h_fw | h_bw] of shape (bp, 2H), f32."""
    G = 4 * H

    # Hoisted input projection: ONE matmul covers all timesteps and both directions.
    gx_ref[...] = jnp.dot(x_ref[...].astype(jnp.bfloat16), wih,
                          preferred_element_type=jnp.float32) + bias

    h_cat = jnp.zeros((bp, 2 * H), jnp.float32)
    c_f = jnp.zeros((bp, H), jnp.float32)
    c_b = jnp.zeros((bp, H), jnp.float32)

    def cell(g, c):
        i = jax.nn.sigmoid(g[:, 0:H])
        f = jax.nn.sigmoid(g[:, H:2 * H])
        gg = jnp.tanh(g[:, 2 * H:3 * H])
        o = jax.nn.sigmoid(g[:, 3 * H:4 * H])
        c_new = f * c + i * gg
        return o * jnp.tanh(c_new), c_new

    # Serial recurrence, fully unrolled at trace time (static indices everywhere).
    for t in range(seq):
        rt = seq - 1 - t
        # Single 256-wide recurrent matmul for BOTH directions (block-diagonal whh).
        hmat = jnp.dot(h_cat.astype(jnp.bfloat16), whh,
                       preferred_element_type=jnp.float32)            # (bp, 8H)
        g_f = gx_ref[t * bp:(t + 1) * bp, 0:G] + hmat[:, 0:G]
        g_b = gx_ref[rt * bp:(rt + 1) * bp, G:2 * G] + hmat[:, G:2 * G]
        h_f, c_f = cell(g_f, c_f)
        h_b, c_b = cell(g_b, c_b)
        h_cat = jnp.concatenate([h_f, h_b], axis=1)
        if y_ref is not None:
            y_ref[t * bp:(t + 1) * bp, 0:H] = h_f
            y_ref[rt * bp:(rt + 1) * bp, H:2 * H] = h_b
    return h_cat


# ----------------------------------------------------------------------------
# Fused whole-model kernel: embedding gather + all layers + FC classifier
# ----------------------------------------------------------------------------
def _textrnn_kernel(ids_ref, emb_ref, wih_ref, whh_ref, b_ref, fcw_ref, fcb_ref,
                    out_ref, xa_ref, xb_ref, gx_ref,
                    *, seq, batch, bp, E, H, L):
    # --- Embedding gather: ids live in SMEM, table in VMEM, x slab built in VMEM ---
    xa_ref[...] = jnp.zeros_like(xa_ref)   # zero padded batch rows / unused columns
    xb_ref[...] = jnp.zeros_like(xb_ref)
    for t in range(seq):
        for b in range(batch):
            tok = ids_ref[b, t]            # original text layout is (batch, seq)
            row = t * bp + b
            xa_ref[row:row + 1, 0:E] = emb_ref[pl.ds(tok, 1), :]

    # --- Stacked bidirectional LSTM layers (activations ping-pong in VMEM) ---------
    slabs = (xa_ref, xb_ref)
    h_cat = None
    for l in range(L):
        x_in = slabs[l % 2]
        y_out = slabs[(l + 1) % 2] if l < L - 1 else None   # last layer: hidden only
        h_cat = _bidir_lstm_layer(x_in, gx_ref, y_out,
                                  wih_ref[l], whh_ref[l], b_ref[l],
                                  seq=seq, bp=bp, H=H)

    # --- Fused FC classifier on concat(h_fw_final, h_bw_final) ---------------------
    out_ref[...] = jnp.dot(h_cat.astype(jnp.bfloat16), fcw_ref[...],
                           preferred_element_type=jnp.float32) + fcb_ref[...]


# ----------------------------------------------------------------------------
# Host-side wrapper
# ----------------------------------------------------------------------------
def text_rnn_forward(text, params, *, class_num):
    batch, seq = text.shape
    emb = params["embedding"]       # (vocab, E)   f32
    wih = params["wih"]             # (L, W, 8H)   bf16
    whh = params["whh"]             # (L, 2H, 8H)  bf16
    bias = params["b"]              # (L, 1, 8H)   f32
    fcw = params["fc_w_t"]          # (2H, CP)     bf16
    fcb = params["fc_b"]            # (1, CP)      f32

    L, W, _ = wih.shape
    H = whh.shape[1] // 2
    E = emb.shape[1]
    CP = fcw.shape[1]
    bp = max(8, ((batch + 7) // 8) * 8)     # pad batch to sublane multiple
    rows = seq * bp

    kernel = functools.partial(_textrnn_kernel, seq=seq, batch=batch, bp=bp,
                               E=E, H=H, L=L)
    out = pl.pallas_call(
        kernel,
        out_shape=jax.ShapeDtypeStruct((bp, CP), jnp.float32),
        in_specs=[
            pl.BlockSpec(memory_space=pltpu.MemorySpace.SMEM),   # token ids
            pl.BlockSpec(memory_space=pltpu.MemorySpace.VMEM),   # embedding table
            pl.BlockSpec(memory_space=pltpu.MemorySpace.VMEM),   # W_ih (stacked)
            pl.BlockSpec(memory_space=pltpu.MemorySpace.VMEM),   # W_hh (stacked, blkdiag)
            pl.BlockSpec(memory_space=pltpu.MemorySpace.VMEM),   # biases (stacked)
            pl.BlockSpec(memory_space=pltpu.MemorySpace.VMEM),   # FC weight
            pl.BlockSpec(memory_space=pltpu.MemorySpace.VMEM),   # FC bias
        ],
        out_specs=pl.BlockSpec(memory_space=pltpu.MemorySpace.VMEM),
        scratch_shapes=[
            pltpu.VMEM((rows, W), jnp.float32),        # activation slab A
            pltpu.VMEM((rows, W), jnp.float32),        # activation slab B
            pltpu.VMEM((rows, 8 * H), jnp.float32),    # hoisted input-projection gates
        ],
    )(text, emb, wih, whh, bias, fcw, fcb)

    return out[:batch, :class_num]       # both slice bounds are static Python ints


# ----------------------------------------------------------------------------
# Deterministic parameters (PyTorch layout -> packed kernel layout)
# ----------------------------------------------------------------------------
def make_params(key, vocab, embed_dim, hidden, num_layers, class_num):
    H, E, C = hidden, embed_dim, class_num
    G = 4 * H
    W = max(E, 2 * H)
    CP = max(128, ((C + 127) // 128) * 128)
    k = 1.0 / (H ** 0.5)

    keys = jax.random.split(key, 2 + num_layers * 2)
    emb = jax.random.normal(keys[0], (vocab, E), jnp.float32) * 0.5

    wih_all = jnp.zeros((num_layers, W, 2 * G), jnp.float32)
    whh_all = jnp.zeros((num_layers, 2 * H, 2 * G), jnp.float32)
    b_all = jnp.zeros((num_layers, 1, 2 * G), jnp.float32)
    raw_layers = []

    for l in range(num_layers):
        in_size = E if l == 0 else 2 * H
        dirs = []
        for d in range(2):                          # 0 = forward, 1 = backward
            kk = jax.random.split(keys[1 + l * 2 + d], 4)
            w_ih = jax.random.uniform(kk[0], (G, in_size), jnp.float32, -k, k)
            w_hh = jax.random.uniform(kk[1], (G, H), jnp.float32, -k, k)
            b_ih = jax.random.uniform(kk[2], (G,), jnp.float32, -k, k)
            b_hh = jax.random.uniform(kk[3], (G,), jnp.float32, -k, k)
            # Round once to bf16 so kernel and f32 reference see identical weights.
            w_ih = w_ih.astype(jnp.bfloat16).astype(jnp.float32)
            w_hh = w_hh.astype(jnp.bfloat16).astype(jnp.float32)
            dirs.append(dict(w_ih=w_ih, w_hh=w_hh, b_ih=b_ih, b_hh=b_hh))

            c0 = d * G      # fw gate columns [0:G], bw gate columns [G:2G]
            wih_all = wih_all.at[l, 0:in_size, c0:c0 + G].set(w_ih.T)
            whh_all = whh_all.at[l, d * H:(d + 1) * H, c0:c0 + G].set(w_hh.T)
            b_all = b_all.at[l, 0, c0:c0 + G].set(b_ih + b_hh)
        raw_layers.append(dirs)

    kf = jax.random.split(keys[-1], 2)
    kc = 1.0 / ((2 * H) ** 0.5)
    fc_w = jax.random.uniform(kf[0], (C, 2 * H), jnp.float32, -kc, kc)
    fc_b = jax.random.uniform(kf[1], (C,), jnp.float32, -kc, kc)
    fc_w = fc_w.astype(jnp.bfloat16).astype(jnp.float32)

    fcw_t = jnp.zeros((2 * H, CP), jnp.float32).at[:, 0:C].set(fc_w.T)
    fcb = jnp.zeros((1, CP), jnp.float32).at[0, 0:C].set(fc_b)

    packed = {
        "embedding": emb,
        "wih": wih_all.astype(jnp.bfloat16),
        "whh": whh_all.astype(jnp.bfloat16),
        "b": b_all,
        "fc_w_t": fcw_t.astype(jnp.bfloat16),
        "fc_b": fcb,
    }
    raw = {"embedding": emb, "layers": raw_layers, "fc_w": fc_w, "fc_b": fc_b}
    return packed, raw


# ----------------------------------------------------------------------------
# Pure-JAX reference (PyTorch semantics) for a tolerance check
# ----------------------------------------------------------------------------
def reference_forward(text, raw, num_layers, hidden):
    H = hidden

    def bf(x):  # mimic the kernel's bf16 MXU inputs
        return x.astype(jnp.bfloat16).astype(jnp.float32)

    def cell(x_t, h, c, p):
        g = bf(x_t) @ p["w_ih"].T + bf(h) @ p["w_hh"].T + p["b_ih"] + p["b_hh"]
        i = jax.nn.sigmoid(g[:, 0:H])
        f = jax.nn.sigmoid(g[:, H:2 * H])
        gg = jnp.tanh(g[:, 2 * H:3 * H])
        o = jax.nn.sigmoid(g[:, 3 * H:4 * H])
        c = f * c + i * gg
        return o * jnp.tanh(c), c

    batch, seq = text.shape
    xs = jnp.take(raw["embedding"], jnp.transpose(text, (1, 0)), axis=0)  # (S,B,E)
    inp = xs
    h_f = h_b = None
    for l in range(num_layers):
        pf, pb = raw["layers"][l]
        h_f = jnp.zeros((batch, H), jnp.float32); c_f = jnp.zeros_like(h_f)
        h_b = jnp.zeros((batch, H), jnp.float32); c_b = jnp.zeros_like(h_b)
        out_f = [None] * seq
        out_b = [None] * seq
        for t in range(seq):
            h_f, c_f = cell(inp[t], h_f, c_f, pf)
            out_f[t] = h_f
        for t in range(seq - 1, -1, -1):
            h_b, c_b = cell(inp[t], h_b, c_b, pb)
            out_b[t] = h_b
        inp = jnp.stack([jnp.concatenate([out_f[t], out_b[t]], axis=1)
                         for t in range(seq)], axis=0)
    hidden_cat = jnp.concatenate([h_f, h_b], axis=1)        # (batch, 2H)
    return bf(hidden_cat) @ raw["fc_w"].T + raw["fc_b"]


if __name__ == "__main__":
    VOCAB, EMBED_DIM, HIDDEN, NUM_LAYERS, CLASS_NUM = 50, 32, 32, 2, 4
    BATCH, SEQ = 4, 8

    kp, kt = jax.random.split(jax.random.PRNGKey(0))
    packed, raw = make_params(kp, VOCAB, EMBED_DIM, HIDDEN, NUM_LAYERS, CLASS_NUM)
    text = jax.random.randint(kt, (BATCH, SEQ), 0, VOCAB, dtype=jnp.int32)

    fwd = jax.jit(lambda t, p: text_rnn_forward(t, p, class_num=CLASS_NUM))
    out = jax.block_until_ready(fwd(text, packed))
    assert out.shape == (BATCH, CLASS_NUM), out.shape

    ref = jax.block_until_ready(
        jax.jit(lambda t: reference_forward(t, raw, NUM_LAYERS, HIDDEN))(text))
    err = float(jnp.max(jnp.abs(out - ref)))
    scale = float(jnp.max(jnp.abs(ref)))
    assert err <= 1e-2 + 5e-2 * scale, ("mismatch vs reference", err, scale)
    print("KERNEL_OK")
</pallas_src>

<mosaic_0001>
module attributes {stable_mosaic.version = 11 : i64} {
  func.func @_textrnn_kernel(%arg0: memref<4x8xi32, #tpu.memory_space<smem>>, %arg1: memref<50x32xf32, #tpu.memory_space<vmem>>, %arg2: memref<2x64x256xbf16, #tpu.memory_space<vmem>>, %arg3: memref<2x64x256xbf16, #tpu.memory_space<vmem>>, %arg4: memref<2x1x256xf32, #tpu.memory_space<vmem>>, %arg5: memref<64x128xbf16, #tpu.memory_space<vmem>>, %arg6: memref<1x128xf32, #tpu.memory_space<vmem>>, %arg7: memref<8x128xf32, #tpu.memory_space<vmem>>, %arg8: memref<64x64xf32, #tpu.memory_space<vmem>>, %arg9: memref<64x64xf32, #tpu.memory_space<vmem>>, %arg10: memref<64x256xf32, #tpu.memory_space<vmem>>) attributes {dimension_semantics = [], scalar_prefetch = 0 : i64, scratch_operands = 3 : i64, tpu.core_type = #tpu.core_type<tc>} {
    %cst = arith.constant 0.000000e+00 : f32
    %0 = vector.broadcast %cst : f32 to vector<64x64xf32>
    %c0 = arith.constant 0 : index
    %c0_0 = arith.constant 0 : index
    %1 = vector.load %arg8[%c0, %c0_0] : memref<64x64xf32, #tpu.memory_space<vmem>>, vector<64x64xf32>
    tpu.vector_store %arg8[%c0, %c0_0], %0 {strides = array<i32>} : memref<64x64xf32, #tpu.memory_space<vmem>>, vector<64x64xf32>,
    %cst_1 = arith.constant 0.000000e+00 : f32
    %2 = vector.broadcast %cst_1 : f32 to vector<64x64xf32>
    %c0_2 = arith.constant 0 : index
    %c0_3 = arith.constant 0 : index
    %3 = vector.load %arg9[%c0_2, %c0_3] : memref<64x64xf32, #tpu.memory_space<vmem>>, vector<64x64xf32>
    tpu.vector_store %arg9[%c0_2, %c0_3], %2 {strides = array<i32>} : memref<64x64xf32, #tpu.memory_space<vmem>>, vector<64x64xf32>,
    %c0_4 = arith.constant 0 : index
    %c0_5 = arith.constant 0 : index
    %4 = memref.load %arg0[%c0_4, %c0_5] : memref<4x8xi32, #tpu.memory_space<smem>>
    %5 = arith.index_cast %4 : i32 to index
    %c0_6 = arith.constant 0 : index
    %6 = vector.load %arg1[%5, %c0_6] : memref<50x32xf32, #tpu.memory_space<vmem>>, vector<1x32xf32>
    %c0_7 = arith.constant 0 : index
    %c0_8 = arith.constant 0 : index
    %7 = vector.load %arg8[%c0_7, %c0_8] : memref<64x64xf32, #tpu.memory_space<vmem>>, vector<1x32xf32>
    tpu.vector_store %arg8[%c0_7, %c0_8], %6 {strides = array<i32>} : memref<64x64xf32, #tpu.memory_space<vmem>>, vector<1x32xf32>,
    %c1 = arith.constant 1 : index
    %c0_9 = arith.constant 0 : index
    %8 = memref.load %arg0[%c1, %c0_9] : memref<4x8xi32, #tpu.memory_space<smem>>
    %9 = arith.index_cast %8 : i32 to index
    %c0_10 = arith.constant 0 : index
    %10 = vector.load %arg1[%9, %c0_10] : memref<50x32xf32, #tpu.memory_space<vmem>>, vector<1x32xf32>
    %c1_11 = arith.constant 1 : index
    %c0_12 = arith.constant 0 : index
    %11 = vector.load %arg8[%c1_11, %c0_12] : memref<64x64xf32, #tpu.memory_space<vmem>>, vector<1x32xf32>
    tpu.vector_store %arg8[%c1_11, %c0_12], %10 {strides = array<i32>} : memref<64x64xf32, #tpu.memory_space<vmem>>, vector<1x32xf32>,
    %c2 = arith.constant 2 : index
    %c0_13 = arith.constant 0 : index
    %12 = memref.load %arg0[%c2, %c0_13] : memref<4x8xi32, #tpu.memory_space<smem>>
    %13 = arith.index_cast %12 : i32 to index
    %c0_14 = arith.constant 0 : index
    %14 = vector.load %arg1[%13, %c0_14] : memref<50x32xf32, #tpu.memory_space<vmem>>, vector<1x32xf32>
    %c2_15 = arith.constant 2 : index
    %c0_16 = arith.constant 0 : index
    %15 = vector.load %arg8[%c2_15, %c0_16] : memref<64x64xf32, #tpu.memory_space<vmem>>, vector<1x32xf32>
    tpu.vector_store %arg8[%c2_15, %c0_16], %14 {strides = array<i32>} : memref<64x64xf32, #tpu.memory_space<vmem>>, vector<1x32xf32>,
    %c3 = arith.constant 3 : index
    %c0_17 = arith.constant 0 : index
    %16 = memref.load %arg0[%c3, %c0_17] : memref<4x8xi32, #tpu.memory_space<smem>>
    %17 = arith.index_cast %16 : i32 to index
    %c0_18 = arith.constant 0 : index
    %18 = vector.load %arg1[%17, %c0_18] : memref<50x32xf32, #tpu.memory_space<vmem>>, vector<1x32xf32>
    %c3_19 = arith.constant 3 : index
    %c0_20 = arith.constant 0 : index
    %19 = vector.load %arg8[%c3_19, %c0_20] : memref<64x64xf32, #tpu.memory_space<vmem>>, vector<1x32xf32>
    tpu.vector_store %arg8[%c3_19, %c0_20], %18 {strides = array<i32>} : memref<64x64xf32, #tpu.memory_space<vmem>>, vector<1x32xf32>,
    %c0_21 = arith.constant 0 : index
    %c1_22 = arith.constant 1 : index
    %20 = memref.load %arg0[%c0_21, %c1_22] : memref<4x8xi32, #tpu.memory_space<smem>>
    %21 = arith.index_cast %20 : i32 to index
    %c0_23 = arith.constant 0 : index
    %22 = vector.load %arg1[%21, %c0_23] : memref<50x32xf32, #tpu.memory_space<vmem>>, vector<1x32xf32>
    %c8 = arith.constant 8 : index
    %c0_24 = arith.constant 0 : index
    %23 = vector.load %arg8[%c8, %c0_24] : memref<64x64xf32, #tpu.memory_space<vmem>>, vector<1x32xf32>
    tpu.vector_store %arg8[%c8, %c0_24], %22 {strides = array<i32>} : memref<64x64xf32, #tpu.memory_space<vmem>>, vector<1x32xf32>,
    %c1_25 = arith.constant 1 : index
    %c1_26 = arith.constant 1 : index
    %24 = memref.load %arg0[%c1_25, %c1_26] : memref<4x8xi32, #tpu.memory_space<smem>>
    %25 = arith.index_cast %24 : i32 to index
    %c0_27 = arith.constant 0 : index
    %26 = vector.load %arg1[%25, %c0_27] : memref<50x32xf32, #tpu.memory_space<vmem>>, vector<1x32xf32>
    %c9 = arith.constant 9 : index
    %c0_28 = arith.constant 0 : index
    %27 = vector.load %arg8[%c9, %c0_28] : memref<64x64xf32, #tpu.memory_space<vmem>>, vector<1x32xf32>
    tpu.vector_store %arg8[%c9, %c0_28], %26 {strides = array<i32>} : memref<64x64xf32, #tpu.memory_space<vmem>>, vector<1x32xf32>,
    %c2_29 = arith.constant 2 : index
    %c1_30 = arith.constant 1 : index
    %28 = memref.load %arg0[%c2_29, %c1_30] : memref<4x8xi32, #tpu.memory_space<smem>>
    %29 = arith.index_cast %28 : i32 to index
    %c0_31 = arith.constant 0 : index
    %30 = vector.load %arg1[%29, %c0_31] : memref<50x32xf32, #tpu.memory_space<vmem>>, vector<1x32xf32>
    %c10 = arith.constant 10 : index
    %c0_32 = arith.constant 0 : index
    %31 = vector.load %arg8[%c10, %c0_32] : memref<64x64xf32, #tpu.memory_space<vmem>>, vector<1x32xf32>
    tpu.vector_store %arg8[%c10, %c0_32], %30 {strides = array<i32>} : memref<64x64xf32, #tpu.memory_space<vmem>>, vector<1x32xf32>,
    %c3_33 = arith.constant 3 : index
    %c1_34 = arith.constant 1 : index
    %32 = memref.load %arg0[%c3_33, %c1_34] : memref<4x8xi32, #tpu.memory_space<smem>>
    %33 = arith.index_cast %32 : i32 to index
    %c0_35 = arith.constant 0 : index
    %34 = vector.load %arg1[%33, %c0_35] : memref<50x32xf32, #tpu.memory_space<vmem>>, vector<1x32xf32>
    %c11 = arith.constant 11 : index
    %c0_36 = arith.constant 0 : index
    %35 = vector.load %arg8[%c11, %c0_36] : memref<64x64xf32, #tpu.memory_space<vmem>>, vector<1x32xf32>
    tpu.vector_store %arg8[%c11, %c0_36], %34 {strides = array<i32>} : memref<64x64xf32, #tpu.memory_space<vmem>>, vector<1x32xf32>,
    %c0_37 = arith.constant 0 : index
    %c2_38 = arith.constant 2 : index
    %36 = memref.load %arg0[%c0_37, %c2_38] : memref<4x8xi32, #tpu.memory_space<smem>>
    %37 = arith.index_cast %36 : i32 to index
    %c0_39 = arith.constant 0 : index
    %38 = vector.load %arg1[%37, %c0_39] : memref<50x32xf32, #tpu.memory_space<vmem>>, vector<1x32xf32>
    %c16 = arith.constant 16 : index
    %c0_40 = arith.constant 0 : index
    %39 = vector.load %arg8[%c16, %c0_40] : memref<64x64xf32, #tpu.memory_space<vmem>>, vector<1x32xf32>
    tpu.vector_store %arg8[%c16, %c0_40], %38 {strides = array<i32>} : memref<64x64xf32, #tpu.memory_space<vmem>>, vector<1x32xf32>,
    %c1_41 = arith.constant 1 : index
    %c2_42 = arith.constant 2 : index
    %40 = memref.load %arg0[%c1_41, %c2_42] : memref<4x8xi32, #tpu.memory_space<smem>>
    %41 = arith.index_cast %40 : i32 to index
    %c0_43 = arith.constant 0 : index
    %42 = vector.load %arg1[%41, %c0_43] : memref<50x32xf32, #tpu.memory_space<vmem>>, vector<1x32xf32>
    %c17 = arith.constant 17 : index
    %c0_44 = arith.constant 0 : index
    %43 = vector.load %arg8[%c17, %c0_44] : memref<64x64xf32, #tpu.memory_space<vmem>>, vector<1x32xf32>
    tpu.vector_store %arg8[%c17, %c0_44], %42 {strides = array<i32>} : memref<64x64xf32, #tpu.memory_space<vmem>>, vector<1x32xf32>,
    %c2_45 = arith.constant 2 : index
    %c2_46 = arith.constant 2 : index
    %44 = memref.load %arg0[%c2_45, %c2_46] : memref<4x8xi32, #tpu.memory_space<smem>>
    %45 = arith.index_cast %44 : i32 to index
    %c0_47 = arith.constant 0 : index
    %46 = vector.load %arg1[%45, %c0_47] : memref<50x32xf32, #tpu.memory_space<vmem>>, vector<1x32xf32>
    %c18 = arith.constant 18 : index
    %c0_48 = arith.constant 0 : index
    %47 = vector.load %arg8[%c18, %c0_48] : memref<64x64xf32, #tpu.memory_space<vmem>>, vector<1x32xf32>
    tpu.vector_store %arg8[%c18, %c0_48], %46 {strides = array<i32>} : memref<64x64xf32, #tpu.memory_space<vmem>>, vector<1x32xf32>,
    %c3_49 = arith.constant 3 : index
    %c2_50 = arith.constant 2 : index
    %48 = memref.load %arg0[%c3_49, %c2_50] : memref<4x8xi32, #tpu.memory_space<smem>>
    %49 = arith.index_cast %48 : i32 to index
    %c0_51 = arith.constant 0 : index
    %50 = vector.load %arg1[%49, %c0_51] : memref<50x32xf32, #tpu.memory_space<vmem>>, vector<1x32xf32>
    %c19 = arith.constant 19 : index
    %c0_52 = arith.constant 0 : index
    %51 = vector.load %arg8[%c19, %c0_52] : memref<64x64xf32, #tpu.memory_space<vmem>>, vector<1x32xf32>
    tpu.vector_store %arg8[%c19, %c0_52], %50 {strides = array<i32>} : memref<64x64xf32, #tpu.memory_space<vmem>>, vector<1x32xf32>,
    %c0_53 = arith.constant 0 : index
    %c3_54 = arith.constant 3 : index
    %52 = memref.load %arg0[%c0_53, %c3_54] : memref<4x8xi32, #tpu.memory_space<smem>>
    %53 = arith.index_cast %52 : i32 to index
    %c0_55 = arith.constant 0 : index
    %54 = vector.load %arg1[%53, %c0_55] : memref<50x32xf32, #tpu.memory_space<vmem>>, vector<1x32xf32>
    %c24 = arith.constant 24 : index
    %c0_56 = arith.constant 0 : index
    %55 = vector.load %arg8[%c24, %c0_56] : memref<64x64xf32, #tpu.memory_space<vmem>>, vector<1x32xf32>
    tpu.vector_store %arg8[%c24, %c0_56], %54 {strides = array<i32>} : memref<64x64xf32, #tpu.memory_space<vmem>>, vector<1x32xf32>,
    %c1_57 = arith.constant 1 : index
    %c3_58 = arith.constant 3 : index
    %56 = memref.load %arg0[%c1_57, %c3_58] : memref<4x8xi32, #tpu.memory_space<smem>>
    %57 = arith.index_cast %56 : i32 to index
    %c0_59 = arith.constant 0 : index
    %58 = vector.load %arg1[%57, %c0_59] : memref<50x32xf32, #tpu.memory_space<vmem>>, vector<1x32xf32>
    %c25 = arith.constant 25 : index
    %c0_60 = arith.constant 0 : index
    %59 = vector.load %arg8[%c25, %c0_60] : memref<64x64xf32, #tpu.memory_space<vmem>>, vector<1x32xf32>
    tpu.vector_store %arg8[%c25, %c0_60], %58 {strides = array<i32>} : memref<64x64xf32, #tpu.memory_space<vmem>>, vector<1x32xf32>,
    %c2_61 = arith.constant 2 : index
    %c3_62 = arith.constant 3 : index
    %60 = memref.load %arg0[%c2_61, %c3_62] : memref<4x8xi32, #tpu.memory_space<smem>>
    %61 = arith.index_cast %60 : i32 to index
    %c0_63 = arith.constant 0 : index
    %62 = vector.load %arg1[%61, %c0_63] : memref<50x32xf32, #tpu.memory_space<vmem>>, vector<1x32xf32>
    %c26 = arith.constant 26 : index
    %c0_64 = arith.constant 0 : index
    %63 = vector.load %arg8[%c26, %c0_64] : memref<64x64xf32, #tpu.memory_space<vmem>>, vector<1x32xf32>
    tpu.vector_store %arg8[%c26, %c0_64], %62 {strides = array<i32>} : memref<64x64xf32, #tpu.memory_space<vmem>>, vector<1x32xf32>,
    %c3_65 = arith.constant 3 : index
    %c3_66 = arith.constant 3 : index
    %64 = memref.load %arg0[%c3_65, %c3_66] : memref<4x8xi32, #tpu.memory_space<smem>>
    %65 = arith.index_cast %64 : i32 to index
    %c0_67 = arith.constant 0 : index
    %66 = vector.load %arg1[%65, %c0_67] : memref<50x32xf32, #tpu.memory_space<vmem>>, vector<1x32xf32>
    %c27 = arith.constant 27 : index
    %c0_68 = arith.constant 0 : index
    %67 = vector.load %arg8[%c27, %c0_68] : memref<64x64xf32, #tpu.memory_space<vmem>>, vector<1x32xf32>
    tpu.vector_store %arg8[%c27, %c0_68], %66 {strides = array<i32>} : memref<64x64xf32, #tpu.memory_space<vmem>>, vector<1x32xf32>,
    %c0_69 = arith.constant 0 : index
    %c4 = arith.constant 4 : index
    %68 = memref.load %arg0[%c0_69, %c4] : memref<4x8xi32, #tpu.memory_space<smem>>
    %69 = arith.index_cast %68 : i32 to index
    %c0_70 = arith.constant 0 : index
    %70 = vector.load %arg1[%69, %c0_70] : memref<50x32xf32, #tpu.memory_space<vmem>>, vector<1x32xf32>
    %c32 = arith.constant 32 : index
    %c0_71 = arith.constant 0 : index
    %71 = vector.load %arg8[%c32, %c0_71] : memref<64x64xf32, #tpu.memory_space<vmem>>, vector<1x32xf32>
    tpu.vector_store %arg8[%c32, %c0_71], %70 {strides = array<i32>} : memref<64x64xf32, #tpu.memory_space<vmem>>, vector<1x32xf32>,
    %c1_72 = arith.constant 1 : index
    %c4_73 = arith.constant 4 : index
    %72 = memref.load %arg0[%c1_72, %c4_73] : memref<4x8xi32, #tpu.memory_space<smem>>
    %73 = arith.index_cast %72 : i32 to index
    %c0_74 = arith.constant 0 : index
    %74 = vector.load %arg1[%73, %c0_74] : memref<50x32xf32, #tpu.memory_space<vmem>>, vector<1x32xf32>
    %c33 = arith.constant 33 : index
    %c0_75 = arith.constant 0 : index
    %75 = vector.load %arg8[%c33, %c0_75] : memref<64x64xf32, #tpu.memory_space<vmem>>, vector<1x32xf32>
    tpu.vector_store %arg8[%c33, %c0_75], %74 {strides = array<i32>} : memref<64x64xf32, #tpu.memory_space<vmem>>, vector<1x32xf32>,
    %c2_76 = arith.constant 2 : index
    %c4_77 = arith.constant 4 : index
    %76 = memref.load %arg0[%c2_76, %c4_77] : memref<4x8xi32, #tpu.memory_space<smem>>
    %77 = arith.index_cast %76 : i32 to index
    %c0_78 = arith.constant 0 : index
    %78 = vector.load %arg1[%77, %c0_78] : memref<50x32xf32, #tpu.memory_space<vmem>>, vector<1x32xf32>
    %c34 = arith.constant 34 : index
    %c0_79 = arith.constant 0 : index
    %79 = vector.load %arg8[%c34, %c0_79] : memref<64x64xf32, #tpu.memory_space<vmem>>, vector<1x32xf32>
    tpu.vector_store %arg8[%c34, %c0_79], %78 {strides = array<i32>} : memref<64x64xf32, #tpu.memory_space<vmem>>, vector<1x32xf32>,
    %c3_80 = arith.constant 3 : index
    %c4_81 = arith.constant 4 : index
    %80 = memref.load %arg0[%c3_80, %c4_81] : memref<4x8xi32, #tpu.memory_space<smem>>
    %81 = arith.index_cast %80 : i32 to index
    %c0_82 = arith.constant 0 : index
    %82 = vector.load %arg1[%81, %c0_82] : memref<50x32xf32, #tpu.memory_space<vmem>>, vector<1x32xf32>
    %c35 = arith.constant 35 : index
    %c0_83 = arith.constant 0 : index
    %83 = vector.load %arg8[%c35, %c0_83] : memref<64x64xf32, #tpu.memory_space<vmem>>, vector<1x32xf32>
    tpu.vector_store %arg8[%c35, %c0_83], %82 {strides = array<i32>} : memref<64x64xf32, #tpu.memory_space<vmem>>, vector<1x32xf32>,
    %c0_84 = arith.constant 0 : index
    %c5 = arith.constant 5 : index
    %84 = memref.load %arg0[%c0_84, %c5] : memref<4x8xi32, #tpu.memory_space<smem>>
    %85 = arith.index_cast %84 : i32 to index
    %c0_85 = arith.constant 0 : index
    %86 = vector.load %arg1[%85, %c0_85] : memref<50x32xf32, #tpu.memory_space<vmem>>, vector<1x32xf32>
    %c40 = arith.constant 40 : index
    %c0_86 = arith.constant 0 : index
    %87 = vector.load %arg8[%c40, %c0_86] : memref<64x64xf32, #tpu.memory_space<vmem>>, vector<1x32xf32>
    tpu.vector_store %arg8[%c40, %c0_86], %86 {strides = array<i32>} : memref<64x64xf32, #tpu.memory_space<vmem>>, vector<1x32xf32>,
    %c1_87 = arith.constant 1 : index
    %c5_88 = arith.constant 5 : index
    %88 = memref.load %arg0[%c1_87, %c5_88] : memref<4x8xi32, #tpu.memory_space<smem>>
    %89 = arith.index_cast %88 : i32 to index
    %c0_89 = arith.constant 0 : index
    %90 = vector.load %arg1[%89, %c0_89] : memref<50x32xf32, #tpu.memory_space<vmem>>, vector<1x32xf32>
    %c41 = arith.constant 41 : index
    %c0_90 = arith.constant 0 : index
    %91 = vector.load %arg8[%c41, %c0_90] : memref<64x64xf32, #tpu.memory_space<vmem>>, vector<1x32xf32>
    tpu.vector_store %arg8[%c41, %c0_90], %90 {strides = array<i32>} : memref<64x64xf32, #tpu.memory_space<vmem>>, vector<1x32xf32>,
    %c2_91 = arith.constant 2 : index
    %c5_92 = arith.constant 5 : index
    %92 = memref.load %arg0[%c2_91, %c5_92] : memref<4x8xi32, #tpu.memory_space<smem>>
    %93 = arith.index_cast %92 : i32 to index
    %c0_93 = arith.constant 0 : index
    %94 = vector.load %arg1[%93, %c0_93] : memref<50x32xf32, #tpu.memory_space<vmem>>, vector<1x32xf32>
    %c42 = arith.constant 42 : index
    %c0_94 = arith.constant 0 : index
    %95 = vector.load %arg8[%c42, %c0_94] : memref<64x64xf32, #tpu.memory_space<vmem>>, vector<1x32xf32>
    tpu.vector_store %arg8[%c42, %c0_94], %94 {strides = array<i32>} : memref<64x64xf32, #tpu.memory_space<vmem>>, vector<1x32xf32>,
    %c3_95 = arith.constant 3 : index
    %c5_96 = arith.constant 5 : index
    %96 = memref.load %arg0[%c3_95, %c5_96] : memref<4x8xi32, #tpu.memory_space<smem>>
    %97 = arith.index_cast %96 : i32 to index
    %c0_97 = arith.constant 0 : index
    %98 = vector.load %arg1[%97, %c0_97] : memref<50x32xf32, #tpu.memory_space<vmem>>, vector<1x32xf32>
    %c43 = arith.constant 43 : index
    %c0_98 = arith.constant 0 : index
    %99 = vector.load %arg8[%c43, %c0_98] : memref<64x64xf32, #tpu.memory_space<vmem>>, vector<1x32xf32>
    tpu.vector_store %arg8[%c43, %c0_98], %98 {strides = array<i32>} : memref<64x64xf32, #tpu.memory_space<vmem>>, vector<1x32xf32>,
    %c0_99 = arith.constant 0 : index
    %c6 = arith.constant 6 : index
    %100 = memref.load %arg0[%c0_99, %c6] : memref<4x8xi32, #tpu.memory_space<smem>>
    %101 = arith.index_cast %100 : i32 to index
    %c0_100 = arith.constant 0 : index
    %102 = vector.load %arg1[%101, %c0_100] : memref<50x32xf32, #tpu.memory_space<vmem>>, vector<1x32xf32>
    %c48 = arith.constant 48 : index
    %c0_101 = arith.constant 0 : index
    %103 = vector.load %arg8[%c48, %c0_101] : memref<64x64xf32, #tpu.memory_space<vmem>>, vector<1x32xf32>
    tpu.vector_store %arg8[%c48, %c0_101], %102 {strides = array<i32>} : memref<64x64xf32, #tpu.memory_space<vmem>>, vector<1x32xf32>,
    %c1_102 = arith.constant 1 : index
    %c6_103 = arith.constant 6 : index
    %104 = memref.load %arg0[%c1_102, %c6_103] : memref<4x8xi32, #tpu.memory_space<smem>>
    %105 = arith.index_cast %104 : i32 to index
    %c0_104 = arith.constant 0 : index
    %106 = vector.load %arg1[%105, %c0_104] : memref<50x32xf32, #tpu.memory_space<vmem>>, vector<1x32xf32>
    %c49 = arith.constant 49 : index
    %c0_105 = arith.constant 0 : index
    %107 = vector.load %arg8[%c49, %c0_105] : memref<64x64xf32, #tpu.memory_space<vmem>>, vector<1x32xf32>
    tpu.vector_store %arg8[%c49, %c0_105], %106 {strides = array<i32>} : memref<64x64xf32, #tpu.memory_space<vmem>>, vector<1x32xf32>,
    %c2_106 = arith.constant 2 : index
    %c6_107 = arith.constant 6 : index
    %108 = memref.load %arg0[%c2_106, %c6_107] : memref<4x8xi32, #tpu.memory_space<smem>>
    %109 = arith.index_cast %108 : i32 to index
    %c0_108 = arith.constant 0 : index
    %110 = vector.load %arg1[%109, %c0_108] : memref<50x32xf32, #tpu.memory_space<vmem>>, vector<1x32xf32>
    %c50 = arith.constant 50 : index
    %c0_109 = arith.constant 0 : index
    %111 = vector.load %arg8[%c50, %c0_109] : memref<64x64xf32, #tpu.memory_space<vmem>>, vector<1x32xf32>
    tpu.vector_store %arg8[%c50, %c0_109], %110 {strides = array<i32>} : memref<64x64xf32, #tpu.memory_space<vmem>>, vector<1x32xf32>,
    %c3_110 = arith.constant 3 : index
    %c6_111 = arith.constant 6 : index
    %112 = memref.load %arg0[%c3_110, %c6_111] : memref<4x8xi32, #tpu.memory_space<smem>>
    %113 = arith.index_cast %112 : i32 to index
    %c0_112 = arith.constant 0 : index
    %114 = vector.load %arg1[%113, %c0_112] : memref<50x32xf32, #tpu.memory_space<vmem>>, vector<1x32xf32>
    %c51 = arith.constant 51 : index
    %c0_113 = arith.constant 0 : index
    %115 = vector.load %arg8[%c51, %c0_113] : memref<64x64xf32, #tpu.memory_space<vmem>>, vector<1x32xf32>
    tpu.vector_store %arg8[%c51, %c0_113], %114 {strides = array<i32>} : memref<64x64xf32, #tpu.memory_space<vmem>>, vector<1x32xf32>,
    %c0_114 = arith.constant 0 : index
    %c7 = arith.constant 7 : index
    %116 = memref.load %arg0[%c0_114, %c7] : memref<4x8xi32, #tpu.memory_space<smem>>
    %117 = arith.index_cast %116 : i32 to index
    %c0_115 = arith.constant 0 : index
    %118 = vector.load %arg1[%117, %c0_115] : memref<50x32xf32, #tpu.memory_space<vmem>>, vector<1x32xf32>
    %c56 = arith.constant 56 : index
    %c0_116 = arith.constant 0 : index
    %119 = vector.load %arg8[%c56, %c0_116] : memref<64x64xf32, #tpu.memory_space<vmem>>, vector<1x32xf32>
    tpu.vector_store %arg8[%c56, %c0_116], %118 {strides = array<i32>} : memref<64x64xf32, #tpu.memory_space<vmem>>, vector<1x32xf32>,
    %c1_117 = arith.constant 1 : index
    %c7_118 = arith.constant 7 : index
    %120 = memref.load %arg0[%c1_117, %c7_118] : memref<4x8xi32, #tpu.memory_space<smem>>
    %121 = arith.index_cast %120 : i32 to index
    %c0_119 = arith.constant 0 : index
    %122 = vector.load %arg1[%121, %c0_119] : memref<50x32xf32, #tpu.memory_space<vmem>>, vector<1x32xf32>
    %c57 = arith.constant 57 : index
    %c0_120 = arith.constant 0 : index
    %123 = vector.load %arg8[%c57, %c0_120] : memref<64x64xf32, #tpu.memory_space<vmem>>, vector<1x32xf32>
    tpu.vector_store %arg8[%c57, %c0_120], %122 {strides = array<i32>} : memref<64x64xf32, #tpu.memory_space<vmem>>, vector<1x32xf32>,
    %c2_121 = arith.constant 2 : index
    %c7_122 = arith.constant 7 : index
    %124 = memref.load %arg0[%c2_121, %c7_122] : memref<4x8xi32, #tpu.memory_space<smem>>
    %125 = arith.index_cast %124 : i32 to index
    %c0_123 = arith.constant 0 : index
    %126 = vector.load %arg1[%125, %c0_123] : memref<50x32xf32, #tpu.memory_space<vmem>>, vector<1x32xf32>
    %c58 = arith.constant 58 : index
    %c0_124 = arith.constant 0 : index
    %127 = vector.load %arg8[%c58, %c0_124] : memref<64x64xf32, #tpu.memory_space<vmem>>, vector<1x32xf32>
    tpu.vector_store %arg8[%c58, %c0_124], %126 {strides = array<i32>} : memref<64x64xf32, #tpu.memory_space<vmem>>, vector<1x32xf32>,
    %c3_125 = arith.constant 3 : index
    %c7_126 = arith.constant 7 : index
    %128 = memref.load %arg0[%c3_125, %c7_126] : memref<4x8xi32, #tpu.memory_space<smem>>
    %129 = arith.index_cast %128 : i32 to index
    %c0_127 = arith.constant 0 : index
    %130 = vector.load %arg1[%129, %c0_127] : memref<50x32xf32, #tpu.memory_space<vmem>>, vector<1x32xf32>
    %c59 = arith.constant 59 : index
    %c0_128 = arith.constant 0 : index
    %131 = vector.load %arg8[%c59, %c0_128] : memref<64x64xf32, #tpu.memory_space<vmem>>, vector<1x32xf32>
    tpu.vector_store %arg8[%c59, %c0_128], %130 {strides = array<i32>} : memref<64x64xf32, #tpu.memory_space<vmem>>, vector<1x32xf32>,
    %c0_129 = arith.constant 0 : index
    %c0_130 = arith.constant 0 : index
    %c0_131 = arith.constant 0 : index
    %132 = vector.load %arg2[%c0_129, %c0_130, %c0_131] : memref<2x64x256xbf16, #tpu.memory_space<vmem>>, vector<1x64x256xbf16>
    %133 = vector.shape_cast %132 : vector<1x64x256xbf16> to vector<64x256xbf16>
    %c0_132 = arith.constant 0 : index
    %c0_133 = arith.constant 0 : index
    %c0_134 = arith.constant 0 : index
    %134 = vector.load %arg3[%c0_132, %c0_133, %c0_134] : memref<2x64x256xbf16, #tpu.memory_space<vmem>>, vector<1x64x256xbf16>
    %135 = vector.shape_cast %134 : vector<1x64x256xbf16> to vector<64x256xbf16>
    %c0_135 = arith.constant 0 : index
    %c0_136 = arith.constant 0 : index
    %c0_137 = arith.constant 0 : index
    %136 = vector.load %arg4[%c0_135, %c0_136, %c0_137] : memref<2x1x256xf32, #tpu.memory_space<vmem>>, vector<1x1x256xf32>
    %137 = vector.shape_cast %136 : vector<1x1x256xf32> to vector<1x256xf32>
    %c0_138 = arith.constant 0 : index
    %c0_139 = arith.constant 0 : index
    %138 = vector.load %arg8[%c0_138, %c0_139] : memref<64x64xf32, #tpu.memory_space<vmem>>, vector<64x64xf32>
    %139 = arith.truncf %138 : vector<64x64xf32> to vector<64x64xbf16>
    %cst_140 = arith.constant dense<0.000000e+00> : vector<64x256xf32>
    %140 = tpu.matmul %139, %133, %cst_140 {dimension_numbers = #tpu.dot_dimension_numbers<[1], [0], [0], [1], [0, 0, 1, 1], [], []>} : vector<64x64xbf16>, vector<64x256xbf16>, vector<64x256xf32> -> vector<64x256xf32>
    %141 = vector.broadcast %137 : vector<1x256xf32> to vector<64x256xf32>
    %142 = arith.addf %140, %141 : vector<64x256xf32>
    %c0_141 = arith.constant 0 : index
    %c0_142 = arith.constant 0 : index
    %143 = vector.load %arg10[%c0_141, %c0_142] : memref<64x256xf32, #tpu.memory_space<vmem>>, vector<64x256xf32>
    tpu.vector_store %arg10[%c0_141, %c0_142], %142 {strides = array<i32>} : memref<64x256xf32, #tpu.memory_space<vmem>>, vector<64x256xf32>,
    %cst_143 = arith.constant 0.000000e+00 : f32
    %144 = vector.broadcast %cst_143 : f32 to vector<8x64xf32>
    %cst_144 = arith.constant 0.000000e+00 : f32
    %145 = vector.broadcast %cst_144 : f32 to vector<8x32xf32>
    %cst_145 = arith.constant 0.000000e+00 : f32
    %146 = vector.broadcast %cst_145 : f32 to vector<8x32xf32>
    %147 = arith.truncf %144 : vector<8x64xf32> to vector<8x64xbf16>
    %cst_146 = arith.constant dense<0.000000e+00> : vector<8x256xf32>
    %148 = tpu.matmul %147, %135, %cst_146 {dimension_numbers = #tpu.dot_dimension_numbers<[1], [0], [0], [1], [0, 0, 1, 1], [], []>} : vector<8x64xbf16>, vector<64x256xbf16>, vector<8x256xf32> -> vector<8x256xf32>
    %c0_147 = arith.constant 0 : index
    %c0_148 = arith.constant 0 : index
    %149 = vector.load %arg10[%c0_147, %c0_148] : memref<64x256xf32, #tpu.memory_space<vmem>>, vector<8x128xf32>
    %150 = vector.extract_strided_slice %148 {offsets = [0, 0], sizes = [8, 128], strides = [1, 1]} : vector<8x256xf32> to vector<8x128xf32>
    %151 = arith.addf %149, %150 : vector<8x128xf32>
    %c56_149 = arith.constant 56 : index
    %c128 = arith.constant 128 : index
    %152 = vector.load %arg10[%c56_149, %c128] : memref<64x256xf32, #tpu.memory_space<vmem>>, vector<8x128xf32>
    %153 = vector.extract_strided_slice %148 {offsets = [0, 128], sizes = [8, 128], strides = [1, 1]} : vector<8x256xf32> to vector<8x128xf32>
    %154 = arith.addf %152, %153 : vector<8x128xf32>
    %155 = vector.extract_strided_slice %151 {offsets = [0, 0], sizes = [8, 32], strides = [1, 1]} : vector<8x128xf32> to vector<8x32xf32>
    %156 = arith.negf %155 : vector<8x32xf32>
    %157 = math.exp %156 : vector<8x32xf32>
    %cst_150 = arith.constant 1.000000e+00 : f32
    %158 = vector.broadcast %cst_150 : f32 to vector<8x32xf32>
    %159 = arith.addf %158, %157 : vector<8x32xf32>
    %160 = arith.divf %158, %159 : vector<8x32xf32>
    %161 = vector.extract_strided_slice %151 {offsets = [0, 32], sizes = [8, 32], strides = [1, 1]} : vector<8x128xf32> to vector<8x32xf32>
    %162 = arith.negf %161 : vector<8x32xf32>
    %163 = math.exp %162 : vector<8x32xf32>
    %cst_151 = arith.constant 1.000000e+00 : f32
    %164 = vector.broadcast %cst_151 : f32 to vector<8x32xf32>
    %165 = arith.addf %164, %163 : vector<8x32xf32>
    %166 = arith.divf %164, %165 : vector<8x32xf32>
    %167 = vector.extract_strided_slice %151 {offsets = [0, 64], sizes = [8, 32], strides = [1, 1]} : vector<8x128xf32> to vector<8x32xf32>
    %168 = math.tanh %167 : vector<8x32xf32>
    %169 = vector.extract_strided_slice %151 {offsets = [0, 96], sizes = [8, 32], strides = [1, 1]} : vector<8x128xf32> to vector<8x32xf32>
    %170 = arith.negf %169 : vector<8x32xf32>
    %171 = math.exp %170 : vector<8x32xf32>
    %cst_152 = arith.constant 1.000000e+00 : f32
    %172 = vector.broadcast %cst_152 : f32 to vector<8x32xf32>
    %173 = arith.addf %172, %171 : vector<8x32xf32>
    %174 = arith.divf %172, %173 : vector<8x32xf32>
    %175 = arith.mulf %166, %145 : vector<8x32xf32>
    %176 = arith.mulf %160, %168 : vector<8x32xf32>
    %177 = arith.addf %175, %176 : vector<8x32xf32>
    %178 = math.tanh %177 : vector<8x32xf32>
    %179 = arith.mulf %174, %178 : vector<8x32xf32>
    %180 = vector.extract_strided_slice %154 {offsets = [0, 0], sizes = [8, 32], strides = [1, 1]} : vector<8x128xf32> to vector<8x32xf32>
    %181 = arith.negf %180 : vector<8x32xf32>
    %182 = math.exp %181 : vector<8x32xf32>
    %cst_153 = arith.constant 1.000000e+00 : f32
    %183 = vector.broadcast %cst_153 : f32 to vector<8x32xf32>
    %184 = arith.addf %183, %182 : vector<8x32xf32>
    %185 = arith.divf %183, %184 : vector<8x32xf32>
    %186 = vector.extract_strided_slice %154 {offsets = [0, 32], sizes = [8, 32], strides = [1, 1]} : vector<8x128xf32> to vector<8x32xf32>
    %187 = arith.negf %186 : vector<8x32xf32>
    %188 = math.exp %187 : vector<8x32xf32>
    %cst_154 = arith.constant 1.000000e+00 : f32
    %189 = vector.broadcast %cst_154 : f32 to vector<8x32xf32>
    %190 = arith.addf %189, %188 : vector<8x32xf32>
    %191 = arith.divf %189, %190 : vector<8x32xf32>
    %192 = vector.extract_strided_slice %154 {offsets = [0, 64], sizes = [8, 32], strides = [1, 1]} : vector<8x128xf32> to vector<8x32xf32>
    %193 = math.tanh %192 : vector<8x32xf32>
    %194 = vector.extract_strided_slice %154 {offsets = [0, 96], sizes = [8, 32], strides = [1, 1]} : vector<8x128xf32> to vector<8x32xf32>
    %195 = arith.negf %194 : vector<8x32xf32>
    %196 = math.exp %195 : vector<8x32xf32>
    %cst_155 = arith.constant 1.000000e+00 : f32
    %197 = vector.broadcast %cst_155 : f32 to vector<8x32xf32>
    %198 = arith.addf %197, %196 : vector<8x32xf32>
    %199 = arith.divf %197, %198 : vector<8x32xf32>
    %200 = arith.mulf %191, %146 : vector<8x32xf32>
    %201 = arith.mulf %185, %193 : vector<8x32xf32>
    %202 = arith.addf %200, %201 : vector<8x32xf32>
    %203 = math.tanh %202 : vector<8x32xf32>
    %204 = arith.mulf %199, %203 : vector<8x32xf32>
    %205 = tpu.concatenate %179, %204 in 1 : vector<8x32xf32>, vector<8x32xf32> -> vector<8x64xf32>
    %c0_156 = arith.constant 0 : index
    %c0_157 = arith.constant 0 : index
    %206 = vector.load %arg9[%c0_156, %c0_157] : memref<64x64xf32, #tpu.memory_space<vmem>>, vector<8x32xf32>
    tpu.vector_store %arg9[%c0_156, %c0_157], %179 {strides = array<i32>} : memref<64x64xf32, #tpu.memory_space<vmem>>, vector<8x32xf32>,
    %c56_158 = arith.constant 56 : index
    %c32_159 = arith.constant 32 : index
    %207 = vector.load %arg9[%c56_158, %c32_159] : memref<64x64xf32, #tpu.memory_space<vmem>>, vector<8x32xf32>
    tpu.vector_store %arg9[%c56_158, %c32_159], %204 {strides = array<i32>} : memref<64x64xf32, #tpu.memory_space<vmem>>, vector<8x32xf32>,
    %208 = arith.truncf %205 : vector<8x64xf32> to vector<8x64xbf16>
    %cst_160 = arith.constant dense<0.000000e+00> : vector<8x256xf32>
    %209 = tpu.matmul %208, %135, %cst_160 {dimension_numbers = #tpu.dot_dimension_numbers<[1], [0], [0], [1], [0, 0, 1, 1], [], []>} : vector<8x64xbf16>, vector<64x256xbf16>, vector<8x256xf32> -> vector<8x256xf32>
    %c8_161 = arith.constant 8 : index
    %c0_162 = arith.constant 0 : index
    %210 = vector.load %arg10[%c8_161, %c0_162] : memref<64x256xf32, #tpu.memory_space<vmem>>, vector<8x128xf32>
    %211 = vector.extract_strided_slice %209 {offsets = [0, 0], sizes = [8, 128], strides = [1, 1]} : vector<8x256xf32> to vector<8x128xf32>
    %212 = arith.addf %210, %211 : vector<8x128xf32>
    %c48_163 = arith.constant 48 : index
    %c128_164 = arith.constant 128 : index
    %213 = vector.load %arg10[%c48_163, %c128_164] : memref<64x256xf32, #tpu.memory_space<vmem>>, vector<8x128xf32>
    %214 = vector.extract_strided_slice %209 {offsets = [0, 128], sizes = [8, 128], strides = [1, 1]} : vector<8x256xf32> to vector<8x128xf32>
    %215 = arith.addf %213, %214 : vector<8x128xf32>
    %216 = vector.extract_strided_slice %212 {offsets = [0, 0], sizes = [8, 32], strides = [1, 1]} : vector<8x128xf32> to vector<8x32xf32>
    %217 = arith.negf %216 : vector<8x32xf32>
    %218 = math.exp %217 : vector<8x32xf32>
    %cst_165 = arith.constant 1.000000e+00 : f32
    %219 = vector.broadcast %cst_165 : f32 to vector<8x32xf32>
    %220 = arith.addf %219, %218 : vector<8x32xf32>
    %221 = arith.divf %219, %220 : vector<8x32xf32>
    %222 = vector.extract_strided_slice %212 {offsets = [0, 32], sizes = [8, 32], strides = [1, 1]} : vector<8x128xf32> to vector<8x32xf32>
    %223 = arith.negf %222 : vector<8x32xf32>
    %224 = math.exp %223 : vector<8x32xf32>
    %cst_166 = arith.constant 1.000000e+00 : f32
    %225 = vector.broadcast %cst_166 : f32 to vector<8x32xf32>
    %226 = arith.addf %225, %224 : vector<8x32xf32>
    %227 = arith.divf %225, %226 : vector<8x32xf32>
    %228 = vector.extract_strided_slice %212 {offsets = [0, 64], sizes = [8, 32], strides = [1, 1]} : vector<8x128xf32> to vector<8x32xf32>
    %229 = math.tanh %228 : vector<8x32xf32>
    %230 = vector.extract_strided_slice %212 {offsets = [0, 96], sizes = [8, 32], strides = [1, 1]} : vector<8x128xf32> to vector<8x32xf32>
    %231 = arith.negf %230 : vector<8x32xf32>
    %232 = math.exp %231 : vector<8x32xf32>
    %cst_167 = arith.constant 1.000000e+00 : f32
    %233 = vector.broadcast %cst_167 : f32 to vector<8x32xf32>
    %234 = arith.addf %233, %232 : vector<8x32xf32>
    %235 = arith.divf %233, %234 : vector<8x32xf32>
    %236 = arith.mulf %227, %177 : vector<8x32xf32>
    %237 = arith.mulf %221, %229 : vector<8x32xf32>
    %238 = arith.addf %236, %237 : vector<8x32xf32>
    %239 = math.tanh %238 : vector<8x32xf32>
    %240 = arith.mulf %235, %239 : vector<8x32xf32>
    %241 = vector.extract_strided_slice %215 {offsets = [0, 0], sizes = [8, 32], strides = [1, 1]} : vector<8x128xf32> to vector<8x32xf32>
    %242 = arith.negf %241 : vector<8x32xf32>
    %243 = math.exp %242 : vector<8x32xf32>
    %cst_168 = arith.constant 1.000000e+00 : f32
    %244 = vector.broadcast %cst_168 : f32 to vector<8x32xf32>
    %245 = arith.addf %244, %243 : vector<8x32xf32>
    %246 = arith.divf %244, %245 : vector<8x32xf32>
    %247 = vector.extract_strided_slice %215 {offsets = [0, 32], sizes = [8, 32], strides = [1, 1]} : vector<8x128xf32> to vector<8x32xf32>
    %248 = arith.negf %247 : vector<8x32xf32>
    %249 = math.exp %248 : vector<8x32xf32>
    %cst_169 = arith.constant 1.000000e+00 : f32
    %250 = vector.broadcast %cst_169 : f32 to vector<8x32xf32>
    %251 = arith.addf %250, %249 : vector<8x32xf32>
    %252 = arith.divf %250, %251 : vector<8x32xf32>
    %253 = vector.extract_strided_slice %215 {offsets = [0, 64], sizes = [8, 32], strides = [1, 1]} : vector<8x128xf32> to vector<8x32xf32>
    %254 = math.tanh %253 : vector<8x32xf32>
    %255 = vector.extract_strided_slice %215 {offsets = [0, 96], sizes = [8, 32], strides = [1, 1]} : vector<8x128xf32> to vector<8x32xf32>
    %256 = arith.negf %255 : vector<8x32xf32>
    %257 = math.exp %256 : vector<8x32xf32>
    %cst_170 = arith.constant 1.000000e+00 : f32
    %258 = vector.broadcast %cst_170 : f32 to vector<8x32xf32>
    %259 = arith.addf %258, %257 : vector<8x32xf32>
    %260 = arith.divf %258, %259 : vector<8x32xf32>
    %261 = arith.mulf %252, %202 : vector<8x32xf32>
    %262 = arith.mulf %246, %254 : vector<8x32xf32>
    %263 = arith.addf %261, %262 : vector<8x32xf32>
    %264 = math.tanh %263 : vector<8x32xf32>
    %265 = arith.mulf %260, %264 : vector<8x32xf32>
    %266 = tpu.concatenate %240, %265 in 1 : vector<8x32xf32>, vector<8x32xf32> -> vector<8x64xf32>
    %c8_171 = arith.constant 8 : index
    %c0_172 = arith.constant 0 : index
    %267 = vector.load %arg9[%c8_171, %c0_172] : memref<64x64xf32, #tpu.memory_space<vmem>>, vector<8x32xf32>
    tpu.vector_store %arg9[%c8_171, %c0_172], %240 {strides = array<i32>} : memref<64x64xf32, #tpu.memory_space<vmem>>, vector<8x32xf32>,
    %c48_173 = arith.constant 48 : index
    %c32_174 = arith.constant 32 : index
    %268 = vector.load %arg9[%c48_173, %c32_174] : memref<64x64xf32, #tpu.memory_space<vmem>>, vector<8x32xf32>
    tpu.vector_store %arg9[%c48_173, %c32_174], %265 {strides = array<i32>} : memref<64x64xf32, #tpu.memory_space<vmem>>, vector<8x32xf32>,
    %269 = arith.truncf %266 : vector<8x64xf32> to vector<8x64xbf16>
    %cst_175 = arith.constant dense<0.000000e+00> : vector<8x256xf32>
    %270 = tpu.matmul %269, %135, %cst_175 {dimension_numbers = #tpu.dot_dimension_numbers<[1], [0], [0], [1], [0, 0, 1, 1], [], []>} : vector<8x64xbf16>, vector<64x256xbf16>, vector<8x256xf32> -> vector<8x256xf32>
    %c16_176 = arith.constant 16 : index
    %c0_177 = arith.constant 0 : index
    %271 = vector.load %arg10[%c16_176, %c0_177] : memref<64x256xf32, #tpu.memory_space<vmem>>, vector<8x128xf32>
    %272 = vector.extract_strided_slice %270 {offsets = [0, 0], sizes = [8, 128], strides = [1, 1]} : vector<8x256xf32> to vector<8x128xf32>
    %273 = arith.addf %271, %272 : vector<8x128xf32>
    %c40_178 = arith.constant 40 : index
    %c128_179 = arith.constant 128 : index
    %274 = vector.load %arg10[%c40_178, %c128_179] : memref<64x256xf32, #tpu.memory_space<vmem>>, vector<8x128xf32>
    %275 = vector.extract_strided_slice %270 {offsets = [0, 128], sizes = [8, 128], strides = [1, 1]} : vector<8x256xf32> to vector<8x128xf32>
    %276 = arith.addf %274, %275 : vector<8x128xf32>
    %277 = vector.extract_strided_slice %273 {offsets = [0, 0], sizes = [8, 32], strides = [1, 1]} : vector<8x128xf32> to vector<8x32xf32>
    %278 = arith.negf %277 : vector<8x32xf32>
    %279 = math.exp %278 : vector<8x32xf32>
    %cst_180 = arith.constant 1.000000e+00 : f32
    %280 = vector.broadcast %cst_180 : f32 to vector<8x32xf32>
    %281 = arith.addf %280, %279 : vector<8x32xf32>
    %282 = arith.divf %280, %281 : vector<8x32xf32>
    %283 = vector.extract_strided_slice %273 {offsets = [0, 32], sizes = [8, 32], strides = [1, 1]} : vector<8x128xf32> to vector<8x32xf32>
    %284 = arith.negf %283 : vector<8x32xf32>
    %285 = math.exp %284 : vector<8x32xf32>
    %cst_181 = arith.constant 1.000000e+00 : f32
    %286 = vector.broadcast %cst_181 : f32 to vector<8x32xf32>
    %287 = arith.addf %286, %285 : vector<8x32xf32>
    %288 = arith.divf %286, %287 : vector<8x32xf32>
    %289 = vector.extract_strided_slice %273 {offsets = [0, 64], sizes = [8, 32], strides = [1, 1]} : vector<8x128xf32> to vector<8x32xf32>
    %290 = math.tanh %289 : vector<8x32xf32>
    %291 = vector.extract_strided_slice %273 {offsets = [0, 96], sizes = [8, 32], strides = [1, 1]} : vector<8x128xf32> to vector<8x32xf32>
    %292 = arith.negf %291 : vector<8x32xf32>
    %293 = math.exp %292 : vector<8x32xf32>
    %cst_182 = arith.constant 1.000000e+00 : f32
    %294 = vector.broadcast %cst_182 : f32 to vector<8x32xf32>
    %295 = arith.addf %294, %293 : vector<8x32xf32>
    %296 = arith.divf %294, %295 : vector<8x32xf32>
    %297 = arith.mulf %288, %238 : vector<8x32xf32>
    %298 = arith.mulf %282, %290 : vector<8x32xf32>
    %299 = arith.addf %297, %298 : vector<8x32xf32>
    %300 = math.tanh %299 : vector<8x32xf32>
    %301 = arith.mulf %296, %300 : vector<8x32xf32>
    %302 = vector.extract_strided_slice %276 {offsets = [0, 0], sizes = [8, 32], strides = [1, 1]} : vector<8x128xf32> to vector<8x32xf32>
    %303 = arith.negf %302 : vector<8x32xf32>
    %304 = math.exp %303 : vector<8x32xf32>
    %cst_183 = arith.constant 1.000000e+00 : f32
    %305 = vector.broadcast %cst_183 : f32 to vector<8x32xf32>
    %306 = arith.addf %305, %304 : vector<8x32xf32>
    %307 = arith.divf %305, %306 : vector<8x32xf32>
    %308 = vector.extract_strided_slice %276 {offsets = [0, 32], sizes = [8, 32], strides = [1, 1]} : vector<8x128xf32> to vector<8x32xf32>
    %309 = arith.negf %308 : vector<8x32xf32>
    %310 = math.exp %309 : vector<8x32xf32>
    %cst_184 = arith.constant 1.000000e+00 : f32
    %311 = vector.broadcast %cst_184 : f32 to vector<8x32xf32>
    %312 = arith.addf %311, %310 : vector<8x32xf32>
    %313 = arith.divf %311, %312 : vector<8x32xf32>
    %314 = vector.extract_strided_slice %276 {offsets = [0, 64], sizes = [8, 32], strides = [1, 1]} : vector<8x128xf32> to vector<8x32xf32>
    %315 = math.tanh %314 : vector<8x32xf32>
    %316 = vector.extract_strided_slice %276 {offsets = [0, 96], sizes = [8, 32], strides = [1, 1]} : vector<8x128xf32> to vector<8x32xf32>
    %317 = arith.negf %316 : vector<8x32xf32>
    %318 = math.exp %317 : vector<8x32xf32>
    %cst_185 = arith.constant 1.000000e+00 : f32
    %319 = vector.broadcast %cst_185 : f32 to vector<8x32xf32>
    %320 = arith.addf %319, %318 : vector<8x32xf32>
    %321 = arith.divf %319, %320 : vector<8x32xf32>
    %322 = arith.mulf %313, %263 : vector<8x32xf32>
    %323 = arith.mulf %307, %315 : vector<8x32xf32>
    %324 = arith.addf %322, %323 : vector<8x32xf32>
    %325 = math.tanh %324 : vector<8x32xf32>
    %326 = arith.mulf %321, %325 : vector<8x32xf32>
    %327 = tpu.concatenate %301, %326 in 1 : vector<8x32xf32>, vector<8x32xf32> -> vector<8x64xf32>
    %c16_186 = arith.constant 16 : index
    %c0_187 = arith.constant 0 : index
    %328 = vector.load %arg9[%c16_186, %c0_187] : memref<64x64xf32, #tpu.memory_space<vmem>>, vector<8x32xf32>
    tpu.vector_store %arg9[%c16_186, %c0_187], %301 {strides = array<i32>} : memref<64x64xf32, #tpu.memory_space<vmem>>, vector<8x32xf32>,
    %c40_188 = arith.constant 40 : index
    %c32_189 = arith.constant 32 : index
    %329 = vector.load %arg9[%c40_188, %c32_189] : memref<64x64xf32, #tpu.memory_space<vmem>>, vector<8x32xf32>
    tpu.vector_store %arg9[%c40_188, %c32_189], %326 {strides = array<i32>} : memref<64x64xf32, #tpu.memory_space<vmem>>, vector<8x32xf32>,
    %330 = arith.truncf %327 : vector<8x64xf32> to vector<8x64xbf16>
    %cst_190 = arith.constant dense<0.000000e+00> : vector<8x256xf32>
    %331 = tpu.matmul %330, %135, %cst_190 {dimension_numbers = #tpu.dot_dimension_numbers<[1], [0], [0], [1], [0, 0, 1, 1], [], []>} : vector<8x64xbf16>, vector<64x256xbf16>, vector<8x256xf32> -> vector<8x256xf32>
    %c24_191 = arith.constant 24 : index
    %c0_192 = arith.constant 0 : index
    %332 = vector.load %arg10[%c24_191, %c0_192] : memref<64x256xf32, #tpu.memory_space<vmem>>, vector<8x128xf32>
    %333 = vector.extract_strided_slice %331 {offsets = [0, 0], sizes = [8, 128], strides = [1, 1]} : vector<8x256xf32> to vector<8x128xf32>
    %334 = arith.addf %332, %333 : vector<8x128xf32>
    %c32_193 = arith.constant 32 : index
    %c128_194 = arith.constant 128 : index
    %335 = vector.load %arg10[%c32_193, %c128_194] : memref<64x256xf32, #tpu.memory_space<vmem>>, vector<8x128xf32>
    %336 = vector.extract_strided_slice %331 {offsets = [0, 128], sizes = [8, 128], strides = [1, 1]} : vector<8x256xf32> to vector<8x128xf32>
    %337 = arith.addf %335, %336 : vector<8x128xf32>
    %338 = vector.extract_strided_slice %334 {offsets = [0, 0], sizes = [8, 32], strides = [1, 1]} : vector<8x128xf32> to vector<8x32xf32>
    %339 = arith.negf %338 : vector<8x32xf32>
    %340 = math.exp %339 : vector<8x32xf32>
    %cst_195 = arith.constant 1.000000e+00 : f32
    %341 = vector.broadcast %cst_195 : f32 to vector<8x32xf32>
    %342 = arith.addf %341, %340 : vector<8x32xf32>
    %343 = arith.divf %341, %342 : vector<8x32xf32>
    %344 = vector.extract_strided_slice %334 {offsets = [0, 32], sizes = [8, 32], strides = [1, 1]} : vector<8x128xf32> to vector<8x32xf32>
    %345 = arith.negf %344 : vector<8x32xf32>
    %346 = math.exp %345 : vector<8x32xf32>
    %cst_196 = arith.constant 1.000000e+00 : f32
    %347 = vector.broadcast %cst_196 : f32 to vector<8x32xf32>
    %348 = arith.addf %347, %346 : vector<8x32xf32>
    %349 = arith.divf %347, %348 : vector<8x32xf32>
    %350 = vector.extract_strided_slice %334 {offsets = [0, 64], sizes = [8, 32], strides = [1, 1]} : vector<8x128xf32> to vector<8x32xf32>
    %351 = math.tanh %350 : vector<8x32xf32>
    %352 = vector.extract_strided_slice %334 {offsets = [0, 96], sizes = [8, 32], strides = [1, 1]} : vector<8x128xf32> to vector<8x32xf32>
    %353 = arith.negf %352 : vector<8x32xf32>
    %354 = math.exp %353 : vector<8x32xf32>
    %cst_197 = arith.constant 1.000000e+00 : f32
    %355 = vector.broadcast %cst_197 : f32 to vector<8x32xf32>
    %356 = arith.addf %355, %354 : vector<8x32xf32>
    %357 = arith.divf %355, %356 : vector<8x32xf32>
    %358 = arith.mulf %349, %299 : vector<8x32xf32>
    %359 = arith.mulf %343, %351 : vector<8x32xf32>
    %360 = arith.addf %358, %359 : vector<8x32xf32>
    %361 = math.tanh %360 : vector<8x32xf32>
    %362 = arith.mulf %357, %361 : vector<8x32xf32>
    %363 = vector.extract_strided_slice %337 {offsets = [0, 0], sizes = [8, 32], strides = [1, 1]} : vector<8x128xf32> to vector<8x32xf32>
    %364 = arith.negf %363 : vector<8x32xf32>
    %365 = math.exp %364 : vector<8x32xf32>
    %cst_198 = arith.constant 1.000000e+00 : f32
    %366 = vector.broadcast %cst_198 : f32 to vector<8x32xf32>
    %367 = arith.addf %366, %365 : vector<8x32xf32>
    %368 = arith.divf %366, %367 : vector<8x32xf32>
    %369 = vector.extract_strided_slice %337 {offsets = [0, 32], sizes = [8, 32], strides = [1, 1]} : vector<8x128xf32> to vector<8x32xf32>
    %370 = arith.negf %369 : vector<8x32xf32>
    %371 = math.exp %370 : vector<8x32xf32>
    %cst_199 = arith.constant 1.000000e+00 : f32
    %372 = vector.broadcast %cst_199 : f32 to vector<8x32xf32>
    %373 = arith.addf %372, %371 : vector<8x32xf32>
    %374 = arith.divf %372, %373 : vector<8x32xf32>
    %375 = vector.extract_strided_slice %337 {offsets = [0, 64], sizes = [8, 32], strides = [1, 1]} : vector<8x128xf32> to vector<8x32xf32>
    %376 = math.tanh %375 : vector<8x32xf32>
    %377 = vector.extract_strided_slice %337 {offsets = [0, 96], sizes = [8, 32], strides = [1, 1]} : vector<8x128xf32> to vector<8x32xf32>
    %378 = arith.negf %377 : vector<8x32xf32>
    %379 = math.exp %378 : vector<8x32xf32>
    %cst_200 = arith.constant 1.000000e+00 : f32
    %380 = vector.broadcast %cst_200 : f32 to vector<8x32xf32>
    %381 = arith.addf %380, %379 : vector<8x32xf32>
    %382 = arith.divf %380, %381 : vector<8x32xf32>
    %383 = arith.mulf %374, %324 : vector<8x32xf32>
    %384 = arith.mulf %368, %376 : vector<8x32xf32>
    %385 = arith.addf %383, %384 : vector<8x32xf32>
    %386 = math.tanh %385 : vector<8x32xf32>
    %387 = arith.mulf %382, %386 : vector<8x32xf32>
    %388 = tpu.concatenate %362, %387 in 1 : vector<8x32xf32>, vector<8x32xf32> -> vector<8x64xf32>
    %c24_201 = arith.constant 24 : index
    %c0_202 = arith.constant 0 : index
    %389 = vector.load %arg9[%c24_201, %c0_202] : memref<64x64xf32, #tpu.memory_space<vmem>>, vector<8x32xf32>
    tpu.vector_store %arg9[%c24_201, %c0_202], %362 {strides = array<i32>} : memref<64x64xf32, #tpu.memory_space<vmem>>, vector<8x32xf32>,
    %c32_203 = arith.constant 32 : index
    %c32_204 = arith.constant 32 : index
    %390 = vector.load %arg9[%c32_203, %c32_204] : memref<64x64xf32, #tpu.memory_space<vmem>>, vector<8x32xf32>
    tpu.vector_store %arg9[%c32_203, %c32_204], %387 {strides = array<i32>} : memref<64x64xf32, #tpu.memory_space<vmem>>, vector<8x32xf32>,
    %391 = arith.truncf %388 : vector<8x64xf32> to vector<8x64xbf16>
    %cst_205 = arith.constant dense<0.000000e+00> : vector<8x256xf32>
    %392 = tpu.matmul %391, %135, %cst_205 {dimension_numbers = #tpu.dot_dimension_numbers<[1], [0], [0], [1], [0, 0, 1, 1], [], []>} : vector<8x64xbf16>, vector<64x256xbf16>, vector<8x256xf32> -> vector<8x256xf32>
    %c32_206 = arith.constant 32 : index
    %c0_207 = arith.constant 0 : index
    %393 = vector.load %arg10[%c32_206, %c0_207] : memref<64x256xf32, #tpu.memory_space<vmem>>, vector<8x128xf32>
    %394 = vector.extract_strided_slice %392 {offsets = [0, 0], sizes = [8, 128], strides = [1, 1]} : vector<8x256xf32> to vector<8x128xf32>
    %395 = arith.addf %393, %394 : vector<8x128xf32>
    %c24_208 = arith.constant 24 : index
    %c128_209 = arith.constant 128 : index
    %396 = vector.load %arg10[%c24_208, %c128_209] : memref<64x256xf32, #tpu.memory_space<vmem>>, vector<8x128xf32>
    %397 = vector.extract_strided_slice %392 {offsets = [0, 128], sizes = [8, 128], strides = [1, 1]} : vector<8x256xf32> to vector<8x128xf32>
    %398 = arith.addf %396, %397 : vector<8x128xf32>
    %399 = vector.extract_strided_slice %395 {offsets = [0, 0], sizes = [8, 32], strides = [1, 1]} : vector<8x128xf32> to vector<8x32xf32>
    %400 = arith.negf %399 : vector<8x32xf32>
    %401 = math.exp %400 : vector<8x32xf32>
    %cst_210 = arith.constant 1.000000e+00 : f32
    %402 = vector.broadcast %cst_210 : f32 to vector<8x32xf32>
    %403 = arith.addf %402, %401 : vector<8x32xf32>
    %404 = arith.divf %402, %403 : vector<8x32xf32>
    %405 = vector.extract_strided_slice %395 {offsets = [0, 32], sizes = [8, 32], strides = [1, 1]} : vector<8x128xf32> to vector<8x32xf32>
    %406 = arith.negf %405 : vector<8x32xf32>
    %407 = math.exp %406 : vector<8x32xf32>
    %cst_211 = arith.constant 1.000000e+00 : f32
    %408 = vector.broadcast %cst_211 : f32 to vector<8x32xf32>
    %409 = arith.addf %408, %407 : vector<8x32xf32>
    %410 = arith.divf %408, %409 : vector<8x32xf32>
    %411 = vector.extract_strided_slice %395 {offsets = [0, 64], sizes = [8, 32], strides = [1, 1]} : vector<8x128xf32> to vector<8x32xf32>
    %412 = math.tanh %411 : vector<8x32xf32>
    %413 = vector.extract_strided_slice %395 {offsets = [0, 96], sizes = [8, 32], strides = [1, 1]} : vector<8x128xf32> to vector<8x32xf32>
    %414 = arith.negf %413 : vector<8x32xf32>
    %415 = math.exp %414 : vector<8x32xf32>
    %cst_212 = arith.constant 1.000000e+00 : f32
    %416 = vector.broadcast %cst_212 : f32 to vector<8x32xf32>
    %417 = arith.addf %416, %415 : vector<8x32xf32>
    %418 = arith.divf %416, %417 : vector<8x32xf32>
    %419 = arith.mulf %410, %360 : vector<8x32xf32>
    %420 = arith.mulf %404, %412 : vector<8x32xf32>
    %421 = arith.addf %419, %420 : vector<8x32xf32>
    %422 = math.tanh %421 : vector<8x32xf32>
    %423 = arith.mulf %418, %422 : vector<8x32xf32>
    %424 = vector.extract_strided_slice %398 {offsets = [0, 0], sizes = [8, 32], strides = [1, 1]} : vector<8x128xf32> to vector<8x32xf32>
    %425 = arith.negf %424 : vector<8x32xf32>
    %426 = math.exp %425 : vector<8x32xf32>
    %cst_213 = arith.constant 1.000000e+00 : f32
    %427 = vector.broadcast %cst_213 : f32 to vector<8x32xf32>
    %428 = arith.addf %427, %426 : vector<8x32xf32>
    %429 = arith.divf %427, %428 : vector<8x32xf32>
    %430 = vector.extract_strided_slice %398 {offsets = [0, 32], sizes = [8, 32], strides = [1, 1]} : vector<8x128xf32> to vector<8x32xf32>
    %431 = arith.negf %430 : vector<8x32xf32>
    %432 = math.exp %431 : vector<8x32xf32>
    %cst_214 = arith.constant 1.000000e+00 : f32
    %433 = vector.broadcast %cst_214 : f32 to vector<8x32xf32>
    %434 = arith.addf %433, %432 : vector<8x32xf32>
    %435 = arith.divf %433, %434 : vector<8x32xf32>
    %436 = vector.extract_strided_slice %398 {offsets = [0, 64], sizes = [8, 32], strides = [1, 1]} : vector<8x128xf32> to vector<8x32xf32>
    %437 = math.tanh %436 : vector<8x32xf32>
    %438 = vector.extract_strided_slice %398 {offsets = [0, 96], sizes = [8, 32], strides = [1, 1]} : vector<8x128xf32> to vector<8x32xf32>
    %439 = arith.negf %438 : vector<8x32xf32>
    %440 = math.exp %439 : vector<8x32xf32>
    %cst_215 = arith.constant 1.000000e+00 : f32
    %441 = vector.broadcast %cst_215 : f32 to vector<8x32xf32>
    %442 = arith.addf %441, %440 : vector<8x32xf32>
    %443 = arith.divf %441, %442 : vector<8x32xf32>
    %444 = arith.mulf %435, %385 : vector<8x32xf32>
    %445 = arith.mulf %429, %437 : vector<8x32xf32>
    %446 = arith.addf %444, %445 : vector<8x32xf32>
    %447 = math.tanh %446 : vector<8x32xf32>
    %448 = arith.mulf %443, %447 : vector<8x32xf32>
    %449 = tpu.concatenate %423, %448 in 1 : vector<8x32xf32>, vector<8x32xf32> -> vector<8x64xf32>
    %c32_216 = arith.constant 32 : index
    %c0_217 = arith.constant 0 : index
    %450 = vector.load %arg9[%c32_216, %c0_217] : memref<64x64xf32, #tpu.memory_space<vmem>>, vector<8x32xf32>
    tpu.vector_store %arg9[%c32_216, %c0_217], %423 {strides = array<i32>} : memref<64x64xf32, #tpu.memory_space<vmem>>, vector<8x32xf32>,
    %c24_218 = arith.constant 24 : index
    %c32_219 = arith.constant 32 : index
    %451 = vector.load %arg9[%c24_218, %c32_219] : memref<64x64xf32, #tpu.memory_space<vmem>>, vector<8x32xf32>
    tpu.vector_store %arg9[%c24_218, %c32_219], %448 {strides = array<i32>} : memref<64x64xf32, #tpu.memory_space<vmem>>, vector<8x32xf32>,
    %452 = arith.truncf %449 : vector<8x64xf32> to vector<8x64xbf16>
    %cst_220 = arith.constant dense<0.000000e+00> : vector<8x256xf32>
    %453 = tpu.matmul %452, %135, %cst_220 {dimension_numbers = #tpu.dot_dimension_numbers<[1], [0], [0], [1], [0, 0, 1, 1], [], []>} : vector<8x64xbf16>, vector<64x256xbf16>, vector<8x256xf32> -> vector<8x256xf32>
    %c40_221 = arith.constant 40 : index
    %c0_222 = arith.constant 0 : index
    %454 = vector.load %arg10[%c40_221, %c0_222] : memref<64x256xf32, #tpu.memory_space<vmem>>, vector<8x128xf32>
    %455 = vector.extract_strided_slice %453 {offsets = [0, 0], sizes = [8, 128], strides = [1, 1]} : vector<8x256xf32> to vector<8x128xf32>
    %456 = arith.addf %454, %455 : vector<8x128xf32>
    %c16_223 = arith.constant 16 : index
    %c128_224 = arith.constant 128 : index
    %457 = vector.load %arg10[%c16_223, %c128_224] : memref<64x256xf32, #tpu.memory_space<vmem>>, vector<8x128xf32>
    %458 = vector.extract_strided_slice %453 {offsets = [0, 128], sizes = [8, 128], strides = [1, 1]} : vector<8x256xf32> to vector<8x128xf32>
    %459 = arith.addf %457, %458 : vector<8x128xf32>
    %460 = vector.extract_strided_slice %456 {offsets = [0, 0], sizes = [8, 32], strides = [1, 1]} : vector<8x128xf32> to vector<8x32xf32>
    %461 = arith.negf %460 : vector<8x32xf32>
    %462 = math.exp %461 : vector<8x32xf32>
    %cst_225 = arith.constant 1.000000e+00 : f32
    %463 = vector.broadcast %cst_225 : f32 to vector<8x32xf32>
    %464 = arith.addf %463, %462 : vector<8x32xf32>
    %465 = arith.divf %463, %464 : vector<8x32xf32>
    %466 = vector.extract_strided_slice %456 {offsets = [0, 32], sizes = [8, 32], strides = [1, 1]} : vector<8x128xf32> to vector<8x32xf32>
    %467 = arith.negf %466 : vector<8x32xf32>
    %468 = math.exp %467 : vector<8x32xf32>
    %cst_226 = arith.constant 1.000000e+00 : f32
    %469 = vector.broadcast %cst_226 : f32 to vector<8x32xf32>
    %470 = arith.addf %469, %468 : vector<8x32xf32>
    %471 = arith.divf %469, %470 : vector<8x32xf32>
    %472 = vector.extract_strided_slice %456 {offsets = [0, 64], sizes = [8, 32], strides = [1, 1]} : vector<8x128xf32> to vector<8x32xf32>
    %473 = math.tanh %472 : vector<8x32xf32>
    %474 = vector.extract_strided_slice %456 {offsets = [0, 96], sizes = [8, 32], strides = [1, 1]} : vector<8x128xf32> to vector<8x32xf32>
    %475 = arith.negf %474 : vector<8x32xf32>
    %476 = math.exp %475 : vector<8x32xf32>
    %cst_227 = arith.constant 1.000000e+00 : f32
    %477 = vector.broadcast %cst_227 : f32 to vector<8x32xf32>
    %478 = arith.addf %477, %476 : vector<8x32xf32>
    %479 = arith.divf %477, %478 : vector<8x32xf32>
    %480 = arith.mulf %471, %421 : vector<8x32xf32>
    %481 = arith.mulf %465, %473 : vector<8x32xf32>
    %482 = arith.addf %480, %481 : vector<8x32xf32>
    %483 = math.tanh %482 : vector<8x32xf32>
    %484 = arith.mulf %479, %483 : vector<8x32xf32>
    %485 = vector.extract_strided_slice %459 {offsets = [0, 0], sizes = [8, 32], strides = [1, 1]} : vector<8x128xf32> to vector<8x32xf32>
    %486 = arith.negf %485 : vector<8x32xf32>
    %487 = math.exp %486 : vector<8x32xf32>
    %cst_228 = arith.constant 1.000000e+00 : f32
    %488 = vector.broadcast %cst_228 : f32 to vector<8x32xf32>
    %489 = arith.addf %488, %487 : vector<8x32xf32>
    %490 = arith.divf %488, %489 : vector<8x32xf32>
    %491 = vector.extract_strided_slice %459 {offsets = [0, 32], sizes = [8, 32], strides = [1, 1]} : vector<8x128xf32> to vector<8x32xf32>
    %492 = arith.negf %491 : vector<8x32xf32>
    %493 = math.exp %492 : vector<8x32xf32>
    %cst_229 = arith.constant 1.000000e+00 : f32
    %494 = vector.broadcast %cst_229 : f32 to vector<8x32xf32>
    %495 = arith.addf %494, %493 : vector<8x32xf32>
    %496 = arith.divf %494, %495 : vector<8x32xf32>
    %497 = vector.extract_strided_slice %459 {offsets = [0, 64], sizes = [8, 32], strides = [1, 1]} : vector<8x128xf32> to vector<8x32xf32>
    %498 = math.tanh %497 : vector<8x32xf32>
    %499 = vector.extract_strided_slice %459 {offsets = [0, 96], sizes = [8, 32], strides = [1, 1]} : vector<8x128xf32> to vector<8x32xf32>
    %500 = arith.negf %499 : vector<8x32xf32>
    %501 = math.exp %500 : vector<8x32xf32>
    %cst_230 = arith.constant 1.000000e+00 : f32
    %502 = vector.broadcast %cst_230 : f32 to vector<8x32xf32>
    %503 = arith.addf %502, %501 : vector<8x32xf32>
    %504 = arith.divf %502, %503 : vector<8x32xf32>
    %505 = arith.mulf %496, %446 : vector<8x32xf32>
    %506 = arith.mulf %490, %498 : vector<8x32xf32>
    %507 = arith.addf %505, %506 : vector<8x32xf32>
    %508 = math.tanh %507 : vector<8x32xf32>
    %509 = arith.mulf %504, %508 : vector<8x32xf32>
    %510 = tpu.concatenate %484, %509 in 1 : vector<8x32xf32>, vector<8x32xf32> -> vector<8x64xf32>
    %c40_231 = arith.constant 40 : index
    %c0_232 = arith.constant 0 : index
    %511 = vector.load %arg9[%c40_231, %c0_232] : memref<64x64xf32, #tpu.memory_space<vmem>>, vector<8x32xf32>
    tpu.vector_store %arg9[%c40_231, %c0_232], %484 {strides = array<i32>} : memref<64x64xf32, #tpu.memory_space<vmem>>, vector<8x32xf32>,
    %c16_233 = arith.constant 16 : index
    %c32_234 = arith.constant 32 : index
    %512 = vector.load %arg9[%c16_233, %c32_234] : memref<64x64xf32, #tpu.memory_space<vmem>>, vector<8x32xf32>
    tpu.vector_store %arg9[%c16_233, %c32_234], %509 {strides = array<i32>} : memref<64x64xf32, #tpu.memory_space<vmem>>, vector<8x32xf32>,
    %513 = arith.truncf %510 : vector<8x64xf32> to vector<8x64xbf16>
    %cst_235 = arith.constant dense<0.000000e+00> : vector<8x256xf32>
    %514 = tpu.matmul %513, %135, %cst_235 {dimension_numbers = #tpu.dot_dimension_numbers<[1], [0], [0], [1], [0, 0, 1, 1], [], []>} : vector<8x64xbf16>, vector<64x256xbf16>, vector<8x256xf32> -> vector<8x256xf32>
    %c48_236 = arith.constant 48 : index
    %c0_237 = arith.constant 0 : index
    %515 = vector.load %arg10[%c48_236, %c0_237] : memref<64x256xf32, #tpu.memory_space<vmem>>, vector<8x128xf32>
    %516 = vector.extract_strided_slice %514 {offsets = [0, 0], sizes = [8, 128], strides = [1, 1]} : vector<8x256xf32> to vector<8x128xf32>
    %517 = arith.addf %515, %516 : vector<8x128xf32>
    %c8_238 = arith.constant 8 : index
    %c128_239 = arith.constant 128 : index
    %518 = vector.load %arg10[%c8_238, %c128_239] : memref<64x256xf32, #tpu.memory_space<vmem>>, vector<8x128xf32>
    %519 = vector.extract_strided_slice %514 {offsets = [0, 128], sizes = [8, 128], strides = [1, 1]} : vector<8x256xf32> to vector<8x128xf32>
    %520 = arith.addf %518, %519 : vector<8x128xf32>
    %521 = vector.extract_strided_slice %517 {offsets = [0, 0], sizes = [8, 32], strides = [1, 1]} : vector<8x128xf32> to vector<8x32xf32>
    %522 = arith.negf %521 : vector<8x32xf32>
    %523 = math.exp %522 : vector<8x32xf32>
    %cst_240 = arith.constant 1.000000e+00 : f32
    %524 = vector.broadcast %cst_240 : f32 to vector<8x32xf32>
    %525 = arith.addf %524, %523 : vector<8x32xf32>
    %526 = arith.divf %524, %525 : vector<8x32xf32>
    %527 = vector.extract_strided_slice %517 {offsets = [0, 32], sizes = [8, 32], strides = [1, 1]} : vector<8x128xf32> to vector<8x32xf32>
    %528 = arith.negf %527 : vector<8x32xf32>
    %529 = math.exp %528 : vector<8x32xf32>
    %cst_241 = arith.constant 1.000000e+00 : f32
    %530 = vector.broadcast %cst_241 : f32 to vector<8x32xf32>
    %531 = arith.addf %530, %529 : vector<8x32xf32>
    %532 = arith.divf %530, %531 : vector<8x32xf32>
    %533 = vector.extract_strided_slice %517 {offsets = [0, 64], sizes = [8, 32], strides = [1, 1]} : vector<8x128xf32> to vector<8x32xf32>
    %534 = math.tanh %533 : vector<8x32xf32>
    %535 = vector.extract_strided_slice %517 {offsets = [0, 96], sizes = [8, 32], strides = [1, 1]} : vector<8x128xf32> to vector<8x32xf32>
    %536 = arith.negf %535 : vector<8x32xf32>
    %537 = math.exp %536 : vector<8x32xf32>
    %cst_242 = arith.constant 1.000000e+00 : f32
    %538 = vector.broadcast %cst_242 : f32 to vector<8x32xf32>
    %539 = arith.addf %538, %537 : vector<8x32xf32>
    %540 = arith.divf %538, %539 : vector<8x32xf32>
    %541 = arith.mulf %532, %482 : vector<8x32xf32>
    %542 = arith.mulf %526, %534 : vector<8x32xf32>
    %543 = arith.addf %541, %542 : vector<8x32xf32>
    %544 = math.tanh %543 : vector<8x32xf32>
    %545 = arith.mulf %540, %544 : vector<8x32xf32>
    %546 = vector.extract_strided_slice %520 {offsets = [0, 0], sizes = [8, 32], strides = [1, 1]} : vector<8x128xf32> to vector<8x32xf32>
    %547 = arith.negf %546 : vector<8x32xf32>
    %548 = math.exp %547 : vector<8x32xf32>
    %cst_243 = arith.constant 1.000000e+00 : f32
    %549 = vector.broadcast %cst_243 : f32 to vector<8x32xf32>
    %550 = arith.addf %549, %548 : vector<8x32xf32>
    %551 = arith.divf %549, %550 : vector<8x32xf32>
    %552 = vector.extract_strided_slice %520 {offsets = [0, 32], sizes = [8, 32], strides = [1, 1]} : vector<8x128xf32> to vector<8x32xf32>
    %553 = arith.negf %552 : vector<8x32xf32>
    %554 = math.exp %553 : vector<8x32xf32>
    %cst_244 = arith.constant 1.000000e+00 : f32
    %555 = vector.broadcast %cst_244 : f32 to vector<8x32xf32>
    %556 = arith.addf %555, %554 : vector<8x32xf32>
    %557 = arith.divf %555, %556 : vector<8x32xf32>
    %558 = vector.extract_strided_slice %520 {offsets = [0, 64], sizes = [8, 32], strides = [1, 1]} : vector<8x128xf32> to vector<8x32xf32>
    %559 = math.tanh %558 : vector<8x32xf32>
    %560 = vector.extract_strided_slice %520 {offsets = [0, 96], sizes = [8, 32], strides = [1, 1]} : vector<8x128xf32> to vector<8x32xf32>
    %561 = arith.negf %560 : vector<8x32xf32>
    %562 = math.exp %561 : vector<8x32xf32>
    %cst_245 = arith.constant 1.000000e+00 : f32
    %563 = vector.broadcast %cst_245 : f32 to vector<8x32xf32>
    %564 = arith.addf %563, %562 : vector<8x32xf32>
    %565 = arith.divf %563, %564 : vector<8x32xf32>
    %566 = arith.mulf %557, %507 : vector<8x32xf32>
    %567 = arith.mulf %551, %559 : vector<8x32xf32>
    %568 = arith.addf %566, %567 : vector<8x32xf32>
    %569 = math.tanh %568 : vector<8x32xf32>
    %570 = arith.mulf %565, %569 : vector<8x32xf32>
    %571 = tpu.concatenate %545, %570 in 1 : vector<8x32xf32>, vector<8x32xf32> -> vector<8x64xf32>
    %c48_246 = arith.constant 48 : index
    %c0_247 = arith.constant 0 : index
    %572 = vector.load %arg9[%c48_246, %c0_247] : memref<64x64xf32, #tpu.memory_space<vmem>>, vector<8x32xf32>
    tpu.vector_store %arg9[%c48_246, %c0_247], %545 {strides = array<i32>} : memref<64x64xf32, #tpu.memory_space<vmem>>, vector<8x32xf32>,
    %c8_248 = arith.constant 8 : index
    %c32_249 = arith.constant 32 : index
    %573 = vector.load %arg9[%c8_248, %c32_249] : memref<64x64xf32, #tpu.memory_space<vmem>>, vector<8x32xf32>
    tpu.vector_store %arg9[%c8_248, %c32_249], %570 {strides = array<i32>} : memref<64x64xf32, #tpu.memory_space<vmem>>, vector<8x32xf32>,
    %574 = arith.truncf %571 : vector<8x64xf32> to vector<8x64xbf16>
    %cst_250 = arith.constant dense<0.000000e+00> : vector<8x256xf32>
    %575 = tpu.matmul %574, %135, %cst_250 {dimension_numbers = #tpu.dot_dimension_numbers<[1], [0], [0], [1], [0, 0, 1, 1], [], []>} : vector<8x64xbf16>, vector<64x256xbf16>, vector<8x256xf32> -> vector<8x256xf32>
    %c56_251 = arith.constant 56 : index
    %c0_252 = arith.constant 0 : index
    %576 = vector.load %arg10[%c56_251, %c0_252] : memref<64x256xf32, #tpu.memory_space<vmem>>, vector<8x128xf32>
    %577 = vector.extract_strided_slice %575 {offsets = [0, 0], sizes = [8, 128], strides = [1, 1]} : vector<8x256xf32> to vector<8x128xf32>
    %578 = arith.addf %576, %577 : vector<8x128xf32>
    %c0_253 = arith.constant 0 : index
    %c128_254 = arith.constant 128 : index
    %579 = vector.load %arg10[%c0_253, %c128_254] : memref<64x256xf32, #tpu.memory_space<vmem>>, vector<8x128xf32>
    %580 = vector.extract_strided_slice %575 {offsets = [0, 128], sizes = [8, 128], strides = [1, 1]} : vector<8x256xf32> to vector<8x128xf32>
    %581 = arith.addf %579, %580 : vector<8x128xf32>
    %582 = vector.extract_strided_slice %578 {offsets = [0, 0], sizes = [8, 32], strides = [1, 1]} : vector<8x128xf32> to vector<8x32xf32>
    %583 = arith.negf %582 : vector<8x32xf32>
    %584 = math.exp %583 : vector<8x32xf32>
    %cst_255 = arith.constant 1.000000e+00 : f32
    %585 = vector.broadcast %cst_255 : f32 to vector<8x32xf32>
    %586 = arith.addf %585, %584 : vector<8x32xf32>
    %587 = arith.divf %585, %586 : vector<8x32xf32>
    %588 = vector.extract_strided_slice %578 {offsets = [0, 32], sizes = [8, 32], strides = [1, 1]} : vector<8x128xf32> to vector<8x32xf32>
    %589 = arith.negf %588 : vector<8x32xf32>
    %590 = math.exp %589 : vector<8x32xf32>
    %cst_256 = arith.constant 1.000000e+00 : f32
    %591 = vector.broadcast %cst_256 : f32 to vector<8x32xf32>
    %592 = arith.addf %591, %590 : vector<8x32xf32>
    %593 = arith.divf %591, %592 : vector<8x32xf32>
    %594 = vector.extract_strided_slice %578 {offsets = [0, 64], sizes = [8, 32], strides = [1, 1]} : vector<8x128xf32> to vector<8x32xf32>
    %595 = math.tanh %594 : vector<8x32xf32>
    %596 = vector.extract_strided_slice %578 {offsets = [0, 96], sizes = [8, 32], strides = [1, 1]} : vector<8x128xf32> to vector<8x32xf32>
    %597 = arith.negf %596 : vector<8x32xf32>
    %598 = math.exp %597 : vector<8x32xf32>
    %cst_257 = arith.constant 1.000000e+00 : f32
    %599 = vector.broadcast %cst_257 : f32 to vector<8x32xf32>
    %600 = arith.addf %599, %598 : vector<8x32xf32>
    %601 = arith.divf %599, %600 : vector<8x32xf32>
    %602 = arith.mulf %593, %543 : vector<8x32xf32>
    %603 = arith.mulf %587, %595 : vector<8x32xf32>
    %604 = arith.addf %602, %603 : vector<8x32xf32>
    %605 = math.tanh %604 : vector<8x32xf32>
    %606 = arith.mulf %601, %605 : vector<8x32xf32>
    %607 = vector.extract_strided_slice %581 {offsets = [0, 0], sizes = [8, 32], strides = [1, 1]} : vector<8x128xf32> to vector<8x32xf32>
    %608 = arith.negf %607 : vector<8x32xf32>
    %609 = math.exp %608 : vector<8x32xf32>
    %cst_258 = arith.constant 1.000000e+00 : f32
    %610 = vector.broadcast %cst_258 : f32 to vector<8x32xf32>
    %611 = arith.addf %610, %609 : vector<8x32xf32>
    %612 = arith.divf %610, %611 : vector<8x32xf32>
    %613 = vector.extract_strided_slice %581 {offsets = [0, 32], sizes = [8, 32], strides = [1, 1]} : vector<8x128xf32> to vector<8x32xf32>
    %614 = arith.negf %613 : vector<8x32xf32>
    %615 = math.exp %614 : vector<8x32xf32>
    %cst_259 = arith.constant 1.000000e+00 : f32
    %616 = vector.broadcast %cst_259 : f32 to vector<8x32xf32>
    %617 = arith.addf %616, %615 : vector<8x32xf32>
    %618 = arith.divf %616, %617 : vector<8x32xf32>
    %619 = vector.extract_strided_slice %581 {offsets = [0, 64], sizes = [8, 32], strides = [1, 1]} : vector<8x128xf32> to vector<8x32xf32>
    %620 = math.tanh %619 : vector<8x32xf32>
    %621 = vector.extract_strided_slice %581 {offsets = [0, 96], sizes = [8, 32], strides = [1, 1]} : vector<8x128xf32> to vector<8x32xf32>
    %622 = arith.negf %621 : vector<8x32xf32>
    %623 = math.exp %622 : vector<8x32xf32>
    %cst_260 = arith.constant 1.000000e+00 : f32
    %624 = vector.broadcast %cst_260 : f32 to vector<8x32xf32>
    %625 = arith.addf %624, %623 : vector<8x32xf32>
    %626 = arith.divf %624, %625 : vector<8x32xf32>
    %627 = arith.mulf %618, %568 : vector<8x32xf32>
    %628 = arith.mulf %612, %620 : vector<8x32xf32>
    %629 = arith.addf %627, %628 : vector<8x32xf32>
    %630 = math.tanh %629 : vector<8x32xf32>
    %631 = arith.mulf %626, %630 : vector<8x32xf32>
    %c56_261 = arith.constant 56 : index
    %c0_262 = arith.constant 0 : index
    %632 = vector.load %arg9[%c56_261, %c0_262] : memref<64x64xf32, #tpu.memory_space<vmem>>, vector<8x32xf32>
    tpu.vector_store %arg9[%c56_261, %c0_262], %606 {strides = array<i32>} : memref<64x64xf32, #tpu.memory_space<vmem>>, vector<8x32xf32>,
    %c0_263 = arith.constant 0 : index
    %c32_264 = arith.constant 32 : index
    %633 = vector.load %arg9[%c0_263, %c32_264] : memref<64x64xf32, #tpu.memory_space<vmem>>, vector<8x32xf32>
    tpu.vector_store %arg9[%c0_263, %c32_264], %631 {strides = array<i32>} : memref<64x64xf32, #tpu.memory_space<vmem>>, vector<8x32xf32>,
    %c1_265 = arith.constant 1 : index
    %c0_266 = arith.constant 0 : index
    %c0_267 = arith.constant 0 : index
    %634 = vector.load %arg2[%c1_265, %c0_266, %c0_267] : memref<2x64x256xbf16, #tpu.memory_space<vmem>>, vector<1x64x256xbf16>
    %635 = vector.shape_cast %634 : vector<1x64x256xbf16> to vector<64x256xbf16>
    %c1_268 = arith.constant 1 : index
    %c0_269 = arith.constant 0 : index
    %c0_270 = arith.constant 0 : index
    %636 = vector.load %arg3[%c1_268, %c0_269, %c0_270] : memref<2x64x256xbf16, #tpu.memory_space<vmem>>, vector<1x64x256xbf16>
    %637 = vector.shape_cast %636 : vector<1x64x256xbf16> to vector<64x256xbf16>
    %c1_271 = arith.constant 1 : index
    %c0_272 = arith.constant 0 : index
    %c0_273 = arith.constant 0 : index
    %638 = vector.load %arg4[%c1_271, %c0_272, %c0_273] : memref<2x1x256xf32, #tpu.memory_space<vmem>>, vector<1x1x256xf32>
    %639 = vector.shape_cast %638 : vector<1x1x256xf32> to vector<1x256xf32>
    %c0_274 = arith.constant 0 : index
    %c0_275 = arith.constant 0 : index
    %640 = vector.load %arg9[%c0_274, %c0_275] : memref<64x64xf32, #tpu.memory_space<vmem>>, vector<64x64xf32>
    %641 = arith.truncf %640 : vector<64x64xf32> to vector<64x64xbf16>
    %cst_276 = arith.constant dense<0.000000e+00> : vector<64x256xf32>
    %642 = tpu.matmul %641, %635, %cst_276 {dimension_numbers = #tpu.dot_dimension_numbers<[1], [0], [0], [1], [0, 0, 1, 1], [], []>} : vector<64x64xbf16>, vector<64x256xbf16>, vector<64x256xf32> -> vector<64x256xf32>
    %643 = vector.broadcast %639 : vector<1x256xf32> to vector<64x256xf32>
    %644 = arith.addf %642, %643 : vector<64x256xf32>
    %c0_277 = arith.constant 0 : index
    %c0_278 = arith.constant 0 : index
    %645 = vector.load %arg10[%c0_277, %c0_278] : memref<64x256xf32, #tpu.memory_space<vmem>>, vector<64x256xf32>
    tpu.vector_store %arg10[%c0_277, %c0_278], %644 {strides = array<i32>} : memref<64x256xf32, #tpu.memory_space<vmem>>, vector<64x256xf32>,
    %cst_279 = arith.constant 0.000000e+00 : f32
    %646 = vector.broadcast %cst_279 : f32 to vector<8x64xf32>
    %cst_280 = arith.constant 0.000000e+00 : f32
    %647 = vector.broadcast %cst_280 : f32 to vector<8x32xf32>
    %cst_281 = arith.constant 0.000000e+00 : f32
    %648 = vector.broadcast %cst_281 : f32 to vector<8x32xf32>
    %649 = arith.truncf %646 : vector<8x64xf32> to vector<8x64xbf16>
    %cst_282 = arith.constant dense<0.000000e+00> : vector<8x256xf32>
    %650 = tpu.matmul %649, %637, %cst_282 {dimension_numbers = #tpu.dot_dimension_numbers<[1], [0], [0], [1], [0, 0, 1, 1], [], []>} : vector<8x64xbf16>, vector<64x256xbf16>, vector<8x256xf32> -> vector<8x256xf32>
    %c0_283 = arith.constant 0 : index
    %c0_284 = arith.constant 0 : index
    %651 = vector.load %arg10[%c0_283, %c0_284] : memref<64x256xf32, #tpu.memory_space<vmem>>, vector<8x128xf32>
    %652 = vector.extract_strided_slice %650 {offsets = [0, 0], sizes = [8, 128], strides = [1, 1]} : vector<8x256xf32> to vector<8x128xf32>
    %653 = arith.addf %651, %652 : vector<8x128xf32>
    %c56_285 = arith.constant 56 : index
    %c128_286 = arith.constant 128 : index
    %654 = vector.load %arg10[%c56_285, %c128_286] : memref<64x256xf32, #tpu.memory_space<vmem>>, vector<8x128xf32>
    %655 = vector.extract_strided_slice %650 {offsets = [0, 128], sizes = [8, 128], strides = [1, 1]} : vector<8x256xf32> to vector<8x128xf32>
    %656 = arith.addf %654, %655 : vector<8x128xf32>
    %657 = vector.extract_strided_slice %653 {offsets = [0, 0], sizes = [8, 32], strides = [1, 1]} : vector<8x128xf32> to vector<8x32xf32>
    %658 = arith.negf %657 : vector<8x32xf32>
    %659 = math.exp %658 : vector<8x32xf32>
    %cst_287 = arith.constant 1.000000e+00 : f32
    %660 = vector.broadcast %cst_287 : f32 to vector<8x32xf32>
    %661 = arith.addf %660, %659 : vector<8x32xf32>
    %662 = arith.divf %660, %661 : vector<8x32xf32>
    %663 = vector.extract_strided_slice %653 {offsets = [0, 32], sizes = [8, 32], strides = [1, 1]} : vector<8x128xf32> to vector<8x32xf32>
    %664 = arith.negf %663 : vector<8x32xf32>
    %665 = math.exp %664 : vector<8x32xf32>
    %cst_288 = arith.constant 1.000000e+00 : f32
    %666 = vector.broadcast %cst_288 : f32 to vector<8x32xf32>
    %667 = arith.addf %666, %665 : vector<8x32xf32>
    %668 = arith.divf %666, %667 : vector<8x32xf32>
    %669 = vector.extract_strided_slice %653 {offsets = [0, 64], sizes = [8, 32], strides = [1, 1]} : vector<8x128xf32> to vector<8x32xf32>
    %670 = math.tanh %669 : vector<8x32xf32>
    %671 = vector.extract_strided_slice %653 {offsets = [0, 96], sizes = [8, 32], strides = [1, 1]} : vector<8x128xf32> to vector<8x32xf32>
    %672 = arith.negf %671 : vector<8x32xf32>
    %673 = math.exp %672 : vector<8x32xf32>
    %cst_289 = arith.constant 1.000000e+00 : f32
    %674 = vector.broadcast %cst_289 : f32 to vector<8x32xf32>
    %675 = arith.addf %674, %673 : vector<8x32xf32>
    %676 = arith.divf %674, %675 : vector<8x32xf32>
    %677 = arith.mulf %668, %647 : vector<8x32xf32>
    %678 = arith.mulf %662, %670 : vector<8x32xf32>
    %679 = arith.addf %677, %678 : vector<8x32xf32>
    %680 = math.tanh %679 : vector<8x32xf32>
    %681 = arith.mulf %676, %680 : vector<8x32xf32>
    %682 = vector.extract_strided_slice %656 {offsets = [0, 0], sizes = [8, 32], strides = [1, 1]} : vector<8x128xf32> to vector<8x32xf32>
    %683 = arith.negf %682 : vector<8x32xf32>
    %684 = math.exp %683 : vector<8x32xf32>
    %cst_290 = arith.constant 1.000000e+00 : f32
    %685 = vector.broadcast %cst_290 : f32 to vector<8x32xf32>
    %686 = arith.addf %685, %684 : vector<8x32xf32>
    %687 = arith.divf %685, %686 : vector<8x32xf32>
    %688 = vector.extract_strided_slice %656 {offsets = [0, 32], sizes = [8, 32], strides = [1, 1]} : vector<8x128xf32> to vector<8x32xf32>
    %689 = arith.negf %688 : vector<8x32xf32>
    %690 = math.exp %689 : vector<8x32xf32>
    %cst_291 = arith.constant 1.000000e+00 : f32
    %691 = vector.broadcast %cst_291 : f32 to vector<8x32xf32>
    %692 = arith.addf %691, %690 : vector<8x32xf32>
    %693 = arith.divf %691, %692 : vector<8x32xf32>
    %694 = vector.extract_strided_slice %656 {offsets = [0, 64], sizes = [8, 32], strides = [1, 1]} : vector<8x128xf32> to vector<8x32xf32>
    %695 = math.tanh %694 : vector<8x32xf32>
    %696 = vector.extract_strided_slice %656 {offsets = [0, 96], sizes = [8, 32], strides = [1, 1]} : vector<8x128xf32> to vector<8x32xf32>
    %697 = arith.negf %696 : vector<8x32xf32>
    %698 = math.exp %697 : vector<8x32xf32>
    %cst_292 = arith.constant 1.000000e+00 : f32
    %699 = vector.broadcast %cst_292 : f32 to vector<8x32xf32>
    %700 = arith.addf %699, %698 : vector<8x32xf32>
    %701 = arith.divf %699, %700 : vector<8x32xf32>
    %702 = arith.mulf %693, %648 : vector<8x32xf32>
    %703 = arith.mulf %687, %695 : vector<8x32xf32>
    %704 = arith.addf %702, %703 : vector<8x32xf32>
    %705 = math.tanh %704 : vector<8x32xf32>
    %706 = arith.mulf %701, %705 : vector<8x32xf32>
    %707 = tpu.concatenate %681, %706 in 1 : vector<8x32xf32>, vector<8x32xf32> -> vector<8x64xf32>
    %708 = arith.truncf %707 : vector<8x64xf32> to vector<8x64xbf16>
    %cst_293 = arith.constant dense<0.000000e+00> : vector<8x256xf32>
    %709 = tpu.matmul %708, %637, %cst_293 {dimension_numbers = #tpu.dot_dimension_numbers<[1], [0], [0], [1], [0, 0, 1, 1], [], []>} : vector<8x64xbf16>, vector<64x256xbf16>, vector<8x256xf32> -> vector<8x256xf32>
    %c8_294 = arith.constant 8 : index
    %c0_295 = arith.constant 0 : index
    %710 = vector.load %arg10[%c8_294, %c0_295] : memref<64x256xf32, #tpu.memory_space<vmem>>, vector<8x128xf32>
    %711 = vector.extract_strided_slice %709 {offsets = [0, 0], sizes = [8, 128], strides = [1, 1]} : vector<8x256xf32> to vector<8x128xf32>
    %712 = arith.addf %710, %711 : vector<8x128xf32>
    %c48_296 = arith.constant 48 : index
    %c128_297 = arith.constant 128 : index
    %713 = vector.load %arg10[%c48_296, %c128_297] : memref<64x256xf32, #tpu.memory_space<vmem>>, vector<8x128xf32>
    %714 = vector.extract_strided_slice %709 {offsets = [0, 128], sizes = [8, 128], strides = [1, 1]} : vector<8x256xf32> to vector<8x128xf32>
    %715 = arith.addf %713, %714 : vector<8x128xf32>
    %716 = vector.extract_strided_slice %712 {offsets = [0, 0], sizes = [8, 32], strides = [1, 1]} : vector<8x128xf32> to vector<8x32xf32>
    %717 = arith.negf %716 : vector<8x32xf32>
    %718 = math.exp %717 : vector<8x32xf32>
    %cst_298 = arith.constant 1.000000e+00 : f32
    %719 = vector.broadcast %cst_298 : f32 to vector<8x32xf32>
    %720 = arith.addf %719, %718 : vector<8x32xf32>
    %721 = arith.divf %719, %720 : vector<8x32xf32>
    %722 = vector.extract_strided_slice %712 {offsets = [0, 32], sizes = [8, 32], strides = [1, 1]} : vector<8x128xf32> to vector<8x32xf32>
    %723 = arith.negf %722 : vector<8x32xf32>
    %724 = math.exp %723 : vector<8x32xf32>
    %cst_299 = arith.constant 1.000000e+00 : f32
    %725 = vector.broadcast %cst_299 : f32 to vector<8x32xf32>
    %726 = arith.addf %725, %724 : vector<8x32xf32>
    %727 = arith.divf %725, %726 : vector<8x32xf32>
    %728 = vector.extract_strided_slice %712 {offsets = [0, 64], sizes = [8, 32], strides = [1, 1]} : vector<8x128xf32> to vector<8x32xf32>
    %729 = math.tanh %728 : vector<8x32xf32>
    %730 = vector.extract_strided_slice %712 {offsets = [0, 96], sizes = [8, 32], strides = [1, 1]} : vector<8x128xf32> to vector<8x32xf32>
    %731 = arith.negf %730 : vector<8x32xf32>
    %732 = math.exp %731 : vector<8x32xf32>
    %cst_300 = arith.constant 1.000000e+00 : f32
    %733 = vector.broadcast %cst_300 : f32 to vector<8x32xf32>
    %734 = arith.addf %733, %732 : vector<8x32xf32>
    %735 = arith.divf %733, %734 : vector<8x32xf32>
    %736 = arith.mulf %727, %679 : vector<8x32xf32>
    %737 = arith.mulf %721, %729 : vector<8x32xf32>
    %738 = arith.addf %736, %737 : vector<8x32xf32>
    %739 = math.tanh %738 : vector<8x32xf32>
    %740 = arith.mulf %735, %739 : vector<8x32xf32>
    %741 = vector.extract_strided_slice %715 {offsets = [0, 0], sizes = [8, 32], strides = [1, 1]} : vector<8x128xf32> to vector<8x32xf32>
    %742 = arith.negf %741 : vector<8x32xf32>
    %743 = math.exp %742 : vector<8x32xf32>
    %cst_301 = arith.constant 1.000000e+00 : f32
    %744 = vector.broadcast %cst_301 : f32 to vector<8x32xf32>
    %745 = arith.addf %744, %743 : vector<8x32xf32>
    %746 = arith.divf %744, %745 : vector<8x32xf32>
    %747 = vector.extract_strided_slice %715 {offsets = [0, 32], sizes = [8, 32], strides = [1, 1]} : vector<8x128xf32> to vector<8x32xf32>
    %748 = arith.negf %747 : vector<8x32xf32>
    %749 = math.exp %748 : vector<8x32xf32>
    %cst_302 = arith.constant 1.000000e+00 : f32
    %750 = vector.broadcast %cst_302 : f32 to vector<8x32xf32>
    %751 = arith.addf %750, %749 : vector<8x32xf32>
    %752 = arith.divf %750, %751 : vector<8x32xf32>
    %753 = vector.extract_strided_slice %715 {offsets = [0, 64], sizes = [8, 32], strides = [1, 1]} : vector<8x128xf32> to vector<8x32xf32>
    %754 = math.tanh %753 : vector<8x32xf32>
    %755 = vector.extract_strided_slice %715 {offsets = [0, 96], sizes = [8, 32], strides = [1, 1]} : vector<8x128xf32> to vector<8x32xf32>
    %756 = arith.negf %755 : vector<8x32xf32>
    %757 = math.exp %756 : vector<8x32xf32>
    %cst_303 = arith.constant 1.000000e+00 : f32
    %758 = vector.broadcast %cst_303 : f32 to vector<8x32xf32>
    %759 = arith.addf %758, %757 : vector<8x32xf32>
    %760 = arith.divf %758, %759 : vector<8x32xf32>
    %761 = arith.mulf %752, %704 : vector<8x32xf32>
    %762 = arith.mulf %746, %754 : vector<8x32xf32>
    %763 = arith.addf %761, %762 : vector<8x32xf32>
    %764 = math.tanh %763 : vector<8x32xf32>
    %765 = arith.mulf %760, %764 : vector<8x32xf32>
    %766 = tpu.concatenate %740, %765 in 1 : vector<8x32xf32>, vector<8x32xf32> -> vector<8x64xf32>
    %767 = arith.truncf %766 : vector<8x64xf32> to vector<8x64xbf16>
    %cst_304 = arith.constant dense<0.000000e+00> : vector<8x256xf32>
    %768 = tpu.matmul %767, %637, %cst_304 {dimension_numbers = #tpu.dot_dimension_numbers<[1], [0], [0], [1], [0, 0, 1, 1], [], []>} : vector<8x64xbf16>, vector<64x256xbf16>, vector<8x256xf32> -> vector<8x256xf32>
    %c16_305 = arith.constant 16 : index
    %c0_306 = arith.constant 0 : index
    %769 = vector.load %arg10[%c16_305, %c0_306] : memref<64x256xf32, #tpu.memory_space<vmem>>, vector<8x128xf32>
    %770 = vector.extract_strided_slice %768 {offsets = [0, 0], sizes = [8, 128], strides = [1, 1]} : vector<8x256xf32> to vector<8x128xf32>
    %771 = arith.addf %769, %770 : vector<8x128xf32>
    %c40_307 = arith.constant 40 : index
    %c128_308 = arith.constant 128 : index
    %772 = vector.load %arg10[%c40_307, %c128_308] : memref<64x256xf32, #tpu.memory_space<vmem>>, vector<8x128xf32>
    %773 = vector.extract_strided_slice %768 {offsets = [0, 128], sizes = [8, 128], strides = [1, 1]} : vector<8x256xf32> to vector<8x128xf32>
    %774 = arith.addf %772, %773 : vector<8x128xf32>
    %775 = vector.extract_strided_slice %771 {offsets = [0, 0], sizes = [8, 32], strides = [1, 1]} : vector<8x128xf32> to vector<8x32xf32>
    %776 = arith.negf %775 : vector<8x32xf32>
    %777 = math.exp %776 : vector<8x32xf32>
    %cst_309 = arith.constant 1.000000e+00 : f32
    %778 = vector.broadcast %cst_309 : f32 to vector<8x32xf32>
    %779 = arith.addf %778, %777 : vector<8x32xf32>
    %780 = arith.divf %778, %779 : vector<8x32xf32>
    %781 = vector.extract_strided_slice %771 {offsets = [0, 32], sizes = [8, 32], strides = [1, 1]} : vector<8x128xf32> to vector<8x32xf32>
    %782 = arith.negf %781 : vector<8x32xf32>
    %783 = math.exp %782 : vector<8x32xf32>
    %cst_310 = arith.constant 1.000000e+00 : f32
    %784 = vector.broadcast %cst_310 : f32 to vector<8x32xf32>
    %785 = arith.addf %784, %783 : vector<8x32xf32>
    %786 = arith.divf %784, %785 : vector<8x32xf32>
    %787 = vector.extract_strided_slice %771 {offsets = [0, 64], sizes = [8, 32], strides = [1, 1]} : vector<8x128xf32> to vector<8x32xf32>
    %788 = math.tanh %787 : vector<8x32xf32>
    %789 = vector.extract_strided_slice %771 {offsets = [0, 96], sizes = [8, 32], strides = [1, 1]} : vector<8x128xf32> to vector<8x32xf32>
    %790 = arith.negf %789 : vector<8x32xf32>
    %791 = math.exp %790 : vector<8x32xf32>
    %cst_311 = arith.constant 1.000000e+00 : f32
    %792 = vector.broadcast %cst_311 : f32 to vector<8x32xf32>
    %793 = arith.addf %792, %791 : vector<8x32xf32>
    %794 = arith.divf %792, %793 : vector<8x32xf32>
    %795 = arith.mulf %786, %738 : vector<8x32xf32>
    %796 = arith.mulf %780, %788 : vector<8x32xf32>
    %797 = arith.addf %795, %796 : vector<8x32xf32>
    %798 = math.tanh %797 : vector<8x32xf32>
    %799 = arith.mulf %794, %798 : vector<8x32xf32>
    %800 = vector.extract_strided_slice %774 {offsets = [0, 0], sizes = [8, 32], strides = [1, 1]} : vector<8x128xf32> to vector<8x32xf32>
    %801 = arith.negf %800 : vector<8x32xf32>
    %802 = math.exp %801 : vector<8x32xf32>
    %cst_312 = arith.constant 1.000000e+00 : f32
    %803 = vector.broadcast %cst_312 : f32 to vector<8x32xf32>
    %804 = arith.addf %803, %802 : vector<8x32xf32>
    %805 = arith.divf %803, %804 : vector<8x32xf32>
    %806 = vector.extract_strided_slice %774 {offsets = [0, 32], sizes = [8, 32], strides = [1, 1]} : vector<8x128xf32> to vector<8x32xf32>
    %807 = arith.negf %806 : vector<8x32xf32>
    %808 = math.exp %807 : vector<8x32xf32>
    %cst_313 = arith.constant 1.000000e+00 : f32
    %809 = vector.broadcast %cst_313 : f32 to vector<8x32xf32>
    %810 = arith.addf %809, %808 : vector<8x32xf32>
    %811 = arith.divf %809, %810 : vector<8x32xf32>
    %812 = vector.extract_strided_slice %774 {offsets = [0, 64], sizes = [8, 32], strides = [1, 1]} : vector<8x128xf32> to vector<8x32xf32>
    %813 = math.tanh %812 : vector<8x32xf32>
    %814 = vector.extract_strided_slice %774 {offsets = [0, 96], sizes = [8, 32], strides = [1, 1]} : vector<8x128xf32> to vector<8x32xf32>
    %815 = arith.negf %814 : vector<8x32xf32>
    %816 = math.exp %815 : vector<8x32xf32>
    %cst_314 = arith.constant 1.000000e+00 : f32
    %817 = vector.broadcast %cst_314 : f32 to vector<8x32xf32>
    %818 = arith.addf %817, %816 : vector<8x32xf32>
    %819 = arith.divf %817, %818 : vector<8x32xf32>
    %820 = arith.mulf %811, %763 : vector<8x32xf32>
    %821 = arith.mulf %805, %813 : vector<8x32xf32>
    %822 = arith.addf %820, %821 : vector<8x32xf32>
    %823 = math.tanh %822 : vector<8x32xf32>
    %824 = arith.mulf %819, %823 : vector<8x32xf32>
    %825 = tpu.concatenate %799, %824 in 1 : vector<8x32xf32>, vector<8x32xf32> -> vector<8x64xf32>
    %826 = arith.truncf %825 : vector<8x64xf32> to vector<8x64xbf16>
    %cst_315 = arith.constant dense<0.000000e+00> : vector<8x256xf32>
    %827 = tpu.matmul %826, %637, %cst_315 {dimension_numbers = #tpu.dot_dimension_numbers<[1], [0], [0], [1], [0, 0, 1, 1], [], []>} : vector<8x64xbf16>, vector<64x256xbf16>, vector<8x256xf32> -> vector<8x256xf32>
    %c24_316 = arith.constant 24 : index
    %c0_317 = arith.constant 0 : index
    %828 = vector.load %arg10[%c24_316, %c0_317] : memref<64x256xf32, #tpu.memory_space<vmem>>, vector<8x128xf32>
    %829 = vector.extract_strided_slice %827 {offsets = [0, 0], sizes = [8, 128], strides = [1, 1]} : vector<8x256xf32> to vector<8x128xf32>
    %830 = arith.addf %828, %829 : vector<8x128xf32>
    %c32_318 = arith.constant 32 : index
    %c128_319 = arith.constant 128 : index
    %831 = vector.load %arg10[%c32_318, %c128_319] : memref<64x256xf32, #tpu.memory_space<vmem>>, vector<8x128xf32>
    %832 = vector.extract_strided_slice %827 {offsets = [0, 128], sizes = [8, 128], strides = [1, 1]} : vector<8x256xf32> to vector<8x128xf32>
    %833 = arith.addf %831, %832 : vector<8x128xf32>
    %834 = vector.extract_strided_slice %830 {offsets = [0, 0], sizes = [8, 32], strides = [1, 1]} : vector<8x128xf32> to vector<8x32xf32>
    %835 = arith.negf %834 : vector<8x32xf32>
    %836 = math.exp %835 : vector<8x32xf32>
    %cst_320 = arith.constant 1.000000e+00 : f32
    %837 = vector.broadcast %cst_320 : f32 to vector<8x32xf32>
    %838 = arith.addf %837, %836 : vector<8x32xf32>
    %839 = arith.divf %837, %838 : vector<8x32xf32>
    %840 = vector.extract_strided_slice %830 {offsets = [0, 32], sizes = [8, 32], strides = [1, 1]} : vector<8x128xf32> to vector<8x32xf32>
    %841 = arith.negf %840 : vector<8x32xf32>
    %842 = math.exp %841 : vector<8x32xf32>
    %cst_321 = arith.constant 1.000000e+00 : f32
    %843 = vector.broadcast %cst_321 : f32 to vector<8x32xf32>
    %844 = arith.addf %843, %842 : vector<8x32xf32>
    %845 = arith.divf %843, %844 : vector<8x32xf32>
    %846 = vector.extract_strided_slice %830 {offsets = [0, 64], sizes = [8, 32], strides = [1, 1]} : vector<8x128xf32> to vector<8x32xf32>
    %847 = math.tanh %846 : vector<8x32xf32>
    %848 = vector.extract_strided_slice %830 {offsets = [0, 96], sizes = [8, 32], strides = [1, 1]} : vector<8x128xf32> to vector<8x32xf32>
    %849 = arith.negf %848 : vector<8x32xf32>
    %850 = math.exp %849 : vector<8x32xf32>
    %cst_322 = arith.constant 1.000000e+00 : f32
    %851 = vector.broadcast %cst_322 : f32 to vector<8x32xf32>
    %852 = arith.addf %851, %850 : vector<8x32xf32>
    %853 = arith.divf %851, %852 : vector<8x32xf32>
    %854 = arith.mulf %845, %797 : vector<8x32xf32>
    %855 = arith.mulf %839, %847 : vector<8x32xf32>
    %856 = arith.addf %854, %855 : vector<8x32xf32>
    %857 = math.tanh %856 : vector<8x32xf32>
    %858 = arith.mulf %853, %857 : vector<8x32xf32>
    %859 = vector.extract_strided_slice %833 {offsets = [0, 0], sizes = [8, 32], strides = [1, 1]} : vector<8x128xf32> to vector<8x32xf32>
    %860 = arith.negf %859 : vector<8x32xf32>
    %861 = math.exp %860 : vector<8x32xf32>
    %cst_323 = arith.constant 1.000000e+00 : f32
    %862 = vector.broadcast %cst_323 : f32 to vector<8x32xf32>
    %863 = arith.addf %862, %861 : vector<8x32xf32>
    %864 = arith.divf %862, %863 : vector<8x32xf32>
    %865 = vector.extract_strided_slice %833 {offsets = [0, 32], sizes = [8, 32], strides = [1, 1]} : vector<8x128xf32> to vector<8x32xf32>
    %866 = arith.negf %865 : vector<8x32xf32>
    %867 = math.exp %866 : vector<8x32xf32>
    %cst_324 = arith.constant 1.000000e+00 : f32
    %868 = vector.broadcast %cst_324 : f32 to vector<8x32xf32>
    %869 = arith.addf %868, %867 : vector<8x32xf32>
    %870 = arith.divf %868, %869 : vector<8x32xf32>
    %871 = vector.extract_strided_slice %833 {offsets = [0, 64], sizes = [8, 32], strides = [1, 1]} : vector<8x128xf32> to vector<8x32xf32>
    %872 = math.tanh %871 : vector<8x32xf32>
    %873 = vector.extract_strided_slice %833 {offsets = [0, 96], sizes = [8, 32], strides = [1, 1]} : vector<8x128xf32> to vector<8x32xf32>
    %874 = arith.negf %873 : vector<8x32xf32>
    %875 = math.exp %874 : vector<8x32xf32>
    %cst_325 = arith.constant 1.000000e+00 : f32
    %876 = vector.broadcast %cst_325 : f32 to vector<8x32xf32>
    %877 = arith.addf %876, %875 : vector<8x32xf32>
    %878 = arith.divf %876, %877 : vector<8x32xf32>
    %879 = arith.mulf %870, %822 : vector<8x32xf32>
    %880 = arith.mulf %864, %872 : vector<8x32xf32>
    %881 = arith.addf %879, %880 : vector<8x32xf32>
    %882 = math.tanh %881 : vector<8x32xf32>
    %883 = arith.mulf %878, %882 : vector<8x32xf32>
    %884 = tpu.concatenate %858, %883 in 1 : vector<8x32xf32>, vector<8x32xf32> -> vector<8x64xf32>
    %885 = arith.truncf %884 : vector<8x64xf32> to vector<8x64xbf16>
    %cst_326 = arith.constant dense<0.000000e+00> : vector<8x256xf32>
    %886 = tpu.matmul %885, %637, %cst_326 {dimension_numbers = #tpu.dot_dimension_numbers<[1], [0], [0], [1], [0, 0, 1, 1], [], []>} : vector<8x64xbf16>, vector<64x256xbf16>, vector<8x256xf32> -> vector<8x256xf32>
    %c32_327 = arith.constant 32 : index
    %c0_328 = arith.constant 0 : index
    %887 = vector.load %arg10[%c32_327, %c0_328] : memref<64x256xf32, #tpu.memory_space<vmem>>, vector<8x128xf32>
    %888 = vector.extract_strided_slice %886 {offsets = [0, 0], sizes = [8, 128], strides = [1, 1]} : vector<8x256xf32> to vector<8x128xf32>
    %889 = arith.addf %887, %888 : vector<8x128xf32>
    %c24_329 = arith.constant 24 : index
    %c128_330 = arith.constant 128 : index
    %890 = vector.load %arg10[%c24_329, %c128_330] : memref<64x256xf32, #tpu.memory_space<vmem>>, vector<8x128xf32>
    %891 = vector.extract_strided_slice %886 {offsets = [0, 128], sizes = [8, 128], strides = [1, 1]} : vector<8x256xf32> to vector<8x128xf32>
    %892 = arith.addf %890, %891 : vector<8x128xf32>
    %893 = vector.extract_strided_slice %889 {offsets = [0, 0], sizes = [8, 32], strides = [1, 1]} : vector<8x128xf32> to vector<8x32xf32>
    %894 = arith.negf %893 : vector<8x32xf32>
    %895 = math.exp %894 : vector<8x32xf32>
    %cst_331 = arith.constant 1.000000e+00 : f32
    %896 = vector.broadcast %cst_331 : f32 to vector<8x32xf32>
    %897 = arith.addf %896, %895 : vector<8x32xf32>
    %898 = arith.divf %896, %897 : vector<8x32xf32>
    %899 = vector.extract_strided_slice %889 {offsets = [0, 32], sizes = [8, 32], strides = [1, 1]} : vector<8x128xf32> to vector<8x32xf32>
    %900 = arith.negf %899 : vector<8x32xf32>
    %901 = math.exp %900 : vector<8x32xf32>
    %cst_332 = arith.constant 1.000000e+00 : f32
    %902 = vector.broadcast %cst_332 : f32 to vector<8x32xf32>
    %903 = arith.addf %902, %901 : vector<8x32xf32>
    %904 = arith.divf %902, %903 : vector<8x32xf32>
    %905 = vector.extract_strided_slice %889 {offsets = [0, 64], sizes = [8, 32], strides = [1, 1]} : vector<8x128xf32> to vector<8x32xf32>
    %906 = math.tanh %905 : vector<8x32xf32>
    %907 = vector.extract_strided_slice %889 {offsets = [0, 96], sizes = [8, 32], strides = [1, 1]} : vector<8x128xf32> to vector<8x32xf32>
    %908 = arith.negf %907 : vector<8x32xf32>
    %909 = math.exp %908 : vector<8x32xf32>
    %cst_333 = arith.constant 1.000000e+00 : f32
    %910 = vector.broadcast %cst_333 : f32 to vector<8x32xf32>
    %911 = arith.addf %910, %909 : vector<8x32xf32>
    %912 = arith.divf %910, %911 : vector<8x32xf32>
    %913 = arith.mulf %904, %856 : vector<8x32xf32>
    %914 = arith.mulf %898, %906 : vector<8x32xf32>
    %915 = arith.addf %913, %914 : vector<8x32xf32>
    %916 = math.tanh %915 : vector<8x32xf32>
    %917 = arith.mulf %912, %916 : vector<8x32xf32>
    %918 = vector.extract_strided_slice %892 {offsets = [0, 0], sizes = [8, 32], strides = [1, 1]} : vector<8x128xf32> to vector<8x32xf32>
    %919 = arith.negf %918 : vector<8x32xf32>
    %920 = math.exp %919 : vector<8x32xf32>
    %cst_334 = arith.constant 1.000000e+00 : f32
    %921 = vector.broadcast %cst_334 : f32 to vector<8x32xf32>
    %922 = arith.addf %921, %920 : vector<8x32xf32>
    %923 = arith.divf %921, %922 : vector<8x32xf32>
    %924 = vector.extract_strided_slice %892 {offsets = [0, 32], sizes = [8, 32], strides = [1, 1]} : vector<8x128xf32> to vector<8x32xf32>
    %925 = arith.negf %924 : vector<8x32xf32>
    %926 = math.exp %925 : vector<8x32xf32>
    %cst_335 = arith.constant 1.000000e+00 : f32
    %927 = vector.broadcast %cst_335 : f32 to vector<8x32xf32>
    %928 = arith.addf %927, %926 : vector<8x32xf32>
    %929 = arith.divf %927, %928 : vector<8x32xf32>
    %930 = vector.extract_strided_slice %892 {offsets = [0, 64], sizes = [8, 32], strides = [1, 1]} : vector<8x128xf32> to vector<8x32xf32>
    %931 = math.tanh %930 : vector<8x32xf32>
    %932 = vector.extract_strided_slice %892 {offsets = [0, 96], sizes = [8, 32], strides = [1, 1]} : vector<8x128xf32> to vector<8x32xf32>
    %933 = arith.negf %932 : vector<8x32xf32>
    %934 = math.exp %933 : vector<8x32xf32>
    %cst_336 = arith.constant 1.000000e+00 : f32
    %935 = vector.broadcast %cst_336 : f32 to vector<8x32xf32>
    %936 = arith.addf %935, %934 : vector<8x32xf32>
    %937 = arith.divf %935, %936 : vector<8x32xf32>
    %938 = arith.mulf %929, %881 : vector<8x32xf32>
    %939 = arith.mulf %923, %931 : vector<8x32xf32>
    %940 = arith.addf %938, %939 : vector<8x32xf32>
    %941 = math.tanh %940 : vector<8x32xf32>
    %942 = arith.mulf %937, %941 : vector<8x32xf32>
    %943 = tpu.concatenate %917, %942 in 1 : vector<8x32xf32>, vector<8x32xf32> -> vector<8x64xf32>
    %944 = arith.truncf %943 : vector<8x64xf32> to vector<8x64xbf16>
    %cst_337 = arith.constant dense<0.000000e+00> : vector<8x256xf32>
    %945 = tpu.matmul %944, %637, %cst_337 {dimension_numbers = #tpu.dot_dimension_numbers<[1], [0], [0], [1], [0, 0, 1, 1], [], []>} : vector<8x64xbf16>, vector<64x256xbf16>, vector<8x256xf32> -> vector<8x256xf32>
    %c40_338 = arith.constant 40 : index
    %c0_339 = arith.constant 0 : index
    %946 = vector.load %arg10[%c40_338, %c0_339] : memref<64x256xf32, #tpu.memory_space<vmem>>, vector<8x128xf32>
    %947 = vector.extract_strided_slice %945 {offsets = [0, 0], sizes = [8, 128], strides = [1, 1]} : vector<8x256xf32> to vector<8x128xf32>
    %948 = arith.addf %946, %947 : vector<8x128xf32>
    %c16_340 = arith.constant 16 : index
    %c128_341 = arith.constant 128 : index
    %949 = vector.load %arg10[%c16_340, %c128_341] : memref<64x256xf32, #tpu.memory_space<vmem>>, vector<8x128xf32>
    %950 = vector.extract_strided_slice %945 {offsets = [0, 128], sizes = [8, 128], strides = [1, 1]} : vector<8x256xf32> to vector<8x128xf32>
    %951 = arith.addf %949, %950 : vector<8x128xf32>
    %952 = vector.extract_strided_slice %948 {offsets = [0, 0], sizes = [8, 32], strides = [1, 1]} : vector<8x128xf32> to vector<8x32xf32>
    %953 = arith.negf %952 : vector<8x32xf32>
    %954 = math.exp %953 : vector<8x32xf32>
    %cst_342 = arith.constant 1.000000e+00 : f32
    %955 = vector.broadcast %cst_342 : f32 to vector<8x32xf32>
    %956 = arith.addf %955, %954 : vector<8x32xf32>
    %957 = arith.divf %955, %956 : vector<8x32xf32>
    %958 = vector.extract_strided_slice %948 {offsets = [0, 32], sizes = [8, 32], strides = [1, 1]} : vector<8x128xf32> to vector<8x32xf32>
    %959 = arith.negf %958 : vector<8x32xf32>
    %960 = math.exp %959 : vector<8x32xf32>
    %cst_343 = arith.constant 1.000000e+00 : f32
    %961 = vector.broadcast %cst_343 : f32 to vector<8x32xf32>
    %962 = arith.addf %961, %960 : vector<8x32xf32>
    %963 = arith.divf %961, %962 : vector<8x32xf32>
    %964 = vector.extract_strided_slice %948 {offsets = [0, 64], sizes = [8, 32], strides = [1, 1]} : vector<8x128xf32> to vector<8x32xf32>
    %965 = math.tanh %964 : vector<8x32xf32>
    %966 = vector.extract_strided_slice %948 {offsets = [0, 96], sizes = [8, 32], strides = [1, 1]} : vector<8x128xf32> to vector<8x32xf32>
    %967 = arith.negf %966 : vector<8x32xf32>
    %968 = math.exp %967 : vector<8x32xf32>
    %cst_344 = arith.constant 1.000000e+00 : f32
    %969 = vector.broadcast %cst_344 : f32 to vector<8x32xf32>
    %970 = arith.addf %969, %968 : vector<8x32xf32>
    %971 = arith.divf %969, %970 : vector<8x32xf32>
    %972 = arith.mulf %963, %915 : vector<8x32xf32>
    %973 = arith.mulf %957, %965 : vector<8x32xf32>
    %974 = arith.addf %972, %973 : vector<8x32xf32>
    %975 = math.tanh %974 : vector<8x32xf32>
    %976 = arith.mulf %971, %975 : vector<8x32xf32>
    %977 = vector.extract_strided_slice %951 {offsets = [0, 0], sizes = [8, 32], strides = [1, 1]} : vector<8x128xf32> to vector<8x32xf32>
    %978 = arith.negf %977 : vector<8x32xf32>
    %979 = math.exp %978 : vector<8x32xf32>
    %cst_345 = arith.constant 1.000000e+00 : f32
    %980 = vector.broadcast %cst_345 : f32 to vector<8x32xf32>
    %981 = arith.addf %980, %979 : vector<8x32xf32>
    %982 = arith.divf %980, %981 : vector<8x32xf32>
    %983 = vector.extract_strided_slice %951 {offsets = [0, 32], sizes = [8, 32], strides = [1, 1]} : vector<8x128xf32> to vector<8x32xf32>
    %984 = arith.negf %983 : vector<8x32xf32>
    %985 = math.exp %984 : vector<8x32xf32>
    %cst_346 = arith.constant 1.000000e+00 : f32
    %986 = vector.broadcast %cst_346 : f32 to vector<8x32xf32>
    %987 = arith.addf %986, %985 : vector<8x32xf32>
    %988 = arith.divf %986, %987 : vector<8x32xf32>
    %989 = vector.extract_strided_slice %951 {offsets = [0, 64], sizes = [8, 32], strides = [1, 1]} : vector<8x128xf32> to vector<8x32xf32>
    %990 = math.tanh %989 : vector<8x32xf32>
    %991 = vector.extract_strided_slice %951 {offsets = [0, 96], sizes = [8, 32], strides = [1, 1]} : vector<8x128xf32> to vector<8x32xf32>
    %992 = arith.negf %991 : vector<8x32xf32>
    %993 = math.exp %992 : vector<8x32xf32>
    %cst_347 = arith.constant 1.000000e+00 : f32
    %994 = vector.broadcast %cst_347 : f32 to vector<8x32xf32>
    %995 = arith.addf %994, %993 : vector<8x32xf32>
    %996 = arith.divf %994, %995 : vector<8x32xf32>
    %997 = arith.mulf %988, %940 : vector<8x32xf32>
    %998 = arith.mulf %982, %990 : vector<8x32xf32>
    %999 = arith.addf %997, %998 : vector<8x32xf32>
    %1000 = math.tanh %999 : vector<8x32xf32>
    %1001 = arith.mulf %996, %1000 : vector<8x32xf32>
    %1002 = tpu.concatenate %976, %1001 in 1 : vector<8x32xf32>, vector<8x32xf32> -> vector<8x64xf32>
    %1003 = arith.truncf %1002 : vector<8x64xf32> to vector<8x64xbf16>
    %cst_348 = arith.constant dense<0.000000e+00> : vector<8x256xf32>
    %1004 = tpu.matmul %1003, %637, %cst_348 {dimension_numbers = #tpu.dot_dimension_numbers<[1], [0], [0], [1], [0, 0, 1, 1], [], []>} : vector<8x64xbf16>, vector<64x256xbf16>, vector<8x256xf32> -> vector<8x256xf32>
    %c48_349 = arith.constant 48 : index
    %c0_350 = arith.constant 0 : index
    %1005 = vector.load %arg10[%c48_349, %c0_350] : memref<64x256xf32, #tpu.memory_space<vmem>>, vector<8x128xf32>
    %1006 = vector.extract_strided_slice %1004 {offsets = [0, 0], sizes = [8, 128], strides = [1, 1]} : vector<8x256xf32> to vector<8x128xf32>
    %1007 = arith.addf %1005, %1006 : vector<8x128xf32>
    %c8_351 = arith.constant 8 : index
    %c128_352 = arith.constant 128 : index
    %1008 = vector.load %arg10[%c8_351, %c128_352] : memref<64x256xf32, #tpu.memory_space<vmem>>, vector<8x128xf32>
    %1009 = vector.extract_strided_slice %1004 {offsets = [0, 128], sizes = [8, 128], strides = [1, 1]} : vector<8x256xf32> to vector<8x128xf32>
    %1010 = arith.addf %1008, %1009 : vector<8x128xf32>
    %1011 = vector.extract_strided_slice %1007 {offsets = [0, 0], sizes = [8, 32], strides = [1, 1]} : vector<8x128xf32> to vector<8x32xf32>
    %1012 = arith.negf %1011 : vector<8x32xf32>
    %1013 = math.exp %1012 : vector<8x32xf32>
    %cst_353 = arith.constant 1.000000e+00 : f32
    %1014 = vector.broadcast %cst_353 : f32 to vector<8x32xf32>
    %1015 = arith.addf %1014, %1013 : vector<8x32xf32>
    %1016 = arith.divf %1014, %1015 : vector<8x32xf32>
    %1017 = vector.extract_strided_slice %1007 {offsets = [0, 32], sizes = [8, 32], strides = [1, 1]} : vector<8x128xf32> to vector<8x32xf32>
    %1018 = arith.negf %1017 : vector<8x32xf32>
    %1019 = math.exp %1018 : vector<8x32xf32>
    %cst_354 = arith.constant 1.000000e+00 : f32
    %1020 = vector.broadcast %cst_354 : f32 to vector<8x32xf32>
    %1021 = arith.addf %1020, %1019 : vector<8x32xf32>
    %1022 = arith.divf %1020, %1021 : vector<8x32xf32>
    %1023 = vector.extract_strided_slice %1007 {offsets = [0, 64], sizes = [8, 32], strides = [1, 1]} : vector<8x128xf32> to vector<8x32xf32>
    %1024 = math.tanh %1023 : vector<8x32xf32>
    %1025 = vector.extract_strided_slice %1007 {offsets = [0, 96], sizes = [8, 32], strides = [1, 1]} : vector<8x128xf32> to vector<8x32xf32>
    %1026 = arith.negf %1025 : vector<8x32xf32>
    %1027 = math.exp %1026 : vector<8x32xf32>
    %cst_355 = arith.constant 1.000000e+00 : f32
    %1028 = vector.broadcast %cst_355 : f32 to vector<8x32xf32>
    %1029 = arith.addf %1028, %1027 : vector<8x32xf32>
    %1030 = arith.divf %1028, %1029 : vector<8x32xf32>
    %1031 = arith.mulf %1022, %974 : vector<8x32xf32>
    %1032 = arith.mulf %1016, %1024 : vector<8x32xf32>
    %1033 = arith.addf %1031, %1032 : vector<8x32xf32>
    %1034 = math.tanh %1033 : vector<8x32xf32>
    %1035 = arith.mulf %1030, %1034 : vector<8x32xf32>
    %1036 = vector.extract_strided_slice %1010 {offsets = [0, 0], sizes = [8, 32], strides = [1, 1]} : vector<8x128xf32> to vector<8x32xf32>
    %1037 = arith.negf %1036 : vector<8x32xf32>
    %1038 = math.exp %1037 : vector<8x32xf32>
    %cst_356 = arith.constant 1.000000e+00 : f32
    %1039 = vector.broadcast %cst_356 : f32 to vector<8x32xf32>
    %1040 = arith.addf %1039, %1038 : vector<8x32xf32>
    %1041 = arith.divf %1039, %1040 : vector<8x32xf32>
    %1042 = vector.extract_strided_slice %1010 {offsets = [0, 32], sizes = [8, 32], strides = [1, 1]} : vector<8x128xf32> to vector<8x32xf32>
    %1043 = arith.negf %1042 : vector<8x32xf32>
    %1044 = math.exp %1043 : vector<8x32xf32>
    %cst_357 = arith.constant 1.000000e+00 : f32
    %1045 = vector.broadcast %cst_357 : f32 to vector<8x32xf32>
    %1046 = arith.addf %1045, %1044 : vector<8x32xf32>
    %1047 = arith.divf %1045, %1046 : vector<8x32xf32>
    %1048 = vector.extract_strided_slice %1010 {offsets = [0, 64], sizes = [8, 32], strides = [1, 1]} : vector<8x128xf32> to vector<8x32xf32>
    %1049 = math.tanh %1048 : vector<8x32xf32>
    %1050 = vector.extract_strided_slice %1010 {offsets = [0, 96], sizes = [8, 32], strides = [1, 1]} : vector<8x128xf32> to vector<8x32xf32>
    %1051 = arith.negf %1050 : vector<8x32xf32>
    %1052 = math.exp %1051 : vector<8x32xf32>
    %cst_358 = arith.constant 1.000000e+00 : f32
    %1053 = vector.broadcast %cst_358 : f32 to vector<8x32xf32>
    %1054 = arith.addf %1053, %1052 : vector<8x32xf32>
    %1055 = arith.divf %1053, %1054 : vector<8x32xf32>
    %1056 = arith.mulf %1047, %999 : vector<8x32xf32>
    %1057 = arith.mulf %1041, %1049 : vector<8x32xf32>
    %1058 = arith.addf %1056, %1057 : vector<8x32xf32>
    %1059 = math.tanh %1058 : vector<8x32xf32>
    %1060 = arith.mulf %1055, %1059 : vector<8x32xf32>
    %1061 = tpu.concatenate %1035, %1060 in 1 : vector<8x32xf32>, vector<8x32xf32> -> vector<8x64xf32>
    %1062 = arith.truncf %1061 : vector<8x64xf32> to vector<8x64xbf16>
    %cst_359 = arith.constant dense<0.000000e+00> : vector<8x256xf32>
    %1063 = tpu.matmul %1062, %637, %cst_359 {dimension_numbers = #tpu.dot_dimension_numbers<[1], [0], [0], [1], [0, 0, 1, 1], [], []>} : vector<8x64xbf16>, vector<64x256xbf16>, vector<8x256xf32> -> vector<8x256xf32>
    %c56_360 = arith.constant 56 : index
    %c0_361 = arith.constant 0 : index
    %1064 = vector.load %arg10[%c56_360, %c0_361] : memref<64x256xf32, #tpu.memory_space<vmem>>, vector<8x128xf32>
    %1065 = vector.extract_strided_slice %1063 {offsets = [0, 0], sizes = [8, 128], strides = [1, 1]} : vector<8x256xf32> to vector<8x128xf32>
    %1066 = arith.addf %1064, %1065 : vector<8x128xf32>
    %c0_362 = arith.constant 0 : index
    %c128_363 = arith.constant 128 : index
    %1067 = vector.load %arg10[%c0_362, %c128_363] : memref<64x256xf32, #tpu.memory_space<vmem>>, vector<8x128xf32>
    %1068 = vector.extract_strided_slice %1063 {offsets = [0, 128], sizes = [8, 128], strides = [1, 1]} : vector<8x256xf32> to vector<8x128xf32>
    %1069 = arith.addf %1067, %1068 : vector<8x128xf32>
    %1070 = vector.extract_strided_slice %1066 {offsets = [0, 0], sizes = [8, 32], strides = [1, 1]} : vector<8x128xf32> to vector<8x32xf32>
    %1071 = arith.negf %1070 : vector<8x32xf32>
    %1072 = math.exp %1071 : vector<8x32xf32>
    %cst_364 = arith.constant 1.000000e+00 : f32
    %1073 = vector.broadcast %cst_364 : f32 to vector<8x32xf32>
    %1074 = arith.addf %1073, %1072 : vector<8x32xf32>
    %1075 = arith.divf %1073, %1074 : vector<8x32xf32>
    %1076 = vector.extract_strided_slice %1066 {offsets = [0, 32], sizes = [8, 32], strides = [1, 1]} : vector<8x128xf32> to vector<8x32xf32>
    %1077 = arith.negf %1076 : vector<8x32xf32>
    %1078 = math.exp %1077 : vector<8x32xf32>
    %cst_365 = arith.constant 1.000000e+00 : f32
    %1079 = vector.broadcast %cst_365 : f32 to vector<8x32xf32>
    %1080 = arith.addf %1079, %1078 : vector<8x32xf32>
    %1081 = arith.divf %1079, %1080 : vector<8x32xf32>
    %1082 = vector.extract_strided_slice %1066 {offsets = [0, 64], sizes = [8, 32], strides = [1, 1]} : vector<8x128xf32> to vector<8x32xf32>
    %1083 = math.tanh %1082 : vector<8x32xf32>
    %1084 = vector.extract_strided_slice %1066 {offsets = [0, 96], sizes = [8, 32], strides = [1, 1]} : vector<8x128xf32> to vector<8x32xf32>
    %1085 = arith.negf %1084 : vector<8x32xf32>
    %1086 = math.exp %1085 : vector<8x32xf32>
    %cst_366 = arith.constant 1.000000e+00 : f32
    %1087 = vector.broadcast %cst_366 : f32 to vector<8x32xf32>
    %1088 = arith.addf %1087, %1086 : vector<8x32xf32>
    %1089 = arith.divf %1087, %1088 : vector<8x32xf32>
    %1090 = arith.mulf %1081, %1033 : vector<8x32xf32>
    %1091 = arith.mulf %1075, %1083 : vector<8x32xf32>
    %1092 = arith.addf %1090, %1091 : vector<8x32xf32>
    %1093 = math.tanh %1092 : vector<8x32xf32>
    %1094 = arith.mulf %1089, %1093 : vector<8x32xf32>
    %1095 = vector.extract_strided_slice %1069 {offsets = [0, 0], sizes = [8, 32], strides = [1, 1]} : vector<8x128xf32> to vector<8x32xf32>
    %1096 = arith.negf %1095 : vector<8x32xf32>
    %1097 = math.exp %1096 : vector<8x32xf32>
    %cst_367 = arith.constant 1.000000e+00 : f32
    %1098 = vector.broadcast %cst_367 : f32 to vector<8x32xf32>
    %1099 = arith.addf %1098, %1097 : vector<8x32xf32>
    %1100 = arith.divf %1098, %1099 : vector<8x32xf32>
    %1101 = vector.extract_strided_slice %1069 {offsets = [0, 32], sizes = [8, 32], strides = [1, 1]} : vector<8x128xf32> to vector<8x32xf32>
    %1102 = arith.negf %1101 : vector<8x32xf32>
    %1103 = math.exp %1102 : vector<8x32xf32>
    %cst_368 = arith.constant 1.000000e+00 : f32
    %1104 = vector.broadcast %cst_368 : f32 to vector<8x32xf32>
    %1105 = arith.addf %1104, %1103 : vector<8x32xf32>
    %1106 = arith.divf %1104, %1105 : vector<8x32xf32>
    %1107 = vector.extract_strided_slice %1069 {offsets = [0, 64], sizes = [8, 32], strides = [1, 1]} : vector<8x128xf32> to vector<8x32xf32>
    %1108 = math.tanh %1107 : vector<8x32xf32>
    %1109 = vector.extract_strided_slice %1069 {offsets = [0, 96], sizes = [8, 32], strides = [1, 1]} : vector<8x128xf32> to vector<8x32xf32>
    %1110 = arith.negf %1109 : vector<8x32xf32>
    %1111 = math.exp %1110 : vector<8x32xf32>
    %cst_369 = arith.constant 1.000000e+00 : f32
    %1112 = vector.broadcast %cst_369 : f32 to vector<8x32xf32>
    %1113 = arith.addf %1112, %1111 : vector<8x32xf32>
    %1114 = arith.divf %1112, %1113 : vector<8x32xf32>
    %1115 = arith.mulf %1106, %1058 : vector<8x32xf32>
    %1116 = arith.mulf %1100, %1108 : vector<8x32xf32>
    %1117 = arith.addf %1115, %1116 : vector<8x32xf32>
    %1118 = math.tanh %1117 : vector<8x32xf32>
    %1119 = arith.mulf %1114, %1118 : vector<8x32xf32>
    %1120 = tpu.concatenate %1094, %1119 in 1 : vector<8x32xf32>, vector<8x32xf32> -> vector<8x64xf32>
    %1121 = arith.truncf %1120 : vector<8x64xf32> to vector<8x64xbf16>
    %c0_370 = arith.constant 0 : index
    %c0_371 = arith.constant 0 : index
    %1122 = vector.load %arg5[%c0_370, %c0_371] : memref<64x128xbf16, #tpu.memory_space<vmem>>, vector<64x128xbf16>
    %cst_372 = arith.constant dense<0.000000e+00> : vector<8x128xf32>
    %1123 = tpu.matmul %1121, %1122, %cst_372 {dimension_numbers = #tpu.dot_dimension_numbers<[1], [0], [0], [1], [0, 0, 1, 1], [], []>} : vector<8x64xbf16>, vector<64x128xbf16>, vector<8x128xf32> -> vector<8x128xf32>
    %c0_373 = arith.constant 0 : index
    %c0_374 = arith.constant 0 : index
    %1124 = vector.load %arg6[%c0_373, %c0_374] : memref<1x128xf32, #tpu.memory_space<vmem>>, vector<1x128xf32>
    %1125 = vector.broadcast %1124 : vector<1x128xf32> to vector<8x128xf32>
    %1126 = arith.addf %1123, %1125 : vector<8x128xf32>
    %c0_375 = arith.constant 0 : index
    %c0_376 = arith.constant 0 : index
    %1127 = vector.load %arg7[%c0_375, %c0_376] : memref<8x128xf32, #tpu.memory_space<vmem>>, vector<8x128xf32>
    tpu.vector_store %arg7[%c0_375, %c0_376], %1126 {strides = array<i32>} : memref<8x128xf32, #tpu.memory_space<vmem>>, vector<8x128xf32>,
    return
  }
}

</mosaic_0001>

<bundles_post_ra>
// kernel: _lambda_.1
= control target key start
LH: loop header
LB: loop body
LE: loop exit
PB: predicated region body
PF: predicated region fallthrough
CT: control target
= control target key end

     0   :  { %12 = vsyncpa [#allocation7], 0  ;;  %s3833_s0 = inlined_call_operand.vmem [shape: s32[4,8], index: 0, kind: input, shape index: {}]   ;;  %s3834_s1 = inlined_call_operand.vmem [shape: f32[50,32], index: 1, kind: input, shape index: {}]   ;;  %s3835_s2 = inlined_call_operand.hbm [shape: bf16[2,64,256], index: 2, kind: input, shape index: {}]   ;;  %s3836_s3 = inlined_call_operand.hbm [shape: bf16[2,64,256], index: 3, kind: input, shape index: {}]   ;;  %s3837_s4 = inlined_call_operand.vmem [shape: f32[2,1,256], index: 4, kind: input, shape index: {}]   ;;  %s3838_s5 = inlined_call_operand.vmem [shape: bf16[64,128], index: 5, kind: input, shape index: {}]   ;;  %s3839_s6 = inlined_call_operand.vmem [shape: f32[1,128], index: 6, kind: input, shape index: {}]   ;;  %s3840_s7 = inlined_call_operand.vmem [shape: f32[8,128], index: 7, kind: output, shape index: {}]  }
   0x1   :  { %13 = vsyncpa [#allocation6], 0  ;;  %s21_s26 = sshll.u32 %s3833_s0, 4  ;;  %s22_s26 = int_to_ptr.vmem [resolvable:$true] %s21_s26 }
   0x2   :  { %14 = vsyncpa [#allocation10], 0  ;;  %s2956_s27 = scalar_lea.vmem %s22_s26, 64  ;;  %p2961_p1 = scmp.lt.s32.totalorder %s22_s26, %s22_s26 }
   0x3   :  { %p2957_p0 = scmp.ne.s32.totalorder %s22_s26, %s2956_s27  ;;  %p2962_p2 = scmp.lt.s32.totalorder %s2956_s27, %s2956_s27 }
   0x5   :  { %p2963_p3 = por %p2962_p2, %p2961_p1 }
   0x7   :  { %p2964_p4 = pnand %p2963_p3, %p2957_p0 }
   0x9   :  { %2967 = shalt.err (!%p2964_p4)
}
   0xa   :  { %s3018_s28 = smov [#allocation5]   ;;  %s3019_s29 = smov [#allocation8]  }
   0xb   :  { %24 = dma.vmem_to_smem %s22_s26, 64, %s3018_s28, [#allocation7]  }
   0xc   :  { %s32_s30 = sshll.u32 %s3019_s29, 4  ;;  %s2968_s10 = scalar_lea.hbm %s3835_s2, 2048  ;;  %s33_s30 = int_to_ptr.vmem [resolvable:$true] %s32_s30 }
   0xd   :  { %p2969_p5 = scmp.ne.s32.totalorder %s3835_s2, %s2968_s10  ;;  %p2972_p6 = scmp.lt.u32.totalorder %s2968_s10, %s3835_s2 }
   0xf   :  { %p2974_p7 = pnand %p2972_p6, %p2969_p5 }
  0x11   :  { %2977 = shalt.err (!%p2974_p7)
}
  0x12   :  { %s2978_s14 = scalar_lea.vmem %s33_s30, 2048  ;;  %p2983_p9 = scmp.lt.s32.totalorder %s33_s30, %s33_s30 }
  0x13   :  { %p2979_p8 = scmp.ne.s32.totalorder %s33_s30, %s2978_s14  ;;  %p2984_p10 = scmp.lt.s32.totalorder %s2978_s14, %s2978_s14 }
  0x15   :  { %p2985_p11 = por %p2984_p10, %p2983_p9 }
  0x17   :  { %p2986_p12 = pnand %p2985_p11, %p2979_p8 }
  0x19   :  { %2989 = shalt.err (!%p2986_p12)
}
  0x1a   :  { %s3020_s15 = smov 128   ;;  %s3021_s16 = smov 8  }
  0x1b   :  { %38 = dma.hbm_to_vmem [thread:$0]  %s3835_s2, 2048, %s33_s30, [#allocation6], %s3020_s15, %s3020_s15, %s3021_s16  }
  0x1c   :  { %s3022_s19 = smov [#allocation9]   ;;  %s2990_s23 = scalar_lea.hbm %s3836_s3, 2048 }
  0x1d   :  { %s44_s20 = sshll.u32 %s3022_s19, 4  ;;  %p2991_p13 = scmp.ne.s32.totalorder %s3836_s3, %s2990_s23  ;;  %s45_s20 = int_to_ptr.vmem [resolvable:$true] %s44_s20 }
  0x1e   :  { %p2994_p0 = scmp.lt.u32.totalorder %s2990_s23, %s3836_s3 }
  0x20   :  { %p2996_p1 = pnand %p2994_p0, %p2991_p13 }
  0x22   :  { %2999 = shalt.err (!%p2996_p1)
}
  0x23   :  { %s3000_s28 = scalar_lea.vmem %s45_s20, 2048  ;;  %p3005_p3 = scmp.lt.s32.totalorder %s45_s20, %s45_s20 }
  0x24   :  { %p3001_p2 = scmp.ne.s32.totalorder %s45_s20, %s3000_s28  ;;  %p3006_p4 = scmp.lt.s32.totalorder %s3000_s28, %s3000_s28 }
  0x26   :  { %p3007_p5 = por %p3006_p4, %p3005_p3 }
  0x28   :  { %p3008_p6 = pnand %p3007_p5, %p3001_p2 }
  0x2a   :  { %3011 = shalt.err (!%p3008_p6)
}
  0x2b   :  { %50 = dma.hbm_to_vmem [thread:$0]  %s3836_s3, 2048, %s45_s20, [#allocation10], %s3020_s15, %s3020_s15, %s3021_s16  }
  0x2c   :  { %3012 = dma.done.wait [#allocation7], 64  }
  0x2d   :  { %3013 = vsyncadd [#allocation7], 4294967232 }
  0x2e   :  { %3014 = dma.done.wait [#allocation6], 2048  }
  0x2f   :  { %3015 = vsyncadd [#allocation6], 4294965248 }
  0x30   :  { %3016 = dma.done.wait [#allocation10], 2048  }
  0x31   :  { %3017 = vsyncadd [#allocation10], 4294965248 }
  0x32   :  { %66 = sfence }
  0x33   :  { %v2641_v0 = vld [vmem:[#allocation8 + $0x4] ss:$8 sps:$4 sm:$0xff]   ;;  %vm68_vm0 = vcmask 523264   ;;  %v2643_v1 = vld [vmem:[#allocation8] ss:$8 sps:$4 sm:$0xff]   ;;  %v3023_v2 = vmov 0   ;;  %v244_v62 = vlaneseq }
  0x34   :  { %338 = vmatprep.mubr.bf16.mxu0 %v3023_v2  ;;  %470 = vmatprep.mubr.bf16.mxu1 %v3023_v2  ;;  %v3097_v3 = vld [vmem:[#allocation9 + $0x4] ss:$8 sps:$4 sm:$0xff]   ;;  %v3099_v4 = vld [vmem:[#allocation9] ss:$8 sps:$4 sm:$0xff]   ;;  %v3024_v5 = vmov 0.0   ;;  %s85_s3 = sld [smem:[#allocation5]] }
  0x35   :  { %306 = vmatprep.subr.bf16.mxu0 %v2641_v0  ;;  %69 = vst.msk [vmem:[#allocation2] sm:$0xff] %vm68_vm0, %v3024_v5  ;;  %70 = vst.msk [vmem:[#allocation2 + $0x8] sm:$0xff] %vm68_vm0, %v3024_v5  ;;  %v2647_v6 = vld [vmem:[#allocation8 + $0x14] ss:$8 sps:$4 sm:$0xff]   ;;  %v2649_v7 = vld [vmem:[#allocation8 + $0x10] ss:$8 sps:$4 sm:$0xff]   ;;  %438 = vmatprep.subr.bf16.mxu1 %v3097_v3 }
  0x36   :  { %71 = vst.msk [vmem:[#allocation2 + $0x10] sm:$0xff] %vm68_vm0, %v3024_v5  ;;  %72 = vst.msk [vmem:[#allocation2 + $0x18] sm:$0xff] %vm68_vm0, %v3024_v5  ;;  %307 = vmatpush1.bf16.msra.mxu0 %v2643_v1  ;;  %v3134_v8 = vld [vmem:[#allocation9 + $0x14] ss:$8 sps:$4 sm:$0xff]   ;;  %439 = vmatpush1.bf16.msra.mxu1 %v3099_v4  ;;  %v3137_v9 = vld [vmem:[#allocation9 + $0x10] ss:$8 sps:$4 sm:$0xff]  }
  0x37   :  { %73 = vst.msk [vmem:[#allocation2 + $0x20] sm:$0xff] %vm68_vm0, %v3024_v5  ;;  %74 = vst.msk [vmem:[#allocation2 + $0x28] sm:$0xff] %vm68_vm0, %v3024_v5  ;;  %308 = vmatprep.subr.bf16.mxu0 %v2647_v6  ;;  %s2490_s30 = sld [smem:[#allocation5 + $0x80]]  ;;  %440 = vmatprep.subr.bf16.mxu1 %v3134_v8  ;;  %v2653_v10 = vld [vmem:[#allocation8 + $0x24] ss:$8 sps:$4 sm:$0xff]   ;;  %vm88_vm1 = vcmask 253952  }
  0x38   :  { %75 = vst.msk [vmem:[#allocation2 + $0x30] sm:$0xff] %vm68_vm0, %v3024_v5  ;;  %76 = vst.msk [vmem:[#allocation2 + $0x38] sm:$0xff] %vm68_vm0, %v3024_v5  ;;  %v2655_v11 = vld [vmem:[#allocation8 + $0x20] ss:$8 sps:$4 sm:$0xff]   ;;  %v3140_v12 = vld [vmem:[#allocation9 + $0x24] ss:$8 sps:$4 sm:$0xff]  }
  0x39   :  { %77 = vst.msk [vmem:[#allocation3] sm:$0xff] %vm68_vm0, %v3024_v5  ;;  %78 = vst.msk [vmem:[#allocation3 + $0x8] sm:$0xff] %vm68_vm0, %v3024_v5  ;;  %v2659_v13 = vld [vmem:[#allocation8 + $0x34] ss:$8 sps:$4 sm:$0xff]   ;;  %s2491_s8 = sld [smem:[#allocation5 + $0x100]]  ;;  %s3151_s12 = sld [smem:[#allocation5 + $0x1]] }
  0x3a   :  { %79 = vst.msk [vmem:[#allocation3 + $0x10] sm:$0xff] %vm68_vm0, %v3024_v5  ;;  %80 = vst.msk [vmem:[#allocation3 + $0x18] sm:$0xff] %vm68_vm0, %v3024_v5  ;;  %309 = vmatpush1.bf16.msra.mxu0 %v2649_v7  ;;  %441 = vmatpush1.bf16.msra.mxu1 %v3137_v9  ;;  %v3143_v14 = vld [vmem:[#allocation9 + $0x20] ss:$8 sps:$4 sm:$0xff]   ;;  %s2492_s9 = sld [smem:[#allocation5 + $0x180]]  ;;  %s86_s0 = scalar_lea.vmem %s3834_s1, %s85_s3  ;;  %v3375_v63 = vshrl.u32 %v244_v62, 7 }
  0x3b   :  { %81 = vst.msk [vmem:[#allocation3 + $0x20] sm:$0xff] %vm68_vm0, %v3024_v5  ;;  %82 = vst.msk [vmem:[#allocation3 + $0x28] sm:$0xff] %vm68_vm0, %v3024_v5  ;;  %310 = vmatprep.subr.bf16.mxu0 %v2653_v10  ;;  %442 = vmatprep.subr.bf16.mxu1 %v3140_v12  ;;  %v2661_v15 = vld [vmem:[#allocation8 + $0x30] ss:$8 sps:$4 sm:$0xff]   ;;  %v3146_v16 = vld [vmem:[#allocation9 + $0x34] ss:$8 sps:$4 sm:$0xff]  }
  0x3c   :  { %83 = vst.msk [vmem:[#allocation3 + $0x30] sm:$0xff] %vm68_vm0, %v3024_v5  ;;  %84 = vst.msk [vmem:[#allocation3 + $0x38] sm:$0xff] %vm68_vm0, %v3024_v5  ;;  %v3153_v17 = vld [vmem:[#allocation9 + $0x30] ss:$8 sps:$4 sm:$0xff]   ;;  %v87_v18 = vld [vmem:[%s86_s0] sm:$0x1] }
  0x3d   :  { %s91_s15 = scalar_lea.vmem %s3834_s1, %s2490_s30  ;;  %s2494_s16 = sld [smem:[#allocation5 + $0x81]]  ;;  %89 = vst.msk [vmem:[#allocation2] sm:$0x1] %vm88_vm1, %v87_v18  ;;  %v246_v7 = vsub.s32 0, %v3375_v63  ;;  %vm539_vm2 = vcmask 261120   ;;  %vm542_vm3 = vcmask 523520  }
  0x3e   :  { %311 = vmatpush1.bf16.msra.mxu0 %v2655_v11  ;;  %v92_v19 = vld [vmem:[%s91_s15] sm:$0x1]  ;;  %s3159_s17 = sld [smem:[#allocation5 + $0x101]]  ;;  %443 = vmatpush1.bf16.msra.mxu1 %v3143_v14  ;;  %s3165_s19 = sld [smem:[#allocation5 + $0x2]]  ;;  %vm3027_vm4 = vmmov 0  }
  0x3f   :  { %312 = vmatprep.subr.bf16.mxu0 %v2659_v13  ;;  %s3161_s18 = sld [smem:[#allocation5 + $0x181]]  ;;  %93 = vst.msk [vmem:[#allocation2 + $0x1] sm:$0x1] %vm88_vm1, %v92_v19  ;;  %s3167_s20 = sld [smem:[#allocation5 + $0x82]]  ;;  %444 = vmatprep.subr.bf16.mxu1 %v3146_v16  ;;  %v230_v11 = vld [vmem:[%s3837_s4] sm:$0x3] }
  0x40   :  { %s95_s23 = scalar_lea.vmem %s3834_s1, %s2491_s8  ;;  %s3173_s24 = sld [smem:[#allocation5 + $0x102]]  ;;  %v250_v13 = vsub.s32 1, %v3375_v63 }
  0x41   :  { %v96_v20 = vld [vmem:[%s95_s23] sm:$0x1]  ;;  %s99_s27 = scalar_lea.vmem %s3834_s1, %s2492_s9  ;;  %s3178_s28 = sld [smem:[#allocation5 + $0x182]] }
  0x42   :  { %313 = vmatpush1.bf16.msra.mxu0 %v2661_v15  ;;  %97 = vst.msk [vmem:[#allocation2 + $0x2] sm:$0x1] %vm88_vm1, %v96_v20  ;;  %v100_v21 = vld [vmem:[%s99_s27] sm:$0x1]  ;;  %s103_s3 = scalar_lea.vmem %s3834_s1, %s3151_s12  ;;  %s3185_s30 = sld [smem:[#allocation5 + $0x3]]  ;;  %445 = vmatpush1.bf16.msra.mxu1 %v3153_v17  ;;  %v247_v15 = vrot.slane %v230_v11, %v246_v7  ;;  %v251_v18 = vrot.slane %v230_v11, %v250_v13 }
  0x43   :  { %656 = vmatprep.subr.bf16.mxu0 %v3097_v3  ;;  %101 = vst.msk [vmem:[#allocation2 + $0x3] sm:$0x1] %vm88_vm1, %v100_v21  ;;  %v104_v22 = vld [vmem:[%s103_s3] sm:$0x1]  ;;  %s107_s10 = scalar_lea.vmem %s3834_s1, %s2494_s16  ;;  %s3193_s11 = sld [smem:[#allocation5 + $0x83]]  ;;  %548 = vmatprep.subr.bf16.mxu1 %v3097_v3 }
  0x44   :  { %105 = vst.msk [vmem:[#allocation2 + $0x8] sm:$0x1] %vm88_vm1, %v104_v22  ;;  %v108_v23 = vld [vmem:[%s107_s10] sm:$0x1]  ;;  %s111_s13 = scalar_lea.vmem %s3834_s1, %s3159_s17  ;;  %s119_s23 = scalar_lea.vmem %s3834_s1, %s3165_s19 }
  0x45   :  { %s115_s21 = scalar_lea.vmem %s3834_s1, %s3161_s18  ;;  %109 = vst.msk [vmem:[#allocation2 + $0x9] sm:$0x1] %vm88_vm1, %v108_v23  ;;  %v112_v24 = vld [vmem:[%s111_s13] sm:$0x1]  ;;  %s123_s27 = scalar_lea.vmem %s3834_s1, %s3167_s20  ;;  %471 = vmatmul.mubr.bf16.vlgmr.msra.gmra.mrb[0].mxu1 %v3023_v2 }
  0x46   :  { %v116_v25 = vld [vmem:[%s115_s21] sm:$0x1]  ;;  %113 = vst.msk [vmem:[#allocation2 + $0xa] sm:$0x1] %vm88_vm1, %v112_v24  ;;  %s127_s2 = scalar_lea.vmem %s3834_s1, %s3173_s24  ;;  %s3221_s29 = sld [smem:[#allocation5 + $0x103]]  ;;  %549 = vmatpush1.bf16.msra.mxu1 %v3099_v4  ;;  %580 = vmatprep.mubr.bf16.mxu1 %v3023_v2 }
  0x47   :  { %117 = vst.msk [vmem:[#allocation2 + $0xb] sm:$0x1] %vm88_vm1, %v116_v25  ;;  %v120_v26 = vld [vmem:[%s119_s23] sm:$0x1]  ;;  %s131_s3 = scalar_lea.vmem %s3834_s1, %s3178_s28  ;;  %s3229_s8 = sld [smem:[#allocation5 + $0x183]]  ;;  %550 = vmatprep.subr.bf16.mxu1 %v3134_v8 }
  0x48   :  { %v124_v27 = vld [vmem:[%s123_s27] sm:$0x1]  ;;  %121 = vst.msk [vmem:[#allocation2 + $0x10] sm:$0x1] %vm88_vm1, %v120_v26  ;;  %s135_s10 = scalar_lea.vmem %s3834_s1, %s3185_s30  ;;  %s2505_s0 = sld [smem:[#allocation5 + $0x4]] }
  0x49   :  { %125 = vst.msk [vmem:[#allocation2 + $0x11] sm:$0x1] %vm88_vm1, %v124_v27  ;;  %v128_v28 = vld [vmem:[%s127_s2] sm:$0x1]  ;;  %s139_s13 = scalar_lea.vmem %s3834_s1, %s3193_s11  ;;  %s2506_s14 = sld [smem:[#allocation5 + $0x84]] }
  0x4a   :  { %129 = vst.msk [vmem:[#allocation2 + $0x12] sm:$0x1] %vm88_vm1, %v128_v28  ;;  %v132_v29 = vld [vmem:[%s131_s3] sm:$0x1]  ;;  %s3245_s15 = sld [smem:[#allocation5 + $0x104]]  ;;  %s3250_s21 = sld [smem:[#allocation5 + $0x5]]  ;;  %551 = vmatpush1.bf16.msra.mxu1 %v3137_v9 }
  0x4b   :  { %133 = vst.msk [vmem:[#allocation2 + $0x13] sm:$0x1] %vm88_vm1, %v132_v29  ;;  %v136_v30 = vld [vmem:[%s135_s10] sm:$0x1]  ;;  %s3248_s30 = sld [smem:[#allocation5 + $0x184]]  ;;  %s3257_s11 = sld [smem:[#allocation5 + $0x85]]  ;;  %552 = vmatprep.subr.bf16.mxu1 %v3140_v12 }
  0x4c   :  { %v231_v31 = vld [vmem:[#allocation2] sm:$0xff]  ;;  %137 = vst.msk [vmem:[#allocation2 + $0x18] sm:$0x1] %vm88_vm1, %v136_v30  ;;  %s143_s23 = scalar_lea.vmem %s3834_s1, %s3221_s29  ;;  %s3264_s17 = sld [smem:[#allocation5 + $0x105]] }
  0x4d   :  { %v140_v32 = vld [vmem:[%s139_s13] sm:$0x1]  ;;  %s147_s27 = scalar_lea.vmem %s3834_s1, %s3229_s8  ;;  %s3270_s19 = sld [smem:[#allocation5 + $0x185]] }
  0x4e   :  { %141 = vst.msk [vmem:[#allocation2 + $0x19] sm:$0x1] %vm88_vm1, %v140_v32  ;;  %v232_v33 = vld [vmem:[#allocation2 + $0x8] sm:$0xff]  ;;  %v144_v34 = vld [vmem:[%s143_s23] sm:$0x1]  ;;  %s151_s29 = scalar_lea.vmem %s3834_s1, %s2505_s0  ;;  %s3276_s24 = sld [smem:[#allocation5 + $0x6]]  ;;  %553 = vmatpush1.bf16.msra.mxu1 %v3143_v14 }
  0x4f   :  { %v239_v35 = vpack.c.bf16 %v232_v33, %v231_v31  ;;  %145 = vst.msk [vmem:[#allocation2 + $0x1a] sm:$0x1] %vm88_vm1, %v144_v34  ;;  %v148_v36 = vld [vmem:[%s147_s27] sm:$0x1]  ;;  %s155_s8 = scalar_lea.vmem %s3834_s1, %s2506_s14  ;;  %s3285_s28 = sld [smem:[#allocation5 + $0x86]]  ;;  %554 = vmatprep.subr.bf16.mxu1 %v3146_v16 }
  0x50   :  { %149 = vst.msk [vmem:[#allocation2 + $0x1b] sm:$0x1] %vm88_vm1, %v148_v36  ;;  %v152_v37 = vld [vmem:[%s151_s29] sm:$0x1]  ;;  %s159_s0 = scalar_lea.vmem %s3834_s1, %s3245_s15  ;;  %s167_s23 = scalar_lea.vmem %s3834_s1, %s3250_s21 }
  0x51   :  { %2529 = vmatmul.mubr.msk.bf16.vlgmr.msra.gmra.mrb[0].mxu0 %vm68_vm0, %v239_v35  ;;  %153 = vst.msk [vmem:[#allocation2 + $0x20] sm:$0x1] %vm88_vm1, %v152_v37  ;;  %v156_v38 = vld [vmem:[%s155_s8] sm:$0x1]  ;;  %s163_s14 = scalar_lea.vmem %s3834_s1, %s3248_s30  ;;  %s171_s26 = scalar_lea.vmem %s3834_s1, %s3257_s11 }
  0x52   :  { %348 = vmatprep.mubr.bf16.mxu0 %v3023_v2  ;;  %157 = vst.msk [vmem:[#allocation2 + $0x21] sm:$0x1] %vm88_vm1, %v156_v38  ;;  %v160_v39 = vld [vmem:[%s159_s0] sm:$0x1]  ;;  %657 = vmatpush1.bf16.msra.mxu0 %v3099_v4  ;;  %s3304_s27 = sld [smem:[#allocation5 + $0x106]]  ;;  %s175_s18 = scalar_lea.vmem %s3834_s1, %s3264_s17  ;;  %v233_v43 = vld [vmem:[#allocation2 + $0x10] sm:$0xff] }
  0x53   :  { %161 = vst.msk [vmem:[#allocation2 + $0x22] sm:$0x1] %vm88_vm1, %v160_v39  ;;  %v164_v40 = vld [vmem:[%s163_s14] sm:$0x1]  ;;  %658 = vmatprep.subr.bf16.mxu0 %v3134_v8  ;;  %s3313_s2 = sld [smem:[#allocation5 + $0x186]]  ;;  %555 = vmatpush1.bf16.msra.mxu1 %v3153_v17  ;;  %s179_s20 = scalar_lea.vmem %s3834_s1, %s3270_s19 }
  0x54   :  { %v168_v41 = vld [vmem:[%s167_s23] sm:$0x1]  ;;  %165 = vst.msk [vmem:[#allocation2 + $0x23] sm:$0x1] %vm88_vm1, %v164_v40  ;;  %s3321_s3 = sld [smem:[#allocation5 + $0x7]]  ;;  %764 = vmatprep.subr.bf16.mxu1 %v3097_v3  ;;  %s183_s9 = scalar_lea.vmem %s3834_s1, %s3276_s24 }
  0x55   :  { %169 = vst.msk [vmem:[#allocation2 + $0x28] sm:$0x1] %vm88_vm1, %v168_v41  ;;  %v172_v42 = vld [vmem:[%s171_s26] sm:$0x1]  ;;  %s2518_s10 = sld [smem:[#allocation5 + $0x87]]  ;;  %s187_s12 = scalar_lea.vmem %s3834_s1, %s3285_s28 }
  0x56   :  { %173 = vst.msk [vmem:[#allocation2 + $0x29] sm:$0x1] %vm88_vm1, %v172_v42  ;;  %v176_v44 = vld [vmem:[%s175_s18] sm:$0x1]  ;;  %659 = vmatpush1.bf16.msra.mxu0 %v3137_v9  ;;  %s2519_s13 = sld [smem:[#allocation5 + $0x107]] }
  0x57   :  { %177 = vst.msk [vmem:[#allocation2 + $0x2a] sm:$0x1] %vm88_vm1, %v176_v44  ;;  %v180_v45 = vld [vmem:[%s179_s20] sm:$0x1]  ;;  %v234_v46 = vld [vmem:[#allocation2 + $0x18] sm:$0xff]  ;;  %660 = vmatprep.subr.bf16.mxu0 %v3140_v12  ;;  %s2520_s24 = sld [smem:[#allocation5 + $0x187]] }
  0x58   :  { %181 = vst.msk [vmem:[#allocation2 + $0x2b] sm:$0x1] %vm88_vm1, %v180_v45  ;;  %v184_v47 = vld [vmem:[%s183_s9] sm:$0x1]  ;;  %v240_v48 = vpack.c.bf16 %v234_v46, %v233_v43  ;;  %s191_s22 = scalar_lea.vmem %s3834_s1, %s3304_s27  ;;  %s3025_s9 = smov 64  }
  0x59   :  { %185 = vst.msk [vmem:[#allocation2 + $0x30] sm:$0x1] %vm88_vm1, %v184_v47  ;;  %v188_v49 = vld [vmem:[%s187_s12] sm:$0x1]  ;;  %s195_s28 = scalar_lea.vmem %s3834_s1, %s3313_s2 }
  0x5a   :  { %189 = vst.msk [vmem:[#allocation2 + $0x31] sm:$0x1] %vm88_vm1, %v188_v49  ;;  %2530 = vmatmul.mubr.msk.bf16.gmra.mrb[4].mxu0 %vm68_vm0, %v240_v48  ;;  %v192_v50 = vld [vmem:[%s191_s22] sm:$0x1]  ;;  %s199_s30 = scalar_lea.vmem %s3834_s1, %s3321_s3 }
  0x5b   :  { %358 = vmatprep.mubr.bf16.mxu0 %v3023_v2  ;;  %193 = vst.msk [vmem:[#allocation2 + $0x32] sm:$0x1] %vm88_vm1, %v192_v50  ;;  %v196_v51 = vld [vmem:[%s195_s28] sm:$0x1]  ;;  %661 = vmatpush1.bf16.msra.mxu0 %v3143_v14  ;;  %s203_s18 = scalar_lea.vmem %s3834_s1, %s2518_s10  ;;  %s3026_s10 = smov 32  }
  0x5c   :  { %v235_v52 = vld [vmem:[#allocation2 + $0x20] sm:$0xff]  ;;  %197 = vst.msk [vmem:[#allocation2 + $0x33] sm:$0x1] %vm88_vm1, %v196_v51  ;;  %662 = vmatprep.subr.bf16.mxu0 %v3146_v16  ;;  %s207_s29 = scalar_lea.vmem %s3834_s1, %s2519_s13 }
  0x5d   :  { %v200_v53 = vld [vmem:[%s199_s30] sm:$0x1]  ;;  %s211_s17 = scalar_lea.vmem %s3834_s1, %s2520_s24 }
  0x5e   :  { %201 = vst.msk [vmem:[#allocation2 + $0x38] sm:$0x1] %vm88_vm1, %v200_v53  ;;  %v204_v54 = vld [vmem:[%s203_s18] sm:$0x1] }
  0x5f   :  { %v236_v55 = vld [vmem:[#allocation2 + $0x28] sm:$0xff]  ;;  %205 = vst.msk [vmem:[#allocation2 + $0x39] sm:$0x1] %vm88_vm1, %v204_v54  ;;  %v208_v56 = vld [vmem:[%s207_s29] sm:$0x1]  ;;  %663 = vmatpush1.bf16.msra.mxu0 %v3153_v17 }
  0x60   :  { %v241_v57 = vpack.c.bf16 %v236_v55, %v235_v52  ;;  %209 = vst.msk [vmem:[#allocation2 + $0x3a] sm:$0x1] %vm88_vm1, %v208_v56  ;;  %v212_v58 = vld [vmem:[%s211_s17] sm:$0x1]  ;;  %872 = vmatprep.subr.bf16.mxu0 %v3097_v3 }
  0x61   :  { %213 = vst.msk [vmem:[#allocation2 + $0x3b] sm:$0x1] %vm88_vm1, %v212_v58 }
  0x62   :  { %2531 = vmatmul.mubr.msk.bf16.gmra.mrb[8].mxu0 %vm68_vm0, %v241_v57 }
  0x63   :  { %368 = vmatprep.mubr.bf16.mxu0 %v3023_v2  ;;  %v237_v59 = vld [vmem:[#allocation2 + $0x30] sm:$0xff] }
  0x68   :  { %v238_v60 = vld [vmem:[#allocation2 + $0x38] sm:$0xff] }
  0x69   :  { %v242_v61 = vpack.c.bf16 %v238_v60, %v237_v59 }
  0x6b   :  { %2532 = vmatmul.mubr.msk.bf16.gmra.mrb[12].mxu0 %vm68_vm0, %v242_v61 }
  0x6c   :  { %688 = vmatprep.mubr.bf16.mxu0 %v3023_v2 }
 0x118   :  { %v472_v0 = vpop.f32.mrb[0].mxu1 }
 0x119   :  { %v474_v1 = vpop.f32.mrb[1].mxu1 }
 0x11a   :  { %v476_v6 = vpop.f32.mrb[2].mxu1 }
 0x11b   :  { %v477_v10 = vpop.f32.mrb[3].mxu1 }
 0x124   :  { %v340_v19 = vpop.f32.mrb[0].mxu0 }
 0x125   :  { %v341_v20 = vadd.f32 %v340_v19, %v247_v15  ;;  %v342_v21 = vpop.f32.mrb[1].mxu0 }
 0x126   :  { %v3386_v22 = vadd.f32 %v342_v21, %v251_v18  ;;  %v344_v23 = vpop.f32.mrb[2].mxu0 }
 0x127   :  { %v3388_v24 = vadd.f32 %v344_v23, %v247_v15  ;;  %v480_v25 = vadd.f32 %v472_v0, %v341_v20  ;;  %v346_v26 = vpop.f32.mrb[3].mxu0 }
 0x128   :  { %v3390_v27 = vadd.f32 %v346_v26, %v251_v18 }
 0x129   :  { %2693 = vtanh.f32 %v480_v25  ;;  %v2541_v55 = vmul.f32 -1.442695, %v480_v25 }
 0x12d   :  { %v350_v28 = vpop.f32.mrb[4].mxu0 }
 0x12e   :  { %v3392_v29 = vadd.f32 %v350_v28, %v247_v15  ;;  %v352_v30 = vpop.f32.mrb[5].mxu0 }
 0x12f   :  { %v3394_v31 = vadd.f32 %v352_v30, %v251_v18  ;;  %v354_v32 = vpop.f32.mrb[6].mxu0 }
 0x130   :  { %v3396_v33 = vadd.f32 %v354_v32, %v247_v15  ;;  %v356_v34 = vpop.f32.mrb[7].mxu0 }
 0x131   :  { %v3398_v35 = vadd.f32 %v356_v34, %v251_v18 }
 0x133   :  { %v2694_v36 = vpop.eup %2693 }
 0x134   :  { %492 = vrot.lane.b32.xlu0 %v2694_v36, %s3025_s9 }
 0x135   :  { %v360_v37 = vpop.f32.mrb[8].mxu0 }
 0x136   :  { %v3401_v38 = vadd.f32 %v360_v37, %v247_v15  ;;  %v362_v39 = vpop.f32.mrb[9].mxu0 }
 0x137   :  { %v3403_v40 = vadd.f32 %v362_v39, %v251_v18  ;;  %v364_v41 = vpop.f32.mrb[10].mxu0 }
 0x138   :  { %v3405_v42 = vadd.f32 %v364_v41, %v247_v15  ;;  %v366_v43 = vpop.f32.mrb[11].mxu0 }
 0x139   :  { %v3407_v44 = vadd.f32 %v366_v43, %v251_v18 }
 0x13e   :  { %v370_v45 = vpop.f32.mrb[12].mxu0 }
 0x13f   :  { %v3409_v46 = vadd.f32 %v370_v45, %v247_v15  ;;  %v372_v47 = vpop.f32.mrb[13].mxu0 }
 0x140   :  { %v3411_v48 = vadd.f32 %v372_v47, %v251_v18  ;;  %v374_v49 = vpop.f32.mrb[14].mxu0 }
 0x141   :  { %v3413_v50 = vadd.f32 %v374_v49, %v247_v15  ;;  %v376_v51 = vpop.f32.mrb[15].mxu0 }
 0x142   :  { %v377_v52 = vadd.f32 %v376_v51, %v251_v18 }
 0x144   :  { %v482_v53 = vadd.f32 %v474_v1, %v377_v52 }
 0x146   :  { %2695 = vtanh.f32 %v482_v53  ;;  %v2542_v58 = vmul.f32 -1.442695, %v482_v53 }
 0x147   :  { %2697 = vpow2.f32 %v2541_v55 }
 0x150   :  { %v2696_v54 = vpop.eup %2695 }
 0x151   :  { %516 = vrot.lane.b32.xlu0 %v2696_v54, %s3025_s9  ;;  %v2698_v56 = vpop.eup %2697 }
 0x152   :  { %v486_v57 = vadd.f32 1.0, %v2698_v56 }
 0x154   :  { %2699 = vrcp.f32 %v486_v57 }
 0x155   :  { %2701 = vpow2.f32 %v2542_v58 }
 0x15e   :  { %v2700_v59 = vpop.eup %2699 }
 0x15f   :  { %v2702_v62 = vpop.eup %2701  ;;  %v490_v11 = vmul.f32 0.0, %v2700_v59 }
 0x160   :  { %v510_v0 = vadd.f32 1.0, %v2702_v62 }
 0x162   :  { %2703 = vrcp.f32 %v510_v0 }
 0x16c   :  { %v2704_v1 = vpop.eup %2703 }
 0x16d   :  { %v514_v20 = vmul.f32 0.0, %v2704_v1 }
 0x1a6   :  { %v493_v60 = vpop.permute.xlu0 %492 }
 0x1a7   :  { %v495_v61 = vmul.f32 %v2700_v59, %v493_v60 }
 0x1a9   :  { %497 = vrot.lane.b32.xlu1 %v495_v61, %s3026_s10 }
 0x1c3   :  { %v517_v6 = vpop.permute.xlu0 %516 }
 0x1c4   :  { %v519_v10 = vmul.f32 %v2704_v1, %v517_v6 }
 0x1c6   :  { %521 = vrot.lane.b32.xlu1 %v519_v10, %s3026_s10 }
 0x21b   :  { %v498_v15 = vpop.permute.xlu1 %497 }
 0x21c   :  { %v3418_v18 = vadd.f32 %v498_v15, %v490_v11 }
 0x21e   :  { %2705 = vtanh.f32 %v3418_v18 }
 0x228   :  { %v2706_v19 = vpop.eup %2705 }
 0x229   :  { %503 = vrot.lane.b32.xlu0 %v2706_v19, %s3025_s9 }
 0x238   :  { %v522_v21 = vpop.permute.xlu1 %521 }
 0x239   :  { %v524_v23 = vadd.f32 %v522_v21, %v514_v20 }
 0x23b   :  { %2707 = vtanh.f32 %v524_v23 }
 0x245   :  { %v2708_v25 = vpop.eup %2707 }
 0x246   :  { %527 = vrot.lane.b32.xlu1 %v2708_v25, %s3025_s9 }
 0x29b   :  { %v504_v26 = vpop.permute.xlu0 %503 }
 0x29c   :  { %v506_v28 = vmul.f32 %v2700_v59, %v504_v26 }
 0x29e   :  { %532 = vrot.lane.b32.xlu0 %v506_v28, %s3026_s10 }
 0x2b8   :  { %v528_v30 = vpop.permute.xlu1 %527 }
 0x2b9   :  { %v530_v32 = vmul.f32 %v2704_v1, %v528_v30 }
 0x2bb   :  { %536 = vrot.lane.b32.xlu1 %v530_v32, %s3025_s9 }
 0x310   :  { %v533_v34 = vpop.permute.xlu0 %532 }
 0x311   :  { %541 = vst.msk [vmem:[#allocation3] sm:$0xff] %vm539_vm2, %v533_v34 }
 0x32d   :  { %v537_v36 = vpop.permute.xlu1 %536 }
 0x32e   :  { %v540_v37 = vsel %vm539_vm2, %v533_v34, %v537_v36  ;;  %543 = vst.msk [vmem:[#allocation3 + $0x38] sm:$0xff] %vm542_vm3, %v537_v36 }
 0x32f   :  { %v544_v39 = vpack.c.bf16 %v540_v37, %v540_v37 }
 0x331   :  { %2543 = vmatmul.mubr.msk.bf16.vlgmr.msra.gmra.mrb[4].mxu1 %vm68_vm0, %v544_v39 }
 0x332   :  { %765 = vmatpush1.bf16.msra.mxu1 %v3099_v4  ;;  %796 = vmatprep.mubr.bf16.mxu1 %v3023_v2 }
 0x333   :  { %766 = vmatprep.subr.bf16.mxu1 %v3134_v8 }
 0x336   :  { %767 = vmatpush1.bf16.msra.mxu1 %v3137_v9 }
 0x337   :  { %768 = vmatprep.subr.bf16.mxu1 %v3140_v12 }
 0x33a   :  { %769 = vmatpush1.bf16.msra.mxu1 %v3143_v14 }
 0x33b   :  { %770 = vmatprep.subr.bf16.mxu1 %v3146_v16 }
 0x33e   :  { %771 = vmatpush1.bf16.msra.mxu1 %v3153_v17 }
 0x33f   :  { %980 = vmatprep.subr.bf16.mxu1 %v3097_v3 }
 0x404   :  { %v582_v41 = vpop.f32.mrb[4].mxu1 }
 0x405   :  { %v590_v43 = vadd.f32 %v582_v41, %v3388_v24  ;;  %v584_v45 = vpop.f32.mrb[5].mxu1 }
 0x406   :  { %v592_v47 = vadd.f32 %v584_v45, %v3411_v48  ;;  %v586_v49 = vpop.f32.mrb[6].mxu1 }
 0x407   :  { %2709 = vtanh.f32 %v590_v43  ;;  %v587_v51 = vpop.f32.mrb[7].mxu1  ;;  %v2544_v54 = vmul.f32 -1.442695, %v590_v43 }
 0x408   :  { %2711 = vtanh.f32 %v592_v47  ;;  %v2545_v55 = vmul.f32 -1.442695, %v592_v47 }
 0x409   :  { %2713 = vpow2.f32 %v2544_v54 }
 0x40a   :  { %2715 = vpow2.f32 %v2545_v55 }
 0x411   :  { %v2710_v52 = vpop.eup %2709 }
 0x412   :  { %v2712_v53 = vpop.eup %2711  ;;  %602 = vrot.lane.b32.xlu0 %v2710_v52, %s3025_s9 }
 0x413   :  { %626 = vrot.lane.b32.xlu1 %v2712_v53, %s3025_s9  ;;  %v2714_v56 = vpop.eup %2713 }
 0x414   :  { %v2716_v57 = vpop.eup %2715  ;;  %v596_v24 = vadd.f32 1.0, %v2714_v56 }
 0x415   :  { %v620_v58 = vadd.f32 1.0, %v2716_v57 }
 0x416   :  { %2717 = vrcp.f32 %v596_v24 }
 0x417   :  { %2719 = vrcp.f32 %v620_v58 }
 0x420   :  { %v2718_v48 = vpop.eup %2717 }
 0x421   :  { %v2720_v60 = vpop.eup %2719  ;;  %v600_v1 = vmul.f32 %v2718_v48, %v3418_v18 }
 0x422   :  { %v624_v10 = vmul.f32 %v2720_v60, %v524_v23 }
 0x484   :  { %v603_v59 = vpop.permute.xlu0 %602 }
 0x485   :  { %v605_v61 = vmul.f32 %v2718_v48, %v603_v59  ;;  %v627_v62 = vpop.permute.xlu1 %626 }
 0x486   :  { %v629_v0 = vmul.f32 %v2720_v60, %v627_v62 }
 0x487   :  { %607 = vrot.lane.b32.xlu0 %v605_v61, %s3026_s10 }
 0x488   :  { %631 = vrot.lane.b32.xlu1 %v629_v0, %s3026_s10 }
 0x4f9   :  { %v608_v6 = vpop.permute.xlu0 %607 }
 0x4fa   :  { %v610_v11 = vadd.f32 %v608_v6, %v600_v1  ;;  %v632_v15 = vpop.permute.xlu1 %631 }
 0x4fb   :  { %v634_v19 = vadd.f32 %v632_v15, %v624_v10 }
 0x4fc   :  { %2721 = vtanh.f32 %v610_v11 }
 0x4fd   :  { %2723 = vtanh.f32 %v634_v19 }
 0x506   :  { %v2722_v20 = vpop.eup %2721 }
 0x507   :  { %v2724_v21 = vpop.eup %2723  ;;  %613 = vrot.lane.b32.xlu0 %v2722_v20, %s3025_s9 }
 0x508   :  { %637 = vrot.lane.b32.xlu1 %v2724_v21, %s3025_s9 }
 0x579   :  { %v614_v25 = vpop.permute.xlu0 %613 }
 0x57a   :  { %v616_v26 = vmul.f32 %v2718_v48, %v614_v25  ;;  %v638_v28 = vpop.permute.xlu1 %637 }
 0x57b   :  { %v640_v30 = vmul.f32 %v2720_v60, %v638_v28 }
 0x57c   :  { %642 = vrot.lane.b32.xlu0 %v616_v26, %s3026_s10 }
 0x57d   :  { %646 = vrot.lane.b32.xlu1 %v640_v30, %s3025_s9 }
 0x5ee   :  { %v643_v18 = vpop.permute.xlu0 %642 }
 0x5ef   :  { %650 = vst.msk [vmem:[#allocation3 + $0x8] sm:$0xff] %vm539_vm2, %v643_v18  ;;  %v647_v23 = vpop.permute.xlu1 %646 }
 0x5f0   :  { %v649_v32 = vsel %vm539_vm2, %v643_v18, %v647_v23  ;;  %651 = vst.msk [vmem:[#allocation3 + $0x30] sm:$0xff] %vm542_vm3, %v647_v23 }
 0x5f1   :  { %v652_v34 = vpack.c.bf16 %v649_v32, %v649_v32 }
 0x5f3   :  { %2546 = vmatmul.mubr.msk.bf16.vlgmr.msra.gmra.mrb[16].mxu0 %vm68_vm0, %v652_v34 }
 0x5f4   :  { %873 = vmatpush1.bf16.msra.mxu0 %v3099_v4  ;;  %904 = vmatprep.mubr.bf16.mxu0 %v3023_v2 }
 0x5f5   :  { %874 = vmatprep.subr.bf16.mxu0 %v3134_v8 }
 0x5f8   :  { %875 = vmatpush1.bf16.msra.mxu0 %v3137_v9 }
 0x5f9   :  { %876 = vmatprep.subr.bf16.mxu0 %v3140_v12 }
 0x5fc   :  { %877 = vmatpush1.bf16.msra.mxu0 %v3143_v14 }
 0x5fd   :  { %878 = vmatprep.subr.bf16.mxu0 %v3146_v16 }
 0x600   :  { %879 = vmatpush1.bf16.msra.mxu0 %v3153_v17 }
 0x601   :  { %1088 = vmatprep.subr.bf16.mxu0 %v3097_v3 }
 0x6c6   :  { %v690_v36 = vpop.f32.mrb[16].mxu0 }
 0x6c7   :  { %v698_v37 = vadd.f32 %v690_v36, %v3392_v29  ;;  %v692_v39 = vpop.f32.mrb[17].mxu0 }
 0x6c8   :  { %v700_v41 = vadd.f32 %v692_v39, %v3407_v44  ;;  %v694_v43 = vpop.f32.mrb[18].mxu0 }
 0x6c9   :  { %2725 = vtanh.f32 %v698_v37  ;;  %v695_v45 = vpop.f32.mrb[19].mxu0  ;;  %v2547_v51 = vmul.f32 -1.442695, %v698_v37 }
 0x6ca   :  { %2727 = vtanh.f32 %v700_v41  ;;  %v2548_v52 = vmul.f32 -1.442695, %v700_v41 }
 0x6cb   :  { %2729 = vpow2.f32 %v2547_v51 }
 0x6cc   :  { %2731 = vpow2.f32 %v2548_v52 }
 0x6d3   :  { %v2726_v47 = vpop.eup %2725 }
 0x6d4   :  { %v2728_v49 = vpop.eup %2727  ;;  %710 = vrot.lane.b32.xlu0 %v2726_v47, %s3025_s9 }
 0x6d5   :  { %734 = vrot.lane.b32.xlu1 %v2728_v49, %s3025_s9  ;;  %v2730_v53 = vpop.eup %2729 }
 0x6d6   :  { %v2732_v54 = vpop.eup %2731  ;;  %v704_v29 = vadd.f32 1.0, %v2730_v53 }
 0x6d7   :  { %v728_v55 = vadd.f32 1.0, %v2732_v54 }
 0x6d8   :  { %2733 = vrcp.f32 %v704_v29 }
 0x6d9   :  { %2735 = vrcp.f32 %v728_v55 }
 0x6e2   :  { %v2734_v44 = vpop.eup %2733 }
 0x6e3   :  { %v2736_v57 = vpop.eup %2735  ;;  %v708_v59 = vmul.f32 %v2734_v44, %v610_v11 }
 0x6e4   :  { %v732_v61 = vmul.f32 %v2736_v57, %v634_v19 }
 0x746   :  { %v711_v56 = vpop.permute.xlu0 %710 }
 0x747   :  { %v713_v24 = vmul.f32 %v2734_v44, %v711_v56  ;;  %v735_v58 = vpop.permute.xlu1 %734 }
 0x748   :  { %v737_v48 = vmul.f32 %v2736_v57, %v735_v58 }
 0x749   :  { %715 = vrot.lane.b32.xlu0 %v713_v24, %s3026_s10 }
 0x74a   :  { %739 = vrot.lane.b32.xlu1 %v737_v48, %s3026_s10 }
 0x7bb   :  { %v716_v60 = vpop.permute.xlu0 %715 }
 0x7bc   :  { %v718_v62 = vadd.f32 %v716_v60, %v708_v59  ;;  %v740_v0 = vpop.permute.xlu1 %739 }
 0x7bd   :  { %v742_v1 = vadd.f32 %v740_v0, %v732_v61 }
 0x7be   :  { %2737 = vtanh.f32 %v718_v62 }
 0x7bf   :  { %2739 = vtanh.f32 %v742_v1 }
 0x7c8   :  { %v2738_v6 = vpop.eup %2737 }
 0x7c9   :  { %v2740_v10 = vpop.eup %2739  ;;  %721 = vrot.lane.b32.xlu0 %v2738_v6, %s3025_s9  ;;  %v3509_v6 = vld [vmem:[#allocation9 + $0x14] ss:$8 sps:$4 sm:$0xff]  }
 0x7ca   :  { %745 = vrot.lane.b32.xlu1 %v2740_v10, %s3025_s9  ;;  %v3512_v10 = vld [vmem:[#allocation9 + $0x10] ss:$8 sps:$4 sm:$0xff]  }
 0x83b   :  { %v722_v15 = vpop.permute.xlu0 %721 }
 0x83c   :  { %v724_v20 = vmul.f32 %v2734_v44, %v722_v15  ;;  %v746_v21 = vpop.permute.xlu1 %745 }
 0x83d   :  { %v748_v25 = vmul.f32 %v2736_v57, %v746_v21 }
 0x83e   :  { %750 = vrot.lane.b32.xlu0 %v724_v20, %s3026_s10 }
 0x83f   :  { %754 = vrot.lane.b32.xlu1 %v748_v25, %s3025_s9 }
 0x8b0   :  { %v751_v11 = vpop.permute.xlu0 %750 }
 0x8b1   :  { %758 = vst.msk [vmem:[#allocation3 + $0x10] sm:$0xff] %vm539_vm2, %v751_v11  ;;  %v755_v19 = vpop.permute.xlu1 %754 }
 0x8b2   :  { %v757_v26 = vsel %vm539_vm2, %v751_v11, %v755_v19  ;;  %759 = vst.msk [vmem:[#allocation3 + $0x28] sm:$0xff] %vm542_vm3, %v755_v19 }
 0x8b3   :  { %v760_v28 = vpack.c.bf16 %v757_v26, %v757_v26 }
 0x8b5   :  { %2549 = vmatmul.mubr.msk.bf16.vlgmr.msra.gmra.mrb[8].mxu1 %vm68_vm0, %v760_v28 }
 0x8b6   :  { %981 = vmatpush1.bf16.msra.mxu1 %v3099_v4  ;;  %1012 = vmatprep.mubr.bf16.mxu1 %v3023_v2 }
 0x8b7   :  { %982 = vmatprep.subr.bf16.mxu1 %v3134_v8 }
 0x8ba   :  { %983 = vmatpush1.bf16.msra.mxu1 %v3137_v9 }
 0x8bb   :  { %984 = vmatprep.subr.bf16.mxu1 %v3140_v12 }
 0x8be   :  { %985 = vmatpush1.bf16.msra.mxu1 %v3143_v14 }
 0x8bf   :  { %986 = vmatprep.subr.bf16.mxu1 %v3146_v16 }
 0x8c2   :  { %987 = vmatpush1.bf16.msra.mxu1 %v3153_v17 }
 0x8c3   :  { %1196 = vmatprep.subr.bf16.mxu1 %v3097_v3 }
 0x988   :  { %v798_v30 = vpop.f32.mrb[8].mxu1 }
 0x989   :  { %v806_v18 = vadd.f32 %v798_v30, %v3396_v33  ;;  %v800_v4 = vpop.f32.mrb[9].mxu1 }
 0x98a   :  { %v808_v23 = vadd.f32 %v800_v4, %v3403_v40  ;;  %v802_v32 = vpop.f32.mrb[10].mxu1 }
 0x98b   :  { %2741 = vtanh.f32 %v806_v18  ;;  %v803_v8 = vpop.f32.mrb[11].mxu1  ;;  %v2550_v36 = vmul.f32 -1.442695, %v806_v18 }
 0x98c   :  { %2743 = vtanh.f32 %v808_v23  ;;  %v2551_v37 = vmul.f32 -1.442695, %v808_v23 }
 0x98d   :  { %2745 = vpow2.f32 %v2550_v36 }
 0x98e   :  { %2747 = vpow2.f32 %v2551_v37 }
 0x995   :  { %v2742_v9 = vpop.eup %2741 }
 0x996   :  { %v2744_v34 = vpop.eup %2743  ;;  %818 = vrot.lane.b32.xlu0 %v2742_v9, %s3025_s9 }
 0x997   :  { %842 = vrot.lane.b32.xlu1 %v2744_v34, %s3025_s9  ;;  %v2746_v3 = vpop.eup %2745 }
 0x998   :  { %v2748_v39 = vpop.eup %2747  ;;  %v812_v33 = vadd.f32 1.0, %v2746_v3 }
 0x999   :  { %v836_v41 = vadd.f32 1.0, %v2748_v39 }
 0x99a   :  { %2749 = vrcp.f32 %v812_v33 }
 0x99b   :  { %2751 = vrcp.f32 %v836_v41 }
 0x9a4   :  { %v2750_v40 = vpop.eup %2749 }
 0x9a5   :  { %v2752_v45 = vpop.eup %2751  ;;  %v816_v52 = vmul.f32 %v2750_v40, %v718_v62 }
 0x9a6   :  { %v840_v54 = vmul.f32 %v2752_v45, %v742_v1  ;;  %v3505_v1 = vld [vmem:[#allocation9] ss:$8 sps:$4 sm:$0xff]  }
 0xa08   :  { %v819_v43 = vpop.permute.xlu0 %818 }
 0xa09   :  { %v821_v47 = vmul.f32 %v2750_v40, %v819_v43  ;;  %v843_v49 = vpop.permute.xlu1 %842 }
 0xa0a   :  { %v845_v51 = vmul.f32 %v2752_v45, %v843_v49 }
 0xa0b   :  { %823 = vrot.lane.b32.xlu0 %v821_v47, %s3026_s10 }
 0xa0c   :  { %847 = vrot.lane.b32.xlu1 %v845_v51, %s3026_s10 }
 0xa7d   :  { %v824_v53 = vpop.permute.xlu0 %823 }
 0xa7e   :  { %v3491_v29 = vadd.f32 %v824_v53, %v816_v52  ;;  %v848_v55 = vpop.permute.xlu1 %847 }
 0xa7f   :  { %v3493_v44 = vadd.f32 %v848_v55, %v840_v54  ;;  %v2952_v54 = vld [vmem:[#allocation9 + $0x24] ss:$8 sps:$4 sm:$0xff]   ;;  %v2954_v55 = vld [vmem:[#allocation9 + $0x34] ss:$8 sps:$4 sm:$0xff]  }
 0xa80   :  { %2753 = vtanh.f32 %v3491_v29 }
 0xa81   :  { %2755 = vtanh.f32 %v3493_v44 }
 0xa8a   :  { %v2754_v56 = vpop.eup %2753 }
 0xa8b   :  { %v2756_v57 = vpop.eup %2755  ;;  %829 = vrot.lane.b32.xlu0 %v2754_v56, %s3025_s9 }
 0xa8c   :  { %853 = vrot.lane.b32.xlu1 %v2756_v57, %s3025_s9 }
 0xafd   :  { %v830_v24 = vpop.permute.xlu0 %829 }
 0xafe   :  { %v832_v58 = vmul.f32 %v2750_v40, %v830_v24  ;;  %v854_v48 = vpop.permute.xlu1 %853 }
 0xaff   :  { %v856_v59 = vmul.f32 %v2752_v45, %v854_v48 }
 0xb00   :  { %858 = vrot.lane.b32.xlu0 %v832_v58, %s3026_s10 }
 0xb01   :  { %862 = vrot.lane.b32.xlu1 %v856_v59, %s3025_s9 }
 0xb72   :  { %v859_v60 = vpop.permute.xlu0 %858 }
 0xb73   :  { %866 = vst.msk [vmem:[#allocation3 + $0x18] sm:$0xff] %vm539_vm2, %v859_v60  ;;  %v863_v61 = vpop.permute.xlu1 %862 }
 0xb74   :  { %v865_v62 = vsel %vm539_vm2, %v859_v60, %v863_v61  ;;  %867 = vst.msk [vmem:[#allocation3 + $0x20] sm:$0xff] %vm542_vm3, %v863_v61 }
 0xb75   :  { %v868_v0 = vpack.c.bf16 %v865_v62, %v865_v62 }
 0xb77   :  { %2552 = vmatmul.mubr.msk.bf16.vlgmr.msra.gmra.mrb[20].mxu0 %vm68_vm0, %v868_v0 }
 0xb78   :  { %1089 = vmatpush1.bf16.msra.mxu0 %v3505_v1  ;;  %1120 = vmatprep.mubr.bf16.mxu0 %v3023_v2 }
 0xb79   :  { %1090 = vmatprep.subr.bf16.mxu0 %v3509_v6 }
 0xb7c   :  { %1091 = vmatpush1.bf16.msra.mxu0 %v3512_v10 }
 0xb7d   :  { %1092 = vmatprep.subr.bf16.mxu0 %v3140_v12 }
 0xb80   :  { %1093 = vmatpush1.bf16.msra.mxu0 %v3143_v14 }
 0xb81   :  { %1094 = vmatprep.subr.bf16.mxu0 %v3146_v16 }
 0xb84   :  { %1095 = vmatpush1.bf16.msra.mxu0 %v3153_v17 }
 0xc4a   :  { %v906_v15 = vpop.f32.mrb[20].mxu0 }
 0xc4b   :  { %v914_v20 = vadd.f32 %v906_v15, %v3401_v38  ;;  %v908_v21 = vpop.f32.mrb[21].mxu0 }
 0xc4c   :  { %v916_v25 = vadd.f32 %v908_v21, %v3398_v35  ;;  %v910_v11 = vpop.f32.mrb[22].mxu0 }
 0xc4d   :  { %2757 = vtanh.f32 %v914_v20  ;;  %v911_v19 = vpop.f32.mrb[23].mxu0  ;;  %v2553_v12 = vmul.f32 -1.442695, %v914_v20 }
 0xc4e   :  { %2759 = vtanh.f32 %v916_v25  ;;  %v2554_v14 = vmul.f32 -1.442695, %v916_v25 }
 0xc4f   :  { %2761 = vpow2.f32 %v2553_v12 }
 0xc50   :  { %2763 = vpow2.f32 %v2554_v14 }
 0xc57   :  { %v2758_v26 = vpop.eup %2757 }
 0xc58   :  { %v2760_v28 = vpop.eup %2759  ;;  %926 = vrot.lane.b32.xlu0 %v2758_v26, %s3025_s9 }
 0xc59   :  { %950 = vrot.lane.b32.xlu1 %v2760_v28, %s3025_s9  ;;  %v2762_v16 = vpop.eup %2761 }
 0xc5a   :  { %v2764_v17 = vpop.eup %2763  ;;  %v920_v38 = vadd.f32 1.0, %v2762_v16 }
 0xc5b   :  { %v944_v30 = vadd.f32 1.0, %v2764_v17 }
 0xc5c   :  { %2765 = vrcp.f32 %v920_v38 }
 0xc5d   :  { %2767 = vrcp.f32 %v944_v30 }
 0xc66   :  { %v2766_v35 = vpop.eup %2765 }
 0xc67   :  { %v2768_v4 = vpop.eup %2767  ;;  %v924_v9 = vmul.f32 %v2766_v35, %v3491_v29  ;;  %v2953_v29 = vld [vmem:[#allocation9 + $0x20] ss:$8 sps:$4 sm:$0xff]  }
 0xc68   :  { %v948_v36 = vmul.f32 %v2768_v4, %v3493_v44  ;;  %v2955_v44 = vld [vmem:[#allocation9 + $0x30] ss:$8 sps:$4 sm:$0xff]  }
 0xcca   :  { %v927_v18 = vpop.permute.xlu0 %926 }
 0xccb   :  { %v929_v23 = vmul.f32 %v2766_v35, %v927_v18  ;;  %v951_v32 = vpop.permute.xlu1 %950 }
 0xccc   :  { %v953_v8 = vmul.f32 %v2768_v4, %v951_v32 }
 0xccd   :  { %931 = vrot.lane.b32.xlu0 %v929_v23, %s3026_s10 }
 0xcce   :  { %955 = vrot.lane.b32.xlu1 %v953_v8, %s3026_s10 }
 0xd3f   :  { %v932_v34 = vpop.permute.xlu0 %931 }
 0xd40   :  { %v3527_v37 = vadd.f32 %v932_v34, %v924_v9  ;;  %v956_v3 = vpop.permute.xlu1 %955 }
 0xd41   :  { %v3529_v39 = vadd.f32 %v956_v3, %v948_v36 }
 0xd42   :  { %2769 = vtanh.f32 %v3527_v37 }
 0xd43   :  { %2771 = vtanh.f32 %v3529_v39 }
 0xd4c   :  { %v2770_v33 = vpop.eup %2769 }
 0xd4d   :  { %v2772_v41 = vpop.eup %2771  ;;  %937 = vrot.lane.b32.xlu0 %v2770_v33, %s3025_s9 }
 0xd4e   :  { %961 = vrot.lane.b32.xlu1 %v2772_v41, %s3025_s9 }
 0xdbf   :  { %v938_v40 = vpop.permute.xlu0 %937 }
 0xdc0   :  { %v940_v43 = vmul.f32 %v2766_v35, %v938_v40  ;;  %v962_v45 = vpop.permute.xlu1 %961 }
 0xdc1   :  { %v964_v47 = vmul.f32 %v2768_v4, %v962_v45 }
 0xdc2   :  { %966 = vrot.lane.b32.xlu0 %v940_v43, %s3026_s10 }
 0xdc3   :  { %970 = vrot.lane.b32.xlu1 %v964_v47, %s3025_s9 }
 0xe34   :  { %v967_v49 = vpop.permute.xlu0 %966 }
 0xe35   :  { %974 = vst.msk [vmem:[#allocation3 + $0x20] sm:$0xff] %vm539_vm2, %v967_v49  ;;  %v971_v51 = vpop.permute.xlu1 %970 }
 0xe36   :  { %v973_v52 = vsel %vm539_vm2, %v967_v49, %v971_v51  ;;  %975 = vst.msk [vmem:[#allocation3 + $0x18] sm:$0xff] %vm542_vm3, %v971_v51 }
 0xe37   :  { %v976_v53 = vpack.c.bf16 %v973_v52, %v973_v52 }
 0xe39   :  { %2555 = vmatmul.mubr.msk.bf16.vlgmr.msra.gmra.mrb[12].mxu1 %vm68_vm0, %v976_v53 }
 0xe3a   :  { %1197 = vmatpush1.bf16.msra.mxu1 %v3505_v1  ;;  %1228 = vmatprep.mubr.bf16.mxu1 %v3023_v2 }
 0xe3b   :  { %1198 = vmatprep.subr.bf16.mxu1 %v3509_v6 }
 0xe3e   :  { %1199 = vmatpush1.bf16.msra.mxu1 %v3512_v10 }
 0xe3f   :  { %1200 = vmatprep.subr.bf16.mxu1 %v2952_v54 }
 0xe42   :  { %1201 = vmatpush1.bf16.msra.mxu1 %v2953_v29 }
 0xe43   :  { %1202 = vmatprep.subr.bf16.mxu1 %v2954_v55 }
 0xe46   :  { %1203 = vmatpush1.bf16.msra.mxu1 %v2955_v44 }
 0xf0c   :  { %v1014_v56 = vpop.f32.mrb[12].mxu1 }
 0xf0d   :  { %v1022_v57 = vadd.f32 %v1014_v56, %v3405_v42  ;;  %v1016_v24 = vpop.f32.mrb[13].mxu1 }
 0xf0e   :  { %v1024_v58 = vadd.f32 %v1016_v24, %v3394_v31  ;;  %v1018_v48 = vpop.f32.mrb[14].mxu1 }
 0xf0f   :  { %2773 = vtanh.f32 %v1022_v57  ;;  %v1019_v59 = vpop.f32.mrb[15].mxu1  ;;  %v2556_v62 = vmul.f32 -1.442695, %v1022_v57 }
 0xf10   :  { %2775 = vtanh.f32 %v1024_v58  ;;  %v2557_v0 = vmul.f32 -1.442695, %v1024_v58 }
 0xf11   :  { %2777 = vpow2.f32 %v2556_v62 }
 0xf12   :  { %2779 = vpow2.f32 %v2557_v0 }
 0xf19   :  { %v2774_v60 = vpop.eup %2773 }
 0xf1a   :  { %v2776_v61 = vpop.eup %2775  ;;  %1034 = vrot.lane.b32.xlu0 %v2774_v60, %s3025_s9 }
 0xf1b   :  { %1058 = vrot.lane.b32.xlu1 %v2776_v61, %s3025_s9  ;;  %v2778_v1 = vpop.eup %2777 }
 0xf1c   :  { %v2780_v6 = vpop.eup %2779  ;;  %v1028_v42 = vadd.f32 1.0, %v2778_v1 }
 0xf1d   :  { %v1052_v10 = vadd.f32 1.0, %v2780_v6 }
 0xf1e   :  { %2781 = vrcp.f32 %v1028_v42 }
 0xf1f   :  { %2783 = vrcp.f32 %v1052_v10 }
 0xf28   :  { %v2782_v31 = vpop.eup %2781 }
 0xf29   :  { %v2784_v20 = vpop.eup %2783  ;;  %v1032_v19 = vmul.f32 %v2782_v31, %v3527_v37 }
 0xf2a   :  { %v1056_v28 = vmul.f32 %v2784_v20, %v3529_v39 }
 0xf8c   :  { %v1035_v15 = vpop.permute.xlu0 %1034 }
 0xf8d   :  { %v1037_v21 = vmul.f32 %v2782_v31, %v1035_v15  ;;  %v1059_v25 = vpop.permute.xlu1 %1058 }
 0xf8e   :  { %v1061_v11 = vmul.f32 %v2784_v20, %v1059_v25 }
 0xf8f   :  { %1039 = vrot.lane.b32.xlu0 %v1037_v21, %s3026_s10 }
 0xf90   :  { %1063 = vrot.lane.b32.xlu1 %v1061_v11, %s3026_s10 }
0x1001   :  { %v1040_v26 = vpop.permute.xlu0 %1039 }
0x1002   :  { %v1042_v12 = vadd.f32 %v1040_v26, %v1032_v19  ;;  %v1064_v14 = vpop.permute.xlu1 %1063 }
0x1003   :  { %v1066_v16 = vadd.f32 %v1064_v14, %v1056_v28 }
0x1004   :  { %2785 = vtanh.f32 %v1042_v12 }
0x1005   :  { %2787 = vtanh.f32 %v1066_v16 }
0x100e   :  { %v2786_v17 = vpop.eup %2785 }
0x100f   :  { %v2788_v38 = vpop.eup %2787  ;;  %1045 = vrot.lane.b32.xlu0 %v2786_v17, %s3025_s9 }
0x1010   :  { %1069 = vrot.lane.b32.xlu1 %v2788_v38, %s3025_s9 }
0x1081   :  { %v1046_v30 = vpop.permute.xlu0 %1045 }
0x1082   :  { %v1048_v35 = vmul.f32 %v2782_v31, %v1046_v30  ;;  %v1070_v18 = vpop.permute.xlu1 %1069 }
0x1083   :  { %v1072_v4 = vmul.f32 %v2784_v20, %v1070_v18 }
0x1084   :  { %1074 = vrot.lane.b32.xlu0 %v1048_v35, %s3026_s10 }
0x1085   :  { %1078 = vrot.lane.b32.xlu1 %v1072_v4, %s3025_s9 }
0x10f6   :  { %v1075_v23 = vpop.permute.xlu0 %1074 }
0x10f7   :  { %1082 = vst.msk [vmem:[#allocation3 + $0x28] sm:$0xff] %vm539_vm2, %v1075_v23  ;;  %v1079_v32 = vpop.permute.xlu1 %1078 }
0x10f8   :  { %v1081_v8 = vsel %vm539_vm2, %v1075_v23, %v1079_v32  ;;  %1083 = vst.msk [vmem:[#allocation3 + $0x10] sm:$0xff] %vm542_vm3, %v1079_v32 }
0x10f9   :  { %v1084_v9 = vpack.c.bf16 %v1081_v8, %v1081_v8 }
0x10fb   :  { %2558 = vmatmul.mubr.msk.bf16.vlgmr.msra.gmra.mrb[24].mxu0 %vm68_vm0, %v1084_v9 }
0x10fc   :  { %1426 = vmatprep.mubr.bf16.mxu0 %v3023_v2 }
0x11ce   :  { %v1122_v34 = vpop.f32.mrb[24].mxu0 }
0x11cf   :  { %v1130_v36 = vadd.f32 %v1122_v34, %v3409_v46  ;;  %v1124_v37 = vpop.f32.mrb[25].mxu0 }
0x11d0   :  { %v1132_v3 = vadd.f32 %v1124_v37, %v3390_v27  ;;  %v1126_v39 = vpop.f32.mrb[26].mxu0 }
0x11d1   :  { %2789 = vtanh.f32 %v1130_v36  ;;  %v1127_v33 = vpop.f32.mrb[27].mxu0  ;;  %v2559_v43 = vmul.f32 -1.442695, %v1130_v36  ;;  %v2667_v39 = vld [vmem:[#allocation8 + $0x44] ss:$8 sps:$4 sm:$0xff]  }
0x11d2   :  { %2791 = vtanh.f32 %v1132_v3  ;;  %v2560_v45 = vmul.f32 -1.442695, %v1132_v3  ;;  %v2665_v3 = vld [vmem:[#allocation8 + $0x40] ss:$8 sps:$4 sm:$0xff]   ;;  %v3583_v33 = vld [vmem:[#allocation9 + $0x44] ss:$8 sps:$4 sm:$0xff]   ;;  %1394 = vmatprep.subr.bf16.mxu0 %v2667_v39 }
0x11d3   :  { %2793 = vpow2.f32 %v2559_v43  ;;  %1523 = vmatprep.subr.bf16.mxu1 %v3583_v33  ;;  %1395 = vmatpush1.bf16.msra.mxu0 %v2665_v3  ;;  %v2671_v43 = vld [vmem:[#allocation8 + $0x50] ss:$8 sps:$4 sm:$0xff]  }
0x11d4   :  { %2795 = vpow2.f32 %v2560_v45 }
0x11db   :  { %v2790_v41 = vpop.eup %2789 }
0x11dc   :  { %v2792_v40 = vpop.eup %2791  ;;  %1142 = vrot.lane.b32.xlu0 %v2790_v41, %s3025_s9  ;;  %v3585_v41 = vld [vmem:[#allocation9 + $0x40] ss:$8 sps:$4 sm:$0xff]  }
0x11dd   :  { %1166 = vrot.lane.b32.xlu1 %v2792_v40, %s3025_s9  ;;  %v2794_v47 = vpop.eup %2793  ;;  %v2673_v40 = vld [vmem:[#allocation8 + $0x54] ss:$8 sps:$4 sm:$0xff]  }
0x11de   :  { %v2796_v49 = vpop.eup %2795  ;;  %v1136_v46 = vadd.f32 1.0, %v2794_v47  ;;  %1396 = vmatprep.subr.bf16.mxu0 %v2673_v40 }
0x11df   :  { %v1160_v51 = vadd.f32 1.0, %v2796_v49  ;;  %1397 = vmatpush1.bf16.msra.mxu0 %v2671_v43  ;;  %v3591_v49 = vld [vmem:[#allocation9 + $0x54] ss:$8 sps:$4 sm:$0xff]  }
0x11e0   :  { %2797 = vrcp.f32 %v1136_v46  ;;  %v3593_v46 = vld [vmem:[#allocation9 + $0x50] ss:$8 sps:$4 sm:$0xff]  }
0x11e1   :  { %2799 = vrcp.f32 %v1160_v51  ;;  %v2677_v51 = vld [vmem:[#allocation8 + $0x60] ss:$8 sps:$4 sm:$0xff]  }
0x11ea   :  { %v2798_v27 = vpop.eup %2797 }
0x11eb   :  { %v2800_v53 = vpop.eup %2799  ;;  %v1140_v44 = vmul.f32 %v2798_v27, %v1042_v12 }
0x11ec   :  { %v1164_v57 = vmul.f32 %v2800_v53, %v1066_v16 }
0x124e   :  { %v1143_v52 = vpop.permute.xlu0 %1142 }
0x124f   :  { %v1145_v54 = vmul.f32 %v2798_v27, %v1143_v52  ;;  %v1167_v29 = vpop.permute.xlu1 %1166  ;;  %v3596_v52 = vld [vmem:[#allocation9 + $0x64] ss:$8 sps:$4 sm:$0xff]  }
0x1250   :  { %v1169_v55 = vmul.f32 %v2800_v53, %v1167_v29  ;;  %v3602_v29 = vld [vmem:[#allocation9 + $0x74] ss:$8 sps:$4 sm:$0xff]  }
0x1251   :  { %1147 = vrot.lane.b32.xlu0 %v1145_v54, %s3026_s10  ;;  %v2685_v54 = vld [vmem:[#allocation8 + $0x74] ss:$8 sps:$4 sm:$0xff]  }
0x1252   :  { %1171 = vrot.lane.b32.xlu1 %v1169_v55, %s3026_s10  ;;  %v2683_v55 = vld [vmem:[#allocation8 + $0x70] ss:$8 sps:$4 sm:$0xff]  }
0x12c3   :  { %v1148_v56 = vpop.permute.xlu0 %1147 }
0x12c4   :  { %v1150_v24 = vadd.f32 %v1148_v56, %v1140_v44  ;;  %v1172_v58 = vpop.permute.xlu1 %1171  ;;  %v3605_v44 = vld [vmem:[#allocation9 + $0x70] ss:$8 sps:$4 sm:$0xff]  }
0x12c5   :  { %v1174_v48 = vadd.f32 %v1172_v58, %v1164_v57 }
0x12c6   :  { %2801 = vtanh.f32 %v1150_v24 }
0x12c7   :  { %2803 = vtanh.f32 %v1174_v48 }
0x12d0   :  { %v2802_v59 = vpop.eup %2801 }
0x12d1   :  { %v2804_v60 = vpop.eup %2803  ;;  %1153 = vrot.lane.b32.xlu0 %v2802_v59, %s3025_s9 }
0x12d2   :  { %1177 = vrot.lane.b32.xlu1 %v2804_v60, %s3025_s9 }
0x1343   :  { %v1154_v61 = vpop.permute.xlu0 %1153 }
0x1344   :  { %v1156_v62 = vmul.f32 %v2798_v27, %v1154_v61  ;;  %v1178_v0 = vpop.permute.xlu1 %1177  ;;  %v2679_v27 = vld [vmem:[#allocation8 + $0x64] ss:$8 sps:$4 sm:$0xff]  }
0x1345   :  { %v1180_v1 = vmul.f32 %v2800_v53, %v1178_v0  ;;  %v3599_v53 = vld [vmem:[#allocation9 + $0x60] ss:$8 sps:$4 sm:$0xff]   ;;  %1398 = vmatprep.subr.bf16.mxu0 %v2679_v27  ;;  %v1321_v0 = vld [vmem:[#allocation3 + $0x10] sm:$0xff] }
0x1346   :  { %1182 = vrot.lane.b32.xlu0 %v1156_v62, %s3026_s10  ;;  %1399 = vmatpush1.bf16.msra.mxu0 %v2677_v51 }
0x1347   :  { %1186 = vrot.lane.b32.xlu1 %v1180_v1, %s3025_s9  ;;  %1400 = vmatprep.subr.bf16.mxu0 %v2685_v54  ;;  %v1322_v1 = vld [vmem:[#allocation3 + $0x18] sm:$0xff] }
0x134a   :  { %1401 = vmatpush1.bf16.msra.mxu0 %v2683_v55 }
0x134b   :  { %1735 = vmatprep.subr.bf16.mxu0 %v3583_v33 }
0x13b8   :  { %v1183_v6 = vpop.permute.xlu0 %1182 }
0x13b9   :  { %1190 = vst.msk [vmem:[#allocation3 + $0x30] sm:$0xff] %vm539_vm2, %v1183_v6  ;;  %v1187_v42 = vpop.permute.xlu1 %1186 }
0x13ba   :  { %v1189_v10 = vsel %vm539_vm2, %v1183_v6, %v1187_v42  ;;  %1191 = vst.msk [vmem:[#allocation3 + $0x8] sm:$0xff] %vm542_vm3, %v1187_v42  ;;  %v1328_v6 = vpack.c.bf16 %v1322_v1, %v1321_v0  ;;  %v1324_v42 = vld [vmem:[#allocation3 + $0x28] sm:$0xff] }
0x13bb   :  { %v1192_v31 = vpack.c.bf16 %v1189_v10, %v1189_v10  ;;  %v1323_v10 = vld [vmem:[#allocation3 + $0x20] sm:$0xff] }
0x13bd   :  { %2561 = vmatmul.mubr.msk.bf16.vlgmr.msra.gmra.mrb[16].mxu1 %vm68_vm0, %v1192_v31  ;;  %v1329_v31 = vpack.c.bf16 %v1324_v42, %v1323_v10 }
0x13be   :  { %1555 = vmatprep.mubr.bf16.mxu1 %v3023_v2  ;;  %1524 = vmatpush1.bf16.msra.mxu1 %v3585_v41 }
0x13bf   :  { %1525 = vmatprep.subr.bf16.mxu1 %v3591_v49 }
0x13c1   :  { %v1320_v61 = vld [vmem:[#allocation3 + $0x8] sm:$0xff] }
0x13c2   :  { %1526 = vmatpush1.bf16.msra.mxu1 %v3593_v46 }
0x13c3   :  { %1527 = vmatprep.subr.bf16.mxu1 %v3596_v52 }
0x13c6   :  { %1528 = vmatpush1.bf16.msra.mxu1 %v3599_v53 }
0x13c7   :  { %1529 = vmatprep.subr.bf16.mxu1 %v3602_v29 }
0x13ca   :  { %1530 = vmatpush1.bf16.msra.mxu1 %v3605_v44 }
0x13cb   :  { %1629 = vmatprep.subr.bf16.mxu1 %v3583_v33 }
0x13cd   :  { %1556 = vmatmul.mubr.bf16.vlgmr.msra.gmra.mrb[20].mxu1 %v3023_v2 }
0x13ce   :  { %1630 = vmatpush1.bf16.msra.mxu1 %v3585_v41  ;;  %1661 = vmatprep.mubr.bf16.mxu1 %v3023_v2 }
0x13cf   :  { %1631 = vmatprep.subr.bf16.mxu1 %v3591_v49 }
0x13d2   :  { %1632 = vmatpush1.bf16.msra.mxu1 %v3593_v46 }
0x13d3   :  { %1633 = vmatprep.subr.bf16.mxu1 %v3596_v52 }
0x13d6   :  { %1634 = vmatpush1.bf16.msra.mxu1 %v3599_v53 }
0x13d7   :  { %1635 = vmatprep.subr.bf16.mxu1 %v3602_v29 }
0x13da   :  { %1636 = vmatpush1.bf16.msra.mxu1 %v3605_v44 }
0x13db   :  { %1841 = vmatprep.subr.bf16.mxu1 %v3583_v33 }
0x1490   :  { %v1230_v15 = vpop.f32.mrb[16].mxu1 }
0x1491   :  { %v1238_v20 = vadd.f32 %v1230_v15, %v3413_v50  ;;  %v1232_v21 = vpop.f32.mrb[17].mxu1 }
0x1492   :  { %v1240_v25 = vadd.f32 %v1232_v21, %v3386_v22  ;;  %v1234_v11 = vpop.f32.mrb[18].mxu1 }
0x1493   :  { %2805 = vtanh.f32 %v1238_v20  ;;  %v1235_v19 = vpop.f32.mrb[19].mxu1  ;;  %v2562_v12 = vmul.f32 -1.442695, %v1238_v20  ;;  %v1325_v20 = vld [vmem:[#allocation3 + $0x30] sm:$0xff] }
0x1494   :  { %2807 = vtanh.f32 %v1240_v25  ;;  %v2563_v14 = vmul.f32 -1.442695, %v1240_v25 }
0x1495   :  { %2809 = vpow2.f32 %v2562_v12 }
0x1496   :  { %2811 = vpow2.f32 %v2563_v14 }
0x149d   :  { %v2806_v26 = vpop.eup %2805 }
0x149e   :  { %v2808_v28 = vpop.eup %2807  ;;  %1250 = vrot.lane.b32.xlu1 %v2806_v26, %s3025_s9 }
0x149f   :  { %1274 = vrot.lane.b32.xlu0 %v2808_v28, %s3025_s9  ;;  %v2810_v16 = vpop.eup %2809  ;;  %v2564_v28 = vld [vmem:[%s3837_s4 + $0x2] sm:$0x3] }
0x14a0   :  { %v2812_v17 = vpop.eup %2811  ;;  %v1244_v50 = vadd.f32 1.0, %v2810_v16  ;;  %v1557_v25 = vpop.f32.mrb[20].mxu1  ;;  %v1335_v12 = vrot.slane %v2564_v28, %v246_v7  ;;  %v1339_v14 = vrot.slane %v2564_v28, %v250_v13 }
0x14a1   :  { %v1268_v38 = vadd.f32 1.0, %v2812_v17  ;;  %v1559_v11 = vpop.f32.mrb[21].mxu1 }
0x14a2   :  { %2813 = vrcp.f32 %v1244_v50  ;;  %v1561_v19 = vpop.f32.mrb[22].mxu1 }
0x14a3   :  { %2815 = vrcp.f32 %v1268_v38  ;;  %v1562_v26 = vpop.f32.mrb[23].mxu1 }
0x14ac   :  { %v2814_v22 = vpop.eup %2813 }
0x14ad   :  { %v2816_v35 = vpop.eup %2815  ;;  %v1248_v32 = vmul.f32 %v2814_v22, %v1150_v24 }
0x14ae   :  { %v1272_v9 = vmul.f32 %v2816_v35, %v1174_v48 }
0x1510   :  { %v1251_v30 = vpop.permute.xlu1 %1250 }
0x1511   :  { %v1253_v18 = vmul.f32 %v2814_v22, %v1251_v30  ;;  %v1275_v4 = vpop.permute.xlu0 %1274 }
0x1512   :  { %v1277_v23 = vmul.f32 %v2816_v35, %v1275_v4 }
0x1513   :  { %1255 = vrot.lane.b32.xlu1 %v1253_v18, %s3026_s10 }
0x1514   :  { %1279 = vrot.lane.b32.xlu0 %v1277_v23, %s3026_s10 }
0x1585   :  { %v1256_v8 = vpop.permute.xlu1 %1255 }
0x1586   :  { %v1258_v34 = vadd.f32 %v1256_v8, %v1248_v32  ;;  %v1280_v36 = vpop.permute.xlu0 %1279 }
0x1587   :  { %v1282_v37 = vadd.f32 %v1280_v36, %v1272_v9 }
0x1588   :  { %2817 = vtanh.f32 %v1258_v34 }
0x1589   :  { %2819 = vtanh.f32 %v1282_v37 }
0x1592   :  { %v2818_v45 = vpop.eup %2817 }
0x1593   :  { %v2820_v47 = vpop.eup %2819  ;;  %1261 = vrot.lane.b32.xlu1 %v2818_v45, %s3025_s9 }
0x1594   :  { %1285 = vrot.lane.b32.xlu0 %v2820_v47, %s3025_s9 }
0x1605   :  { %v1262_v56 = vpop.permute.xlu1 %1261 }
0x1606   :  { %v1264_v57 = vmul.f32 %v2814_v22, %v1262_v56  ;;  %v1286_v24 = vpop.permute.xlu0 %1285 }
0x1607   :  { %v1288_v58 = vmul.f32 %v2816_v35, %v1286_v24 }
0x1608   :  { %1290 = vrot.lane.b32.xlu1 %v1264_v57, %s3026_s10 }
0x1609   :  { %1295 = vrot.lane.b32.xlu0 %v1288_v58, %s3025_s9 }
0x167a   :  { %v1291_v48 = vpop.permute.xlu1 %1290 }
0x167b   :  { %1293 = vst.msk [vmem:[#allocation3 + $0x38] sm:$0xff] %vm539_vm2, %v1291_v48  ;;  %v1296_v59 = vpop.permute.xlu0 %1295 }
0x167c   :  { %1298 = vst.msk [vmem:[#allocation3] sm:$0xff] %vm542_vm3, %v1296_v59 }
0x1682   :  { %v1326_v15 = vld [vmem:[#allocation3 + $0x38] sm:$0xff] }
0x1683   :  { %v1319_v60 = vld [vmem:[#allocation3] sm:$0xff]  ;;  %v1330_v21 = vpack.c.bf16 %v1326_v15, %v1325_v20 }
0x1684   :  { %v1327_v62 = vpack.c.bf16 %v1320_v61, %v1319_v60 }
0x1686   :  { %2573 = vmatmul.mubr.msk.bf16.vlgmr.msra.gmra.mrb[28].mxu0 %vm68_vm0, %v1327_v62 }
0x1687   :  { %1436 = vmatprep.mubr.bf16.mxu0 %v3023_v2  ;;  %1736 = vmatpush1.bf16.msra.mxu0 %v3585_v41 }
0x1688   :  { %1737 = vmatprep.subr.bf16.mxu0 %v3591_v49 }
0x168b   :  { %1738 = vmatpush1.bf16.msra.mxu0 %v3593_v46 }
0x168c   :  { %1739 = vmatprep.subr.bf16.mxu0 %v3596_v52 }
0x168e   :  { %2574 = vmatmul.mubr.msk.bf16.gmra.mrb[32].mxu0 %vm68_vm0, %v1328_v6 }
0x168f   :  { %1446 = vmatprep.mubr.bf16.mxu0 %v3023_v2  ;;  %1740 = vmatpush1.bf16.msra.mxu0 %v3599_v53 }
0x1690   :  { %1741 = vmatprep.subr.bf16.mxu0 %v3602_v29 }
0x1693   :  { %1742 = vmatpush1.bf16.msra.mxu0 %v3605_v44 }
0x1694   :  { %1947 = vmatprep.subr.bf16.mxu0 %v3583_v33 }
0x1696   :  { %2575 = vmatmul.mubr.msk.bf16.gmra.mrb[36].mxu0 %vm68_vm0, %v1329_v31 }
0x1697   :  { %1456 = vmatprep.mubr.bf16.mxu0 %v3023_v2 }
0x169e   :  { %2576 = vmatmul.mubr.msk.bf16.gmra.mrb[40].mxu0 %vm68_vm0, %v1330_v21 }
0x169f   :  { %1767 = vmatprep.mubr.bf16.mxu0 %v3023_v2 }
0x1759   :  { %v1428_v16 = vpop.f32.mrb[28].mxu0 }
0x175a   :  { %v1429_v17 = vadd.f32 %v1428_v16, %v1335_v12  ;;  %v1430_v50 = vpop.f32.mrb[29].mxu0 }
0x175b   :  { %v3648_v38 = vadd.f32 %v1430_v50, %v1339_v14  ;;  %v1432_v22 = vpop.f32.mrb[30].mxu0 }
0x175c   :  { %v3650_v30 = vadd.f32 %v1432_v22, %v1335_v12  ;;  %v1565_v35 = vadd.f32 %v1557_v25, %v1429_v17  ;;  %v1434_v18 = vpop.f32.mrb[31].mxu0 }
0x175d   :  { %v3652_v4 = vadd.f32 %v1434_v18, %v1339_v14 }
0x175e   :  { %2821 = vtanh.f32 %v1565_v35  ;;  %v2585_v61 = vmul.f32 -1.442695, %v1565_v35 }
0x1761   :  { %v1438_v23 = vpop.f32.mrb[32].mxu0 }
0x1762   :  { %v3654_v32 = vadd.f32 %v1438_v23, %v1335_v12  ;;  %v1440_v7 = vpop.f32.mrb[33].mxu0 }
0x1763   :  { %v3656_v8 = vadd.f32 %v1440_v7, %v1339_v14  ;;  %v1442_v63 = vpop.f32.mrb[34].mxu0 }
0x1764   :  { %v3658_v13 = vadd.f32 %v1442_v63, %v1335_v12  ;;  %v1444_v9 = vpop.f32.mrb[35].mxu0 }
0x1765   :  { %v3660_v34 = vadd.f32 %v1444_v9, %v1339_v14 }
0x1768   :  { %v2822_v36 = vpop.eup %2821 }
0x1769   :  { %v1448_v37 = vpop.f32.mrb[36].mxu0  ;;  %1577 = vrot.lane.b32.xlu0 %v2822_v36, %s3025_s9 }
0x176a   :  { %v3663_v3 = vadd.f32 %v1448_v37, %v1335_v12  ;;  %v1450_v39 = vpop.f32.mrb[37].mxu0 }
0x176b   :  { %v3665_v40 = vadd.f32 %v1450_v39, %v1339_v14  ;;  %v1452_v43 = vpop.f32.mrb[38].mxu0 }
0x176c   :  { %v3667_v45 = vadd.f32 %v1452_v43, %v1335_v12  ;;  %v1454_v47 = vpop.f32.mrb[39].mxu0 }
0x176d   :  { %v3669_v51 = vadd.f32 %v1454_v47, %v1339_v14 }
0x1771   :  { %v1458_v27 = vpop.f32.mrb[40].mxu0 }
0x1772   :  { %v3671_v54 = vadd.f32 %v1458_v27, %v1335_v12  ;;  %v1460_v55 = vpop.f32.mrb[41].mxu0 }
0x1773   :  { %v1461_v56 = vadd.f32 %v1460_v55, %v1339_v14  ;;  %v1462_v57 = vpop.f32.mrb[42].mxu0 }
0x1774   :  { %v3673_v24 = vadd.f32 %v1462_v57, %v1335_v12  ;;  %v1464_v58 = vpop.f32.mrb[43].mxu0 }
0x1775   :  { %v1465_v48 = vadd.f32 %v1464_v58, %v1339_v14 }
0x1777   :  { %v1567_v59 = vadd.f32 %v1559_v11, %v1465_v48 }
0x1779   :  { %2823 = vtanh.f32 %v1567_v59  ;;  %v2586_v1 = vmul.f32 -1.442695, %v1567_v59 }
0x177a   :  { %2825 = vpow2.f32 %v2585_v61 }
0x1783   :  { %v2824_v60 = vpop.eup %2823 }
0x1784   :  { %1601 = vrot.lane.b32.xlu1 %v2824_v60, %s3025_s9  ;;  %v2826_v62 = vpop.eup %2825 }
0x1785   :  { %v1571_v0 = vadd.f32 1.0, %v2826_v62 }
0x1787   :  { %2827 = vrcp.f32 %v1571_v0 }
0x1788   :  { %2829 = vpow2.f32 %v2586_v1 }
0x1791   :  { %v2828_v6 = vpop.eup %2827 }
0x1792   :  { %v2830_v31 = vpop.eup %2829  ;;  %v1575_v11 = vmul.f32 0.0, %v2828_v6 }
0x1793   :  { %v1595_v15 = vadd.f32 1.0, %v2830_v31 }
0x1795   :  { %2831 = vrcp.f32 %v1595_v15 }
0x179f   :  { %v2832_v20 = vpop.eup %2831 }
0x17a0   :  { %v1599_v12 = vmul.f32 0.0, %v2832_v20 }
0x17db   :  { %v1578_v42 = vpop.permute.xlu0 %1577 }
0x17dc   :  { %v1580_v10 = vmul.f32 %v2828_v6, %v1578_v42 }
0x17de   :  { %1582 = vrot.lane.b32.xlu0 %v1580_v10, %s3026_s10 }
0x17f6   :  { %v1602_v21 = vpop.permute.xlu1 %1601 }
0x17f7   :  { %v1604_v25 = vmul.f32 %v2832_v20, %v1602_v21 }
0x17f9   :  { %1606 = vrot.lane.b32.xlu1 %v1604_v25, %s3026_s10 }
0x1850   :  { %v1583_v19 = vpop.permute.xlu0 %1582 }
0x1851   :  { %v1585_v26 = vadd.f32 %v1583_v19, %v1575_v11 }
0x1853   :  { %2833 = vtanh.f32 %v1585_v26 }
0x185d   :  { %v2834_v28 = vpop.eup %2833 }
0x185e   :  { %1588 = vrot.lane.b32.xlu0 %v2834_v28, %s3025_s9 }
0x186b   :  { %v1607_v14 = vpop.permute.xlu1 %1606 }
0x186c   :  { %v1609_v16 = vadd.f32 %v1607_v14, %v1599_v12 }
0x186e   :  { %2835 = vtanh.f32 %v1609_v16 }
0x1878   :  { %v2836_v17 = vpop.eup %2835 }
0x1879   :  { %1612 = vrot.lane.b32.xlu1 %v2836_v17, %s3025_s9 }
0x18d0   :  { %v1589_v50 = vpop.permute.xlu0 %1588 }
0x18d1   :  { %v1591_v22 = vmul.f32 %v2828_v6, %v1589_v50 }
0x18d3   :  { %1617 = vrot.lane.b32.xlu0 %v1591_v22, %s3026_s10 }
0x18eb   :  { %v1613_v35 = vpop.permute.xlu1 %1612 }
0x18ec   :  { %v1615_v18 = vmul.f32 %v2832_v20, %v1613_v35 }
0x18ee   :  { %1621 = vrot.lane.b32.xlu1 %v1615_v18, %s3025_s9 }
0x1945   :  { %v1618_v23 = vpop.permute.xlu0 %1617 }
0x1960   :  { %v1622_v7 = vpop.permute.xlu1 %1621 }
0x1961   :  { %v1624_v63 = vsel %vm539_vm2, %v1618_v23, %v1622_v7 }
0x1962   :  { %v1625_v9 = vpack.c.bf16 %v1624_v63, %v1624_v63 }
0x1964   :  { %2587 = vmatmul.mubr.msk.bf16.vlgmr.msra.gmra.mrb[24].mxu1 %vm68_vm0, %v1625_v9 }
0x1965   :  { %1842 = vmatpush1.bf16.msra.mxu1 %v3585_v41  ;;  %1873 = vmatprep.mubr.bf16.mxu1 %v3023_v2 }
0x1966   :  { %1843 = vmatprep.subr.bf16.mxu1 %v3591_v49 }
0x1969   :  { %1844 = vmatpush1.bf16.msra.mxu1 %v3593_v46 }
0x196a   :  { %1845 = vmatprep.subr.bf16.mxu1 %v3596_v52 }
0x196d   :  { %1846 = vmatpush1.bf16.msra.mxu1 %v3599_v53 }
0x196e   :  { %1847 = vmatprep.subr.bf16.mxu1 %v3602_v29 }
0x1971   :  { %1848 = vmatpush1.bf16.msra.mxu1 %v3605_v44 }
0x1972   :  { %2053 = vmatprep.subr.bf16.mxu1 %v3583_v33 }
0x1a37   :  { %v1663_v36 = vpop.f32.mrb[24].mxu1 }
0x1a38   :  { %v1671_v37 = vadd.f32 %v1663_v36, %v3650_v30  ;;  %v1665_v39 = vpop.f32.mrb[25].mxu1 }
0x1a39   :  { %v1673_v43 = vadd.f32 %v1665_v39, %v1461_v56  ;;  %v1667_v47 = vpop.f32.mrb[26].mxu1 }
0x1a3a   :  { %2837 = vtanh.f32 %v1671_v37  ;;  %v1668_v27 = vpop.f32.mrb[27].mxu1  ;;  %v2588_v58 = vmul.f32 -1.442695, %v1671_v37 }
0x1a3b   :  { %2839 = vtanh.f32 %v1673_v43  ;;  %v2589_v48 = vmul.f32 -1.442695, %v1673_v43 }
0x1a3c   :  { %2841 = vpow2.f32 %v2588_v58 }
0x1a3d   :  { %2843 = vpow2.f32 %v2589_v48 }
0x1a44   :  { %v2838_v55 = vpop.eup %2837 }
0x1a45   :  { %v2840_v57 = vpop.eup %2839  ;;  %1683 = vrot.lane.b32.xlu0 %v2838_v55, %s3025_s9 }
0x1a46   :  { %1707 = vrot.lane.b32.xlu1 %v2840_v57, %s3025_s9  ;;  %v2842_v59 = vpop.eup %2841 }
0x1a47   :  { %v2844_v60 = vpop.eup %2843  ;;  %v1677_v61 = vadd.f32 1.0, %v2842_v59 }
0x1a48   :  { %v1701_v30 = vadd.f32 1.0, %v2844_v60 }
0x1a49   :  { %2845 = vrcp.f32 %v1677_v61 }
0x1a4a   :  { %2847 = vrcp.f32 %v1701_v30 }
0x1a53   :  { %v2846_v56 = vpop.eup %2845 }
0x1a54   :  { %v2848_v0 = vpop.eup %2847  ;;  %v1681_v10 = vmul.f32 %v2846_v56, %v1585_v26 }
0x1a55   :  { %v1705_v15 = vmul.f32 %v2848_v0, %v1609_v16 }
0x1ab7   :  { %v1684_v62 = vpop.permute.xlu0 %1683 }
0x1ab8   :  { %v1686_v1 = vmul.f32 %v2846_v56, %v1684_v62  ;;  %v1708_v6 = vpop.permute.xlu1 %1707 }
0x1ab9   :  { %v1710_v42 = vmul.f32 %v2848_v0, %v1708_v6 }
0x1aba   :  { %1688 = vrot.lane.b32.xlu0 %v1686_v1, %s3026_s10 }
0x1abb   :  { %1712 = vrot.lane.b32.xlu1 %v1710_v42, %s3026_s10 }
0x1b2c   :  { %v1689_v31 = vpop.permute.xlu0 %1688 }
0x1b2d   :  { %v1691_v20 = vadd.f32 %v1689_v31, %v1681_v10  ;;  %v1713_v21 = vpop.permute.xlu1 %1712 }
0x1b2e   :  { %v1715_v25 = vadd.f32 %v1713_v21, %v1705_v15 }
0x1b2f   :  { %2849 = vtanh.f32 %v1691_v20 }
0x1b30   :  { %2851 = vtanh.f32 %v1715_v25 }
0x1b39   :  { %v2850_v11 = vpop.eup %2849 }
0x1b3a   :  { %v2852_v19 = vpop.eup %2851  ;;  %1694 = vrot.lane.b32.xlu0 %v2850_v11, %s3025_s9 }
0x1b3b   :  { %1718 = vrot.lane.b32.xlu1 %v2852_v19, %s3025_s9 }
0x1bac   :  { %v1695_v28 = vpop.permute.xlu0 %1694 }
0x1bad   :  { %v1697_v12 = vmul.f32 %v2846_v56, %v1695_v28  ;;  %v1719_v14 = vpop.permute.xlu1 %1718 }
0x1bae   :  { %v1721_v17 = vmul.f32 %v2848_v0, %v1719_v14 }
0x1baf   :  { %1723 = vrot.lane.b32.xlu0 %v1697_v12, %s3026_s10 }
0x1bb0   :  { %1727 = vrot.lane.b32.xlu1 %v1721_v17, %s3025_s9 }
0x1c21   :  { %v1724_v26 = vpop.permute.xlu0 %1723 }
0x1c22   :  { %v1728_v16 = vpop.permute.xlu1 %1727 }
0x1c23   :  { %v1730_v50 = vsel %vm539_vm2, %v1724_v26, %v1728_v16 }
0x1c24   :  { %v1731_v22 = vpack.c.bf16 %v1730_v50, %v1730_v50 }
0x1c26   :  { %2590 = vmatmul.mubr.msk.bf16.vlgmr.msra.gmra.mrb[44].mxu0 %vm68_vm0, %v1731_v22 }
0x1c27   :  { %1948 = vmatpush1.bf16.msra.mxu0 %v3585_v41  ;;  %1979 = vmatprep.mubr.bf16.mxu0 %v3023_v2 }
0x1c28   :  { %1949 = vmatprep.subr.bf16.mxu0 %v3591_v49 }
0x1c2b   :  { %1950 = vmatpush1.bf16.msra.mxu0 %v3593_v46 }
0x1c2c   :  { %1951 = vmatprep.subr.bf16.mxu0 %v3596_v52 }
0x1c2f   :  { %1952 = vmatpush1.bf16.msra.mxu0 %v3599_v53 }
0x1c30   :  { %1953 = vmatprep.subr.bf16.mxu0 %v3602_v29 }
0x1c33   :  { %1954 = vmatpush1.bf16.msra.mxu0 %v3605_v44 }
0x1c34   :  { %2159 = vmatprep.subr.bf16.mxu0 %v3583_v33 }
0x1cf9   :  { %v1769_v35 = vpop.f32.mrb[44].mxu0 }
0x1cfa   :  { %v1777_v18 = vadd.f32 %v1769_v35, %v3654_v32  ;;  %v1771_v23 = vpop.f32.mrb[45].mxu0 }
0x1cfb   :  { %v1779_v7 = vadd.f32 %v1771_v23, %v3669_v51  ;;  %v1773_v63 = vpop.f32.mrb[46].mxu0 }
0x1cfc   :  { %2853 = vtanh.f32 %v1777_v18  ;;  %v1774_v9 = vpop.f32.mrb[47].mxu0  ;;  %v2591_v39 = vmul.f32 -1.442695, %v1777_v18 }
0x1cfd   :  { %2855 = vtanh.f32 %v1779_v7  ;;  %v2592_v43 = vmul.f32 -1.442695, %v1779_v7 }
0x1cfe   :  { %2857 = vpow2.f32 %v2591_v39 }
0x1cff   :  { %2859 = vpow2.f32 %v2592_v43 }
0x1d06   :  { %v2854_v36 = vpop.eup %2853 }
0x1d07   :  { %v2856_v37 = vpop.eup %2855  ;;  %1789 = vrot.lane.b32.xlu0 %v2854_v36, %s3025_s9 }
0x1d08   :  { %1813 = vrot.lane.b32.xlu1 %v2856_v37, %s3025_s9  ;;  %v2858_v47 = vpop.eup %2857 }
0x1d09   :  { %v2860_v27 = vpop.eup %2859  ;;  %v1783_v32 = vadd.f32 1.0, %v2858_v47 }
0x1d0a   :  { %v1807_v55 = vadd.f32 1.0, %v2860_v27 }
0x1d0b   :  { %2861 = vrcp.f32 %v1783_v32 }
0x1d0c   :  { %2863 = vrcp.f32 %v1807_v55 }
0x1d15   :  { %v2862_v51 = vpop.eup %2861 }
0x1d16   :  { %v2864_v58 = vpop.eup %2863  ;;  %v1787_v61 = vmul.f32 %v2862_v51, %v1691_v20 }
0x1d17   :  { %v1811_v56 = vmul.f32 %v2864_v58, %v1715_v25 }
0x1d79   :  { %v1790_v57 = vpop.permute.xlu0 %1789 }
0x1d7a   :  { %v1792_v48 = vmul.f32 %v2862_v51, %v1790_v57  ;;  %v1814_v59 = vpop.permute.xlu1 %1813 }
0x1d7b   :  { %v1816_v60 = vmul.f32 %v2864_v58, %v1814_v59 }
0x1d7c   :  { %1794 = vrot.lane.b32.xlu0 %v1792_v48, %s3026_s10 }
0x1d7d   :  { %1818 = vrot.lane.b32.xlu1 %v1816_v60, %s3026_s10 }
0x1dee   :  { %v1795_v30 = vpop.permute.xlu0 %1794 }
0x1def   :  { %v1797_v62 = vadd.f32 %v1795_v30, %v1787_v61  ;;  %v1819_v0 = vpop.permute.xlu1 %1818 }
0x1df0   :  { %v1821_v1 = vadd.f32 %v1819_v0, %v1811_v56 }
0x1df1   :  { %2865 = vtanh.f32 %v1797_v62 }
0x1df2   :  { %2867 = vtanh.f32 %v1821_v1 }
0x1dfb   :  { %v2866_v6 = vpop.eup %2865 }
0x1dfc   :  { %v2868_v42 = vpop.eup %2867  ;;  %1800 = vrot.lane.b32.xlu0 %v2866_v6, %s3025_s9 }
0x1dfd   :  { %1824 = vrot.lane.b32.xlu1 %v2868_v42, %s3025_s9 }
0x1e6e   :  { %v1801_v10 = vpop.permute.xlu0 %1800 }
0x1e6f   :  { %v1803_v31 = vmul.f32 %v2862_v51, %v1801_v10  ;;  %v1825_v15 = vpop.permute.xlu1 %1824 }
0x1e70   :  { %v1827_v21 = vmul.f32 %v2864_v58, %v1825_v15 }
0x1e71   :  { %1829 = vrot.lane.b32.xlu0 %v1803_v31, %s3026_s10 }
0x1e72   :  { %1833 = vrot.lane.b32.xlu1 %v1827_v21, %s3025_s9 }
0x1ee3   :  { %v1830_v20 = vpop.permute.xlu0 %1829 }
0x1ee4   :  { %v1834_v25 = vpop.permute.xlu1 %1833 }
0x1ee5   :  { %v1836_v11 = vsel %vm539_vm2, %v1830_v20, %v1834_v25 }
0x1ee6   :  { %v1837_v19 = vpack.c.bf16 %v1836_v11, %v1836_v11 }
0x1ee8   :  { %2593 = vmatmul.mubr.msk.bf16.vlgmr.msra.gmra.mrb[28].mxu1 %vm68_vm0, %v1837_v19 }
0x1ee9   :  { %2054 = vmatpush1.bf16.msra.mxu1 %v3585_v41  ;;  %2085 = vmatprep.mubr.bf16.mxu1 %v3023_v2 }
0x1eea   :  { %2055 = vmatprep.subr.bf16.mxu1 %v3591_v49 }
0x1eed   :  { %2056 = vmatpush1.bf16.msra.mxu1 %v3593_v46 }
0x1eee   :  { %2057 = vmatprep.subr.bf16.mxu1 %v3596_v52 }
0x1ef1   :  { %2058 = vmatpush1.bf16.msra.mxu1 %v3599_v53 }
0x1ef2   :  { %2059 = vmatprep.subr.bf16.mxu1 %v3602_v29 }
0x1ef5   :  { %2060 = vmatpush1.bf16.msra.mxu1 %v3605_v44 }
0x1ef6   :  { %2265 = vmatprep.subr.bf16.mxu1 %v3583_v33 }
0x1fbb   :  { %v1875_v28 = vpop.f32.mrb[28].mxu1 }
0x1fbc   :  { %v1883_v12 = vadd.f32 %v1875_v28, %v3658_v13  ;;  %v1877_v14 = vpop.f32.mrb[29].mxu1 }
0x1fbd   :  { %v1885_v17 = vadd.f32 %v1877_v14, %v3665_v40  ;;  %v1879_v26 = vpop.f32.mrb[30].mxu1 }
0x1fbe   :  { %2869 = vtanh.f32 %v1883_v12  ;;  %v1880_v16 = vpop.f32.mrb[31].mxu1  ;;  %v2594_v35 = vmul.f32 -1.442695, %v1883_v12 }
0x1fbf   :  { %2871 = vtanh.f32 %v1885_v17  ;;  %v2595_v18 = vmul.f32 -1.442695, %v1885_v17 }
0x1fc0   :  { %2873 = vpow2.f32 %v2594_v35 }
0x1fc1   :  { %2875 = vpow2.f32 %v2595_v18 }
0x1fc8   :  { %v2870_v50 = vpop.eup %2869 }
0x1fc9   :  { %v2872_v22 = vpop.eup %2871  ;;  %1895 = vrot.lane.b32.xlu0 %v2870_v50, %s3025_s9 }
0x1fca   :  { %1919 = vrot.lane.b32.xlu1 %v2872_v22, %s3025_s9  ;;  %v2874_v33 = vpop.eup %2873 }
0x1fcb   :  { %v2876_v23 = vpop.eup %2875  ;;  %v1889_v13 = vadd.f32 1.0, %v2874_v33 }
0x1fcc   :  { %v1913_v7 = vadd.f32 1.0, %v2876_v23 }
0x1fcd   :  { %2877 = vrcp.f32 %v1889_v13 }
0x1fce   :  { %2879 = vrcp.f32 %v1913_v7 }
0x1fd7   :  { %v2878_v40 = vpop.eup %2877 }
0x1fd8   :  { %v2880_v9 = vpop.eup %2879  ;;  %v1893_v43 = vmul.f32 %v2878_v40, %v1797_v62 }
0x1fd9   :  { %v1917_v27 = vmul.f32 %v2880_v9, %v1821_v1 }
0x203b   :  { %v1896_v63 = vpop.permute.xlu0 %1895 }
0x203c   :  { %v1898_v36 = vmul.f32 %v2878_v40, %v1896_v63  ;;  %v1920_v37 = vpop.permute.xlu1 %1919 }
0x203d   :  { %v1922_v39 = vmul.f32 %v2880_v9, %v1920_v37 }
0x203e   :  { %1900 = vrot.lane.b32.xlu0 %v1898_v36, %s3026_s10 }
0x203f   :  { %1924 = vrot.lane.b32.xlu1 %v1922_v39, %s3026_s10 }
0x20b0   :  { %v1901_v47 = vpop.permute.xlu0 %1900 }
0x20b1   :  { %v1903_v32 = vadd.f32 %v1901_v47, %v1893_v43  ;;  %v1925_v55 = vpop.permute.xlu1 %1924 }
0x20b2   :  { %v1927_v51 = vadd.f32 %v1925_v55, %v1917_v27 }
0x20b3   :  { %2881 = vtanh.f32 %v1903_v32 }
0x20b4   :  { %2883 = vtanh.f32 %v1927_v51 }
0x20bd   :  { %v2882_v57 = vpop.eup %2881 }
0x20be   :  { %v2884_v58 = vpop.eup %2883  ;;  %1906 = vrot.lane.b32.xlu0 %v2882_v57, %s3025_s9 }
0x20bf   :  { %1930 = vrot.lane.b32.xlu1 %v2884_v58, %s3025_s9 }
0x2130   :  { %v1907_v48 = vpop.permute.xlu0 %1906 }
0x2131   :  { %v1909_v59 = vmul.f32 %v2878_v40, %v1907_v48  ;;  %v1931_v60 = vpop.permute.xlu1 %1930 }
0x2132   :  { %v1933_v61 = vmul.f32 %v2880_v9, %v1931_v60 }
0x2133   :  { %1935 = vrot.lane.b32.xlu0 %v1909_v59, %s3026_s10 }
0x2134   :  { %1939 = vrot.lane.b32.xlu1 %v1933_v61, %s3025_s9 }
0x21a5   :  { %v1936_v30 = vpop.permute.xlu0 %1935 }
0x21a6   :  { %v1940_v56 = vpop.permute.xlu1 %1939 }
0x21a7   :  { %v1942_v62 = vsel %vm539_vm2, %v1936_v30, %v1940_v56 }
0x21a8   :  { %v1943_v0 = vpack.c.bf16 %v1942_v62, %v1942_v62 }
0x21aa   :  { %2596 = vmatmul.mubr.msk.bf16.vlgmr.msra.gmra.mrb[48].mxu0 %vm68_vm0, %v1943_v0 }
0x21ab   :  { %2160 = vmatpush1.bf16.msra.mxu0 %v3585_v41  ;;  %2191 = vmatprep.mubr.bf16.mxu0 %v3023_v2 }
0x21ac   :  { %2161 = vmatprep.subr.bf16.mxu0 %v3591_v49 }
0x21af   :  { %2162 = vmatpush1.bf16.msra.mxu0 %v3593_v46 }
0x21b0   :  { %2163 = vmatprep.subr.bf16.mxu0 %v3596_v52 }
0x21b3   :  { %2164 = vmatpush1.bf16.msra.mxu0 %v3599_v53 }
0x21b4   :  { %2165 = vmatprep.subr.bf16.mxu0 %v3602_v29 }
0x21b7   :  { %2166 = vmatpush1.bf16.msra.mxu0 %v3605_v44 }
0x21b8   :  { %2619 = vmatprep.subr.bf16.mxu0 %v3024_v5 }
0x227d   :  { %v1981_v1 = vpop.f32.mrb[48].mxu0 }
0x227e   :  { %v1989_v6 = vadd.f32 %v1981_v1, %v3663_v3  ;;  %v1983_v42 = vpop.f32.mrb[49].mxu0 }
0x227f   :  { %v1991_v10 = vadd.f32 %v1983_v42, %v3660_v34  ;;  %v1985_v31 = vpop.f32.mrb[50].mxu0 }
0x2280   :  { %2885 = vtanh.f32 %v1989_v6  ;;  %v1986_v15 = vpop.f32.mrb[51].mxu0  ;;  %v2597_v25 = vmul.f32 -1.442695, %v1989_v6 }
0x2281   :  { %2887 = vtanh.f32 %v1991_v10  ;;  %v2598_v11 = vmul.f32 -1.442695, %v1991_v10 }
0x2282   :  { %2889 = vpow2.f32 %v2597_v25 }
0x2283   :  { %2891 = vpow2.f32 %v2598_v11 }
0x228a   :  { %v2886_v21 = vpop.eup %2885 }
0x228b   :  { %v2888_v20 = vpop.eup %2887  ;;  %2001 = vrot.lane.b32.xlu0 %v2886_v21, %s3025_s9 }
0x228c   :  { %2025 = vrot.lane.b32.xlu1 %v2888_v20, %s3025_s9  ;;  %v2890_v19 = vpop.eup %2889 }
0x228d   :  { %v2892_v28 = vpop.eup %2891  ;;  %v1995_v3 = vadd.f32 1.0, %v2890_v19 }
0x228e   :  { %v2019_v12 = vadd.f32 1.0, %v2892_v28 }
0x228f   :  { %2893 = vrcp.f32 %v1995_v3 }
0x2290   :  { %2895 = vrcp.f32 %v2019_v12 }
0x2299   :  { %v2894_v34 = vpop.eup %2893 }
0x229a   :  { %v2896_v17 = vpop.eup %2895  ;;  %v1999_v22 = vmul.f32 %v2894_v34, %v1903_v32 }
0x229b   :  { %v2023_v18 = vmul.f32 %v2896_v17, %v1927_v51 }
0x22fd   :  { %v2002_v14 = vpop.permute.xlu0 %2001 }
0x22fe   :  { %v2004_v26 = vmul.f32 %v2894_v34, %v2002_v14  ;;  %v2026_v16 = vpop.permute.xlu1 %2025 }
0x22ff   :  { %v2028_v50 = vmul.f32 %v2896_v17, %v2026_v16 }
0x2300   :  { %2006 = vrot.lane.b32.xlu0 %v2004_v26, %s3026_s10 }
0x2301   :  { %2030 = vrot.lane.b32.xlu1 %v2028_v50, %s3026_s10 }
0x2372   :  { %v2007_v35 = vpop.permute.xlu0 %2006 }
0x2373   :  { %v2009_v33 = vadd.f32 %v2007_v35, %v1999_v22  ;;  %v2031_v23 = vpop.permute.xlu1 %2030 }
0x2374   :  { %v2033_v13 = vadd.f32 %v2031_v23, %v2023_v18 }
0x2375   :  { %2897 = vtanh.f32 %v2009_v33 }
0x2376   :  { %2899 = vtanh.f32 %v2033_v13 }
0x237f   :  { %v2898_v7 = vpop.eup %2897 }
0x2380   :  { %v2900_v40 = vpop.eup %2899  ;;  %2012 = vrot.lane.b32.xlu0 %v2898_v7, %s3025_s9 }
0x2381   :  { %2036 = vrot.lane.b32.xlu1 %v2900_v40, %s3025_s9 }
0x23f2   :  { %v2013_v63 = vpop.permute.xlu0 %2012 }
0x23f3   :  { %v2015_v9 = vmul.f32 %v2894_v34, %v2013_v63  ;;  %v2037_v36 = vpop.permute.xlu1 %2036 }
0x23f4   :  { %v2039_v37 = vmul.f32 %v2896_v17, %v2037_v36 }
0x23f5   :  { %2041 = vrot.lane.b32.xlu0 %v2015_v9, %s3026_s10 }
0x23f6   :  { %2045 = vrot.lane.b32.xlu1 %v2039_v37, %s3025_s9 }
0x2467   :  { %v2042_v39 = vpop.permute.xlu0 %2041 }
0x2468   :  { %v2046_v43 = vpop.permute.xlu1 %2045 }
0x2469   :  { %v2048_v47 = vsel %vm539_vm2, %v2042_v39, %v2046_v43 }
0x246a   :  { %v2049_v27 = vpack.c.bf16 %v2048_v47, %v2048_v47 }
0x246c   :  { %2599 = vmatmul.mubr.msk.bf16.vlgmr.msra.gmra.mrb[32].mxu1 %vm68_vm0, %v2049_v27 }
0x246d   :  { %2266 = vmatpush1.bf16.msra.mxu1 %v3585_v41  ;;  %2297 = vmatprep.mubr.bf16.mxu1 %v3023_v2 }
0x246e   :  { %2267 = vmatprep.subr.bf16.mxu1 %v3591_v49 }
0x2471   :  { %2268 = vmatpush1.bf16.msra.mxu1 %v3593_v46 }
0x2472   :  { %2269 = vmatprep.subr.bf16.mxu1 %v3596_v52 }
0x2475   :  { %2270 = vmatpush1.bf16.msra.mxu1 %v3599_v53 }
0x2476   :  { %2271 = vmatprep.subr.bf16.mxu1 %v3602_v29 }
0x2479   :  { %2272 = vmatpush1.bf16.msra.mxu1 %v3605_v44 }
0x253f   :  { %v2087_v32 = vpop.f32.mrb[32].mxu1 }
0x2540   :  { %v2095_v55 = vadd.f32 %v2087_v32, %v3667_v45  ;;  %v2089_v51 = vpop.f32.mrb[33].mxu1 }
0x2541   :  { %v2097_v41 = vadd.f32 %v2089_v51, %v3656_v8  ;;  %v2091_v57 = vpop.f32.mrb[34].mxu1 }
0x2542   :  { %2901 = vtanh.f32 %v2095_v55  ;;  %v2092_v2 = vpop.f32.mrb[35].mxu1  ;;  %v2600_v52 = vmul.f32 -1.442695, %v2095_v55 }
0x2543   :  { %2903 = vtanh.f32 %v2097_v41  ;;  %v2601_v53 = vmul.f32 -1.442695, %v2097_v41 }
0x2544   :  { %2905 = vpow2.f32 %v2600_v52 }
0x2545   :  { %2907 = vpow2.f32 %v2601_v53 }
0x254c   :  { %v2902_v49 = vpop.eup %2901 }
0x254d   :  { %v2904_v46 = vpop.eup %2903  ;;  %2107 = vrot.lane.b32.xlu0 %v2902_v49, %s3025_s9 }
0x254e   :  { %2131 = vrot.lane.b32.xlu1 %v2904_v46, %s3025_s9  ;;  %v2906_v29 = vpop.eup %2905 }
0x254f   :  { %v2908_v44 = vpop.eup %2907  ;;  %v2101_v45 = vadd.f32 1.0, %v2906_v29 }
0x2550   :  { %v2125_v58 = vadd.f32 1.0, %v2908_v44 }
0x2551   :  { %2909 = vrcp.f32 %v2101_v45 }
0x2552   :  { %2911 = vrcp.f32 %v2125_v58 }
0x255b   :  { %v2910_v8 = vpop.eup %2909 }
0x255c   :  { %v2912_v59 = vpop.eup %2911  ;;  %v2105_v56 = vmul.f32 %v2910_v8, %v2009_v33 }
0x255d   :  { %v2129_v0 = vmul.f32 %v2912_v59, %v2033_v13 }
0x25bf   :  { %v2108_v48 = vpop.permute.xlu0 %2107 }
0x25c0   :  { %v2110_v60 = vmul.f32 %v2910_v8, %v2108_v48  ;;  %v2132_v61 = vpop.permute.xlu1 %2131 }
0x25c1   :  { %v2134_v30 = vmul.f32 %v2912_v59, %v2132_v61 }
0x25c2   :  { %2112 = vrot.lane.b32.xlu0 %v2110_v60, %s3026_s10 }
0x25c3   :  { %2136 = vrot.lane.b32.xlu1 %v2134_v30, %s3026_s10 }
0x2634   :  { %v2113_v62 = vpop.permute.xlu0 %2112 }
0x2635   :  { %v2115_v1 = vadd.f32 %v2113_v62, %v2105_v56  ;;  %v2137_v6 = vpop.permute.xlu1 %2136 }
0x2636   :  { %v2139_v42 = vadd.f32 %v2137_v6, %v2129_v0 }
0x2637   :  { %2913 = vtanh.f32 %v2115_v1 }
0x2638   :  { %2915 = vtanh.f32 %v2139_v42 }
0x2641   :  { %v2914_v10 = vpop.eup %2913 }
0x2642   :  { %v2916_v31 = vpop.eup %2915  ;;  %2118 = vrot.lane.b32.xlu0 %v2914_v10, %s3025_s9 }
0x2643   :  { %2142 = vrot.lane.b32.xlu1 %v2916_v31, %s3025_s9 }
0x26b4   :  { %v2119_v15 = vpop.permute.xlu0 %2118 }
0x26b5   :  { %v2121_v21 = vmul.f32 %v2910_v8, %v2119_v15  ;;  %v2143_v20 = vpop.permute.xlu1 %2142 }
0x26b6   :  { %v2145_v25 = vmul.f32 %v2912_v59, %v2143_v20 }
0x26b7   :  { %2147 = vrot.lane.b32.xlu0 %v2121_v21, %s3026_s10 }
0x26b8   :  { %2151 = vrot.lane.b32.xlu1 %v2145_v25, %s3025_s9 }
0x2729   :  { %v2148_v11 = vpop.permute.xlu0 %2147 }
0x272a   :  { %v2152_v19 = vpop.permute.xlu1 %2151 }
0x272b   :  { %v2154_v28 = vsel %vm539_vm2, %v2148_v11, %v2152_v19 }
0x272c   :  { %v2155_v3 = vpack.c.bf16 %v2154_v28, %v2154_v28 }
0x272e   :  { %2602 = vmatmul.mubr.msk.bf16.vlgmr.msra.gmra.mrb[52].mxu0 %vm68_vm0, %v2155_v3  ;;  %v2689_v3 = vld [vmem:[%s3838_s5] sm:$0xff]  }
0x272f   :  { %2620 = vmatpush3.bf16.msra.mxu0 %v2689_v3  ;;  %2627 = vmatprep.mubr.msk.bf16.mxu0 %vm3027_vm4, %v3024_v5 }
0x2730   :  { %2621 = vmatprep.subr.bf16.mxu0 %v3024_v5 }
0x2801   :  { %v2193_v12 = vpop.f32.mrb[52].mxu0 }
0x2802   :  { %v2201_v34 = vadd.f32 %v2193_v12, %v3671_v54  ;;  %v2195_v14 = vpop.f32.mrb[53].mxu0  ;;  %v2690_v12 = vld [vmem:[%s3838_s5 + $0x8] sm:$0xff]  }
0x2803   :  { %v2203_v17 = vadd.f32 %v2195_v14, %v3652_v4  ;;  %v2197_v26 = vpop.f32.mrb[54].mxu0  ;;  %2622 = vmatpush3.bf16.msra.mxu0 %v2690_v12 }
0x2804   :  { %2917 = vtanh.f32 %v2201_v34  ;;  %v2198_v16 = vpop.f32.mrb[55].mxu0  ;;  %v2603_v35 = vmul.f32 -1.442695, %v2201_v34  ;;  %v2691_v34 = vld [vmem:[%s3838_s5 + $0x10] sm:$0xff]   ;;  %2623 = vmatprep.subr.bf16.mxu0 %v3024_v5  ;;  %v2692_v26 = vld [vmem:[%s3838_s5 + $0x18] sm:$0xff]  }
0x2805   :  { %2919 = vtanh.f32 %v2203_v17  ;;  %v2604_v18 = vmul.f32 -1.442695, %v2203_v17 }
0x2806   :  { %2921 = vpow2.f32 %v2603_v35 }
0x2807   :  { %2923 = vpow2.f32 %v2604_v18  ;;  %2624 = vmatpush3.bf16.msra.mxu0 %v2691_v34 }
0x2808   :  { %2625 = vmatprep.subr.bf16.mxu0 %v3024_v5 }
0x280b   :  { %2626 = vmatpush3.bf16.msra.mxu0 %v2692_v26 }
0x280e   :  { %v2918_v50 = vpop.eup %2917 }
0x280f   :  { %v2920_v22 = vpop.eup %2919  ;;  %2213 = vrot.lane.b32.xlu0 %v2918_v50, %s3025_s9 }
0x2810   :  { %2237 = vrot.lane.b32.xlu1 %v2920_v22, %s3025_s9  ;;  %v2922_v33 = vpop.eup %2921 }
0x2811   :  { %v2924_v23 = vpop.eup %2923  ;;  %v2207_v54 = vadd.f32 1.0, %v2922_v33 }
0x2812   :  { %v2231_v13 = vadd.f32 1.0, %v2924_v23 }
0x2813   :  { %2925 = vrcp.f32 %v2207_v54 }
0x2814   :  { %2927 = vrcp.f32 %v2231_v13  ;;  %v2608_v13 = vld [vmem:[%s3839_s6] ss:$0 sm:$0xff] }
0x281d   :  { %v2926_v4 = vpop.eup %2925 }
0x281e   :  { %v2928_v40 = vpop.eup %2927  ;;  %v2211_v37 = vmul.f32 %v2926_v4, %v2115_v1 }
0x281f   :  { %v2235_v43 = vmul.f32 %v2928_v40, %v2139_v42 }
0x2881   :  { %v2214_v7 = vpop.permute.xlu0 %2213 }
0x2882   :  { %v2216_v63 = vmul.f32 %v2926_v4, %v2214_v7  ;;  %v2238_v9 = vpop.permute.xlu1 %2237 }
0x2883   :  { %v2240_v36 = vmul.f32 %v2928_v40, %v2238_v9 }
0x2884   :  { %2218 = vrot.lane.b32.xlu0 %v2216_v63, %s3026_s10 }
0x2885   :  { %2242 = vrot.lane.b32.xlu1 %v2240_v36, %s3026_s10 }
0x28f6   :  { %v2219_v39 = vpop.permute.xlu0 %2218 }
0x28f7   :  { %v2221_v47 = vadd.f32 %v2219_v39, %v2211_v37  ;;  %v2243_v27 = vpop.permute.xlu1 %2242 }
0x28f8   :  { %v2245_v32 = vadd.f32 %v2243_v27, %v2235_v43 }
0x28f9   :  { %2929 = vtanh.f32 %v2221_v47 }
0x28fa   :  { %2931 = vtanh.f32 %v2245_v32 }
0x2903   :  { %v2930_v55 = vpop.eup %2929 }
0x2904   :  { %v2932_v51 = vpop.eup %2931  ;;  %2224 = vrot.lane.b32.xlu0 %v2930_v55, %s3025_s9 }
0x2905   :  { %2248 = vrot.lane.b32.xlu1 %v2932_v51, %s3025_s9 }
0x2976   :  { %v2225_v41 = vpop.permute.xlu0 %2224 }
0x2977   :  { %v2227_v57 = vmul.f32 %v2926_v4, %v2225_v41  ;;  %v2249_v2 = vpop.permute.xlu1 %2248 }
0x2978   :  { %v2251_v49 = vmul.f32 %v2928_v40, %v2249_v2 }
0x2979   :  { %2253 = vrot.lane.b32.xlu0 %v2227_v57, %s3026_s10 }
0x297a   :  { %2257 = vrot.lane.b32.xlu1 %v2251_v49, %s3025_s9 }
0x29eb   :  { %v2254_v46 = vpop.permute.xlu0 %2253 }
0x29ec   :  { %v2258_v52 = vpop.permute.xlu1 %2257 }
0x29ed   :  { %v2260_v53 = vsel %vm539_vm2, %v2254_v46, %v2258_v52 }
0x29ee   :  { %v2261_v29 = vpack.c.bf16 %v2260_v53, %v2260_v53 }
0x29f0   :  { %2605 = vmatmul.mubr.msk.bf16.vlgmr.msra.gmra.mrb[36].mxu1 %vm68_vm0, %v2261_v29 }
0x2ac3   :  { %v2299_v44 = vpop.f32.mrb[36].mxu1 }
0x2ac4   :  { %v2307_v45 = vadd.f32 %v2299_v44, %v3673_v24  ;;  %v2301_v58 = vpop.f32.mrb[37].mxu1 }
0x2ac5   :  { %v2309_v8 = vadd.f32 %v2301_v58, %v3648_v38  ;;  %v2303_v48 = vpop.f32.mrb[38].mxu1 }
0x2ac6   :  { %2933 = vtanh.f32 %v2307_v45  ;;  %v2304_v59 = vpop.f32.mrb[39].mxu1  ;;  %v2606_v30 = vmul.f32 -1.442695, %v2307_v45 }
0x2ac7   :  { %2935 = vtanh.f32 %v2309_v8  ;;  %v2607_v56 = vmul.f32 -1.442695, %v2309_v8 }
0x2ac8   :  { %2937 = vpow2.f32 %v2606_v30 }
0x2ac9   :  { %2939 = vpow2.f32 %v2607_v56 }
0x2ad0   :  { %v2934_v60 = vpop.eup %2933 }
0x2ad1   :  { %v2936_v61 = vpop.eup %2935  ;;  %2319 = vrot.lane.b32.xlu0 %v2934_v60, %s3025_s9 }
0x2ad2   :  { %2343 = vrot.lane.b32.xlu1 %v2936_v61, %s3025_s9  ;;  %v2938_v62 = vpop.eup %2937 }
0x2ad3   :  { %v2940_v0 = vpop.eup %2939  ;;  %v2313_v24 = vadd.f32 1.0, %v2938_v62 }
0x2ad4   :  { %v2337_v1 = vadd.f32 1.0, %v2940_v0 }
0x2ad5   :  { %2941 = vrcp.f32 %v2313_v24 }
0x2ad6   :  { %2943 = vrcp.f32 %v2337_v1 }
0x2adf   :  { %v2942_v38 = vpop.eup %2941 }
0x2ae0   :  { %v2944_v42 = vpop.eup %2943  ;;  %v2317_v21 = vmul.f32 %v2942_v38, %v2221_v47 }
0x2ae1   :  { %v2341_v25 = vmul.f32 %v2944_v42, %v2245_v32 }
0x2b43   :  { %v2320_v6 = vpop.permute.xlu0 %2319 }
0x2b44   :  { %v2322_v10 = vmul.f32 %v2942_v38, %v2320_v6  ;;  %v2344_v31 = vpop.permute.xlu1 %2343 }
0x2b45   :  { %v2346_v15 = vmul.f32 %v2944_v42, %v2344_v31 }
0x2b46   :  { %2324 = vrot.lane.b32.xlu0 %v2322_v10, %s3026_s10 }
0x2b47   :  { %2348 = vrot.lane.b32.xlu1 %v2346_v15, %s3026_s10 }
0x2bb8   :  { %v2325_v20 = vpop.permute.xlu0 %2324 }
0x2bb9   :  { %v2327_v11 = vadd.f32 %v2325_v20, %v2317_v21  ;;  %v2349_v19 = vpop.permute.xlu1 %2348 }
0x2bba   :  { %v2351_v28 = vadd.f32 %v2349_v19, %v2341_v25 }
0x2bbb   :  { %2945 = vtanh.f32 %v2327_v11 }
0x2bbc   :  { %2947 = vtanh.f32 %v2351_v28 }
0x2bc5   :  { %v2946_v14 = vpop.eup %2945 }
0x2bc6   :  { %v2948_v17 = vpop.eup %2947  ;;  %2330 = vrot.lane.b32.xlu0 %v2946_v14, %s3025_s9 }
0x2bc7   :  { %2354 = vrot.lane.b32.xlu1 %v2948_v17, %s3025_s9 }
0x2c38   :  { %v2331_v16 = vpop.permute.xlu0 %2330 }
0x2c39   :  { %v2333_v50 = vmul.f32 %v2942_v38, %v2331_v16  ;;  %v2355_v22 = vpop.permute.xlu1 %2354 }
0x2c3a   :  { %v2357_v35 = vmul.f32 %v2944_v42, %v2355_v22 }
0x2c3b   :  { %2359 = vrot.lane.b32.xlu0 %v2333_v50, %s3026_s10 }
0x2c3c   :  { %2363 = vrot.lane.b32.xlu1 %v2357_v35, %s3025_s9 }
0x2cad   :  { %v2360_v18 = vpop.permute.xlu0 %2359 }
0x2cae   :  { %v2364_v33 = vpop.permute.xlu1 %2363 }
0x2caf   :  { %v2366_v23 = vsel %vm539_vm2, %v2360_v18, %v2364_v33 }
0x2cb0   :  { %v2367_v54 = vpack.c.bf16 %v2366_v23, %v2366_v23 }
0x2cb2   :  { %2628 = vmatmul.mubr.msk.bf16.vlgmr.msra.gmra.mrb[56].mxu0 %vm68_vm0, %v2367_v54 }
0x2d85   :  { %v2444_v5 = vpop.f32.mrb[56].mxu0 }
0x2d86   :  { %v2445_v4 = vadd.f32 %v2608_v13, %v2444_v5  ;;  %v2629_v7 = vpop.f32.mrb[57].mxu0 }
0x2d87   :  { %v2447_v40 = vpop.f32.mrb[58].mxu0 }
0x2d88   :  { %2450 = vst [vmem:[%s3840_s7] sm:$0xff] %v2445_v4  ;;  %v2630_v63 = vpop.f32.mrb[59].mxu0 }
0x2d89   :  { %2455 = vsyncpa [#allocation6], 1 }
0x2d8a   :  { %2456 = vsyncpa [#allocation10], 1 }
0x2d8b   :  { %2457 = vsyncpa [#allocation7], 1 }

</bundles_post_ra>
